<compile_context>
chip_gen: v7x
topology: tpu7x:2x2x1
jax: 0.10.0
libtpu: 0.0.40
codegen_flags: <defaults>
</compile_context>

<pallas_src>
import jax
import jax.numpy as jnp
from jax.experimental import pallas as pl
from jax.experimental.pallas import tpu as pltpu

LANE = 128  # TPU lane width


def _round_up(x, m):
    return (x + m - 1) // m * m


def _double_conv_kernel(x_ref, w1_ref, sb1_ref, w2_ref, sb2_ref, o_ref, p_ref):
    # x_ref : (H, W, Cin_p)        one batch element, NHWC, lane-padded
    # w1_ref: (9*Cin_p, Cmid_p)    bf16, im2col layout, tap index = dy*3 + dx
    # sb1_ref: (2, Cmid_p)         f32, row0 = scale, row1 = shift (bias+BN folded)
    # w2_ref: (9*Cmid_p, Cout_p)   bf16
    # sb2_ref: (2, Cout_p)
    # o_ref : (H, W, Cout_p)
    # p_ref : ((H+2)*W, Cmax) f32  vertically zero-padded activation scratch
    H, W, cin = x_ref.shape
    cmid = w1_ref.shape[-1]
    cout = w2_ref.shape[-1]
    cmax = p_ref.shape[-1]
    HW = H * W
    npad = (H + 2) * W

    # Zero the vertical halo rows (one padded image row above / below).  Done
    # unconditionally (2*W rows, trivial) so it stays correct when the parallel
    # grid axis is sharded across TensorCores.
    halo = jnp.zeros((W, cmax), jnp.float32)
    p_ref[0:W, :] = halo
    p_ref[W + HW:npad, :] = halo

    # Column masks on the padded flat coordinate, hoisted once and shared by
    # both convs; folded into the two shifted operands, not applied per tap.
    pcol = jax.lax.broadcasted_iota(jnp.int32, (npad, 1), 0) % W
    mask_l = pcol != 0          # row p of the "+1 roll" holds a valid left neighbour
    mask_r = pcol != W - 1      # row p of the "-1 roll" holds a valid right neighbour

    def conv3x3(c, w_ref):
        # Single im2col matmul.  p_ref[:, :c] holds the vertically padded
        # activation, row p <-> image pixel (p // W - 1, p % W).
        center_f = p_ref[:, 0:c]
        left = jnp.where(mask_l, pltpu.roll(center_f, shift=1, axis=0), 0.0)
        right = jnp.where(mask_r, pltpu.roll(center_f, shift=npad - 1, axis=0), 0.0)
        center = center_f.astype(jnp.bfloat16)
        left = left.astype(jnp.bfloat16)
        right = right.astype(jnp.bfloat16)
        taps = []
        for dy in range(3):                       # oy = dy - 1  (static slices)
            base = dy * W
            for buf in (left, center, right):     # ox = -1, 0, +1
                taps.append(buf[base:base + HW])
        patches = jnp.concatenate(taps, axis=1)   # (HW, 9*c) bf16
        return jnp.dot(patches, w_ref[...],
                       preferred_element_type=jnp.float32)   # (HW, cout) f32

    # ---- conv1 -> BN(eval) -> ReLU ------------------------------------------
    p_ref[W:W + HW, 0:cin] = x_ref[...].astype(jnp.float32).reshape(HW, cin)
    sb1 = sb1_ref[...]
    y1 = conv3x3(cin, w1_ref)
    y1 = jnp.maximum(y1 * sb1[0:1, :] + sb1[1:2, :], 0.0)

    # Stage y1 back into the padded scratch: bounds its live range and reuses
    # the same vertical-halo layout for the second conv.
    p_ref[W:W + HW, 0:cmid] = y1

    # ---- conv2 -> BN(eval) -> ReLU ------------------------------------------
    sb2 = sb2_ref[...]
    y2 = conv3x3(cmid, w2_ref)
    y2 = jnp.maximum(y2 * sb2[0:1, :] + sb2[1:2, :], 0.0)

    o_ref[...] = y2.reshape(H, W, cout).astype(o_ref.dtype)


def double_conv(x_nchw, w1_hwio, sb1, w2_hwio, sb2):
    """x_nchw: (N, Cin, H, W) float32 -> (N, Cout, H, W) float32 (eval-mode)."""
    N, Cin, H, W = x_nchw.shape
    Cmid = w1_hwio.shape[-1]
    Cout = w2_hwio.shape[-1]

    cin_p = _round_up(Cin, LANE)
    cmid_p = _round_up(Cmid, LANE)
    cout_p = _round_up(Cout, LANE)
    cmax = max(cin_p, cmid_p)

    # NCHW -> NHWC, lane-pad channels (no-op at real U-Net widths).
    x = jnp.transpose(x_nchw, (0, 2, 3, 1))
    x = jnp.pad(x, ((0, 0), (0, 0), (0, 0), (0, cin_p - Cin)))

    def pack_w(w_hwio, ci, ci_p, co, co_p):
        # (3,3,ci,co) -> zero-pad channels -> (9*ci_p, co_p) bf16 MXU operand.
        w = jnp.pad(w_hwio, ((0, 0), (0, 0), (0, ci_p - ci), (0, co_p - co)))
        return w.reshape(9 * ci_p, co_p).astype(jnp.bfloat16)

    w1 = pack_w(w1_hwio, Cin, cin_p, Cmid, cmid_p)
    w2 = pack_w(w2_hwio, Cmid, cmid_p, Cout, cout_p)
    sb1p = jnp.pad(sb1, ((0, 0), (0, cmid_p - Cmid)))
    sb2p = jnp.pad(sb2, ((0, 0), (0, cout_p - Cout)))

    out_nhwc = pl.pallas_call(
        _double_conv_kernel,
        out_shape=jax.ShapeDtypeStruct((N, H, W, cout_p), x_nchw.dtype),
        grid_spec=pltpu.PrefetchScalarGridSpec(
            num_scalar_prefetch=0,
            grid=(N,),
            in_specs=[
                pl.BlockSpec((None, H, W, cin_p), lambda n: (n, 0, 0, 0)),
                pl.BlockSpec((9 * cin_p, cmid_p), lambda n: (0, 0)),
                pl.BlockSpec((2, cmid_p), lambda n: (0, 0)),
                pl.BlockSpec((9 * cmid_p, cout_p), lambda n: (0, 0)),
                pl.BlockSpec((2, cout_p), lambda n: (0, 0)),
            ],
            out_specs=pl.BlockSpec((None, H, W, cout_p), lambda n: (n, 0, 0, 0)),
            scratch_shapes=[pltpu.VMEM(((H + 2) * W, cmax), jnp.float32)],
        ),
        compiler_params=pltpu.CompilerParams(
            dimension_semantics=("parallel",),
            # Default scoped VMEM (16/32 MiB) is the usual limiter for large
            # image blocks; 48 MiB fits v5e/v6e (128 MiB) and v7x (64 MiB).
            vmem_limit_bytes=48 * 1024 * 1024),
    )(x, w1, sb1p, w2, sb2p)

    out_nhwc = out_nhwc[..., :Cout]
    return jnp.transpose(out_nhwc, (0, 3, 1, 2))   # back to NCHW


def _ref_double_conv(x_nchw, w1_hwio, sb1, w2_hwio, sb2,
                     operand_dtype=jnp.float32):
    """Pure-JAX reference (PyTorch Conv2d pad=1 + eval BN + ReLU).

    operand_dtype=bfloat16 reproduces the kernel's bf16 MXU operands (with f32
    accumulation) for a tight structural check.
    """
    x = jnp.transpose(x_nchw, (0, 2, 3, 1))

    def conv(v, w):
        return jax.lax.conv_general_dilated(
            v.astype(operand_dtype), w.astype(operand_dtype), (1, 1), "SAME",
            dimension_numbers=("NHWC", "HWIO", "NHWC"),
            preferred_element_type=jnp.float32,
            precision=jax.lax.Precision.HIGHEST)

    y = jnp.maximum(conv(x, w1_hwio) * sb1[0] + sb1[1], 0.0)
    y = jnp.maximum(conv(y, w2_hwio) * sb2[0] + sb2[1], 0.0)
    return jnp.transpose(y, (0, 3, 1, 2))


def _make_params(key, cin, cout, eps=1e-5):
    """Deterministic Conv2d(cin, cout, 3) + BatchNorm2d(cout) parameters, folded."""
    ks = jax.random.split(key, 6)
    w = jax.random.normal(ks[0], (cout, cin, 3, 3), jnp.float32) * 0.1   # OIHW
    b = jax.random.normal(ks[1], (cout,), jnp.float32) * 0.1             # conv bias
    gamma = 1.0 + 0.1 * jax.random.normal(ks[2], (cout,), jnp.float32)
    beta = 0.1 * jax.random.normal(ks[3], (cout,), jnp.float32)
    rmean = 0.1 * jax.random.normal(ks[4], (cout,), jnp.float32)
    rvar = 0.5 + jax.nn.softplus(jax.random.normal(ks[5], (cout,), jnp.float32))
    scale = gamma / jnp.sqrt(rvar + eps)
    shift = (b - rmean) * scale + beta           # conv bias folded into BN shift
    w_hwio = jnp.transpose(w, (2, 3, 1, 0))      # (3, 3, cin, cout)
    sb = jnp.stack([scale, shift], axis=0)       # (2, cout)
    return w_hwio, sb


if __name__ == "__main__":
    key = jax.random.PRNGKey(0)
    kx, k1, k2 = jax.random.split(key, 3)

    N, IN_CH, OUT_CH, H, W = 2, 4, 8, 16, 16
    x = jax.random.normal(kx, (N, IN_CH, H, W), jnp.float32)   # NCHW, as PyTorch

    w1_hwio, sb1 = _make_params(k1, IN_CH, OUT_CH)
    w2_hwio, sb2 = _make_params(k2, OUT_CH, OUT_CH)

    out = double_conv(x, w1_hwio, sb1, w2_hwio, sb2)
    out = jax.block_until_ready(out)
    assert out.shape == (N, OUT_CH, H, W), out.shape

    # Tight check against a bf16-operand / f32-accumulate reference (same
    # rounding as the kernel's MXU matmuls) -> catches indexing/layout bugs.
    ref_bf16 = _ref_double_conv(x, w1_hwio, sb1, w2_hwio, sb2,
                                operand_dtype=jnp.bfloat16)
    err_bf16 = float(jnp.max(jnp.abs(out - ref_bf16)))
    assert jnp.allclose(out, ref_bf16, atol=2e-2, rtol=2e-2), err_bf16

    # Looser check against the full-f32 HIGHEST reference (tolerance loosened
    # because the kernel uses bf16 MXU operands, per the perf review).
    ref_f32 = _ref_double_conv(x, w1_hwio, sb1, w2_hwio, sb2)
    err_f32 = float(jnp.max(jnp.abs(out - ref_f32)))
    assert jnp.allclose(out, ref_f32, atol=5e-2, rtol=5e-2), err_f32

    print("KERNEL_OK")
</pallas_src>

<mosaic_0001>
module attributes {stable_mosaic.version = 11 : i64} {
  func.func @_double_conv_kernel(%arg0: i32, %arg1: memref<1x16x16x128xf32, #tpu.memory_space<vmem>>, %arg2: memref<1152x128xbf16, #tpu.memory_space<vmem>>, %arg3: memref<2x128xf32, #tpu.memory_space<vmem>>, %arg4: memref<1152x128xbf16, #tpu.memory_space<vmem>>, %arg5: memref<2x128xf32, #tpu.memory_space<vmem>>, %arg6: memref<1x16x16x128xf32, #tpu.memory_space<vmem>>, %arg7: memref<288x128xf32, #tpu.memory_space<vmem>>) attributes {dimension_semantics = [#tpu.dimension_semantics<parallel>], iteration_bounds = array<i64: 2>, scalar_prefetch = 0 : i64, scratch_operands = 1 : i64, tpu.core_type = #tpu.core_type<tc>, window_params = [{transform_indices = @transform_0, window_bounds = array<i64: 1, 16, 16, 128>}, {pipeline_mode = #tpu.pipeline_mode<synchronous>, transform_indices = @transform_1, window_bounds = array<i64: 1152, 128>}, {pipeline_mode = #tpu.pipeline_mode<synchronous>, transform_indices = @transform_2, window_bounds = array<i64: 2, 128>}, {pipeline_mode = #tpu.pipeline_mode<synchronous>, transform_indices = @transform_3, window_bounds = array<i64: 1152, 128>}, {pipeline_mode = #tpu.pipeline_mode<synchronous>, transform_indices = @transform_4, window_bounds = array<i64: 2, 128>}, {transform_indices = @transform_5, window_bounds = array<i64: 1, 16, 16, 128>}]} {
    %cst = arith.constant 0.000000e+00 : f32
    %0 = vector.broadcast %cst : f32 to vector<16x128xf32>
    %c0 = arith.constant 0 : index
    %c0_0 = arith.constant 0 : index
    %1 = vector.load %arg7[%c0, %c0_0] : memref<288x128xf32, #tpu.memory_space<vmem>>, vector<16x128xf32>
    tpu.vector_store %arg7[%c0, %c0_0], %0 {strides = array<i32>} : memref<288x128xf32, #tpu.memory_space<vmem>>, vector<16x128xf32>,
    %c272 = arith.constant 272 : index
    %c0_1 = arith.constant 0 : index
    %2 = vector.load %arg7[%c272, %c0_1] : memref<288x128xf32, #tpu.memory_space<vmem>>, vector<16x128xf32>
    tpu.vector_store %arg7[%c272, %c0_1], %0 {strides = array<i32>} : memref<288x128xf32, #tpu.memory_space<vmem>>, vector<16x128xf32>,
    %3 = tpu.iota {dimensions = array<i32: 0>} : vector<288x1xi32>
    %c16_i32 = arith.constant 16 : i32
    %c0_i32 = arith.constant 0 : i32
    %4 = arith.cmpi eq, %c16_i32, %c0_i32 : i32
    %c1_i32 = arith.constant 1 : i32
    %5 = arith.select %4, %c1_i32, %c16_i32 : i32
    %6 = vector.broadcast %5 : i32 to vector<288x1xi32>
    %7 = arith.remsi %3, %6 : vector<288x1xi32>
    %c0_i32_2 = arith.constant 0 : i32
    %8 = vector.broadcast %c0_i32_2 : i32 to vector<288x1xi32>
    %9 = arith.cmpi ne, %7, %8 : vector<288x1xi32>
    %c0_i32_3 = arith.constant 0 : i32
    %10 = vector.broadcast %c0_i32_3 : i32 to vector<288x1xi32>
    %11 = arith.cmpi slt, %7, %10 : vector<288x1xi32>
    %c0_i32_4 = arith.constant 0 : i32
    %12 = arith.cmpi slt, %5, %c0_i32_4 : i32
    %13 = vector.broadcast %12 : i1 to vector<288x1xi1>
    %14 = vector.broadcast %13 : vector<288x1xi1> to vector<288x1xi1>
    %15 = arith.xori %11, %14 : vector<288x1xi1>
    %16 = arith.andi %15, %9 : vector<288x1xi1>
    %17 = vector.broadcast %5 : i32 to vector<288x1xi32>
    %18 = arith.addi %7, %17 : vector<288x1xi32>
    %19 = arith.select %16, %18, %7 : vector<288x1xi1>, vector<288x1xi32>
    %c0_i32_5 = arith.constant 0 : i32
    %20 = vector.broadcast %c0_i32_5 : i32 to vector<288x1xi32>
    %21 = arith.cmpi ne, %19, %20 : vector<288x1xi32>
    %c15_i32 = arith.constant 15 : i32
    %22 = vector.broadcast %c15_i32 : i32 to vector<288x1xi32>
    %23 = arith.cmpi ne, %19, %22 : vector<288x1xi32>
    %c0_6 = arith.constant 0 : index
    %c0_7 = arith.constant 0 : index
    %c0_8 = arith.constant 0 : index
    %c0_9 = arith.constant 0 : index
    %24 = vector.load %arg1[%c0_6, %c0_7, %c0_8, %c0_9] : memref<1x16x16x128xf32, #tpu.memory_space<vmem>>, vector<1x16x16x128xf32>
    %25 = vector.shape_cast %24 : vector<1x16x16x128xf32> to vector<16x16x128xf32>
    %26 = vector.shape_cast %25 : vector<16x16x128xf32> to vector<256x128xf32>
    %c16 = arith.constant 16 : index
    %c0_10 = arith.constant 0 : index
    %27 = vector.load %arg7[%c16, %c0_10] : memref<288x128xf32, #tpu.memory_space<vmem>>, vector<256x128xf32>
    tpu.vector_store %arg7[%c16, %c0_10], %26 {strides = array<i32>} : memref<288x128xf32, #tpu.memory_space<vmem>>, vector<256x128xf32>,
    %c0_11 = arith.constant 0 : index
    %c0_12 = arith.constant 0 : index
    %28 = vector.load %arg3[%c0_11, %c0_12] : memref<2x128xf32, #tpu.memory_space<vmem>>, vector<2x128xf32>
    %c0_13 = arith.constant 0 : index
    %c0_14 = arith.constant 0 : index
    %29 = vector.load %arg7[%c0_13, %c0_14] : memref<288x128xf32, #tpu.memory_space<vmem>>, vector<288x128xf32>
    %c1_i32_15 = arith.constant 1 : i32
    %30 = tpu.dynamic_rotate %29 by %c1_i32_15 dim 0 : vector<288x128xf32>, i32 -> vector<288x128xf32>
    %cst_16 = arith.constant 0.000000e+00 : f32
    %31 = vector.shape_cast %21 : vector<288x1xi1> to vector<288x1xi1>
    %32 = vector.broadcast %31 : vector<288x1xi1> to vector<288x128xi1>
    %33 = vector.broadcast %cst_16 : f32 to vector<288x128xf32>
    %34 = arith.select %32, %30, %33 : vector<288x128xi1>, vector<288x128xf32>
    %c287_i32 = arith.constant 287 : i32
    %35 = tpu.dynamic_rotate %29 by %c287_i32 dim 0 : vector<288x128xf32>, i32 -> vector<288x128xf32>
    %cst_17 = arith.constant 0.000000e+00 : f32
    %36 = vector.shape_cast %23 : vector<288x1xi1> to vector<288x1xi1>
    %37 = vector.broadcast %36 : vector<288x1xi1> to vector<288x128xi1>
    %38 = vector.broadcast %cst_17 : f32 to vector<288x128xf32>
    %39 = arith.select %37, %35, %38 : vector<288x128xi1>, vector<288x128xf32>
    %40 = arith.truncf %29 : vector<288x128xf32> to vector<288x128xbf16>
    %41 = arith.truncf %34 : vector<288x128xf32> to vector<288x128xbf16>
    %42 = arith.truncf %39 : vector<288x128xf32> to vector<288x128xbf16>
    %43 = vector.extract_strided_slice %41 {offsets = [0, 0], sizes = [256, 128], strides = [1, 1]} : vector<288x128xbf16> to vector<256x128xbf16>
    %44 = vector.extract_strided_slice %40 {offsets = [0, 0], sizes = [256, 128], strides = [1, 1]} : vector<288x128xbf16> to vector<256x128xbf16>
    %45 = vector.extract_strided_slice %42 {offsets = [0, 0], sizes = [256, 128], strides = [1, 1]} : vector<288x128xbf16> to vector<256x128xbf16>
    %46 = vector.extract_strided_slice %41 {offsets = [16, 0], sizes = [256, 128], strides = [1, 1]} : vector<288x128xbf16> to vector<256x128xbf16>
    %47 = vector.extract_strided_slice %40 {offsets = [16, 0], sizes = [256, 128], strides = [1, 1]} : vector<288x128xbf16> to vector<256x128xbf16>
    %48 = vector.extract_strided_slice %42 {offsets = [16, 0], sizes = [256, 128], strides = [1, 1]} : vector<288x128xbf16> to vector<256x128xbf16>
    %49 = vector.extract_strided_slice %41 {offsets = [32, 0], sizes = [256, 128], strides = [1, 1]} : vector<288x128xbf16> to vector<256x128xbf16>
    %50 = vector.extract_strided_slice %40 {offsets = [32, 0], sizes = [256, 128], strides = [1, 1]} : vector<288x128xbf16> to vector<256x128xbf16>
    %51 = vector.extract_strided_slice %42 {offsets = [32, 0], sizes = [256, 128], strides = [1, 1]} : vector<288x128xbf16> to vector<256x128xbf16>
    %52 = tpu.concatenate %43, %44, %45, %46, %47, %48, %49, %50, %51 in 1 : vector<256x128xbf16>, vector<256x128xbf16>, vector<256x128xbf16>, vector<256x128xbf16>, vector<256x128xbf16>, vector<256x128xbf16>, vector<256x128xbf16>, vector<256x128xbf16>, vector<256x128xbf16> -> vector<256x1152xbf16>
    %c0_18 = arith.constant 0 : index
    %c0_19 = arith.constant 0 : index
    %53 = vector.load %arg2[%c0_18, %c0_19] : memref<1152x128xbf16, #tpu.memory_space<vmem>>, vector<1152x128xbf16>
    %cst_20 = arith.constant dense<0.000000e+00> : vector<256x128xf32>
    %54 = tpu.matmul %52, %53, %cst_20 {dimension_numbers = #tpu.dot_dimension_numbers<[1], [0], [0], [1], [0, 0, 1, 1], [], []>} : vector<256x1152xbf16>, vector<1152x128xbf16>, vector<256x128xf32> -> vector<256x128xf32>
    %55 = vector.extract_strided_slice %28 {offsets = [0, 0], sizes = [1, 128], strides = [1, 1]} : vector<2x128xf32> to vector<1x128xf32>
    %56 = vector.broadcast %55 : vector<1x128xf32> to vector<256x128xf32>
    %57 = arith.mulf %54, %56 : vector<256x128xf32>
    %58 = vector.extract_strided_slice %28 {offsets = [1, 0], sizes = [1, 128], strides = [1, 1]} : vector<2x128xf32> to vector<1x128xf32>
    %59 = vector.broadcast %58 : vector<1x128xf32> to vector<256x128xf32>
    %60 = arith.addf %57, %59 : vector<256x128xf32>
    %cst_21 = arith.constant 0.000000e+00 : f32
    %61 = vector.broadcast %cst_21 : f32 to vector<256x128xf32>
    %62 = arith.maximumf %60, %61 : vector<256x128xf32>
    %c16_22 = arith.constant 16 : index
    %c0_23 = arith.constant 0 : index
    %63 = vector.load %arg7[%c16_22, %c0_23] : memref<288x128xf32, #tpu.memory_space<vmem>>, vector<256x128xf32>
    tpu.vector_store %arg7[%c16_22, %c0_23], %62 {strides = array<i32>} : memref<288x128xf32, #tpu.memory_space<vmem>>, vector<256x128xf32>,
    %c0_24 = arith.constant 0 : index
    %c0_25 = arith.constant 0 : index
    %64 = vector.load %arg5[%c0_24, %c0_25] : memref<2x128xf32, #tpu.memory_space<vmem>>, vector<2x128xf32>
    %c0_26 = arith.constant 0 : index
    %c0_27 = arith.constant 0 : index
    %65 = vector.load %arg7[%c0_26, %c0_27] : memref<288x128xf32, #tpu.memory_space<vmem>>, vector<288x128xf32>
    %c1_i32_28 = arith.constant 1 : i32
    %66 = tpu.dynamic_rotate %65 by %c1_i32_28 dim 0 : vector<288x128xf32>, i32 -> vector<288x128xf32>
    %cst_29 = arith.constant 0.000000e+00 : f32
    %67 = vector.shape_cast %21 : vector<288x1xi1> to vector<288x1xi1>
    %68 = vector.broadcast %67 : vector<288x1xi1> to vector<288x128xi1>
    %69 = vector.broadcast %cst_29 : f32 to vector<288x128xf32>
    %70 = arith.select %68, %66, %69 : vector<288x128xi1>, vector<288x128xf32>
    %c287_i32_30 = arith.constant 287 : i32
    %71 = tpu.dynamic_rotate %65 by %c287_i32_30 dim 0 : vector<288x128xf32>, i32 -> vector<288x128xf32>
    %cst_31 = arith.constant 0.000000e+00 : f32
    %72 = vector.shape_cast %23 : vector<288x1xi1> to vector<288x1xi1>
    %73 = vector.broadcast %72 : vector<288x1xi1> to vector<288x128xi1>
    %74 = vector.broadcast %cst_31 : f32 to vector<288x128xf32>
    %75 = arith.select %73, %71, %74 : vector<288x128xi1>, vector<288x128xf32>
    %76 = arith.truncf %65 : vector<288x128xf32> to vector<288x128xbf16>
    %77 = arith.truncf %70 : vector<288x128xf32> to vector<288x128xbf16>
    %78 = arith.truncf %75 : vector<288x128xf32> to vector<288x128xbf16>
    %79 = vector.extract_strided_slice %77 {offsets = [0, 0], sizes = [256, 128], strides = [1, 1]} : vector<288x128xbf16> to vector<256x128xbf16>
    %80 = vector.extract_strided_slice %76 {offsets = [0, 0], sizes = [256, 128], strides = [1, 1]} : vector<288x128xbf16> to vector<256x128xbf16>
    %81 = vector.extract_strided_slice %78 {offsets = [0, 0], sizes = [256, 128], strides = [1, 1]} : vector<288x128xbf16> to vector<256x128xbf16>
    %82 = vector.extract_strided_slice %77 {offsets = [16, 0], sizes = [256, 128], strides = [1, 1]} : vector<288x128xbf16> to vector<256x128xbf16>
    %83 = vector.extract_strided_slice %76 {offsets = [16, 0], sizes = [256, 128], strides = [1, 1]} : vector<288x128xbf16> to vector<256x128xbf16>
    %84 = vector.extract_strided_slice %78 {offsets = [16, 0], sizes = [256, 128], strides = [1, 1]} : vector<288x128xbf16> to vector<256x128xbf16>
    %85 = vector.extract_strided_slice %77 {offsets = [32, 0], sizes = [256, 128], strides = [1, 1]} : vector<288x128xbf16> to vector<256x128xbf16>
    %86 = vector.extract_strided_slice %76 {offsets = [32, 0], sizes = [256, 128], strides = [1, 1]} : vector<288x128xbf16> to vector<256x128xbf16>
    %87 = vector.extract_strided_slice %78 {offsets = [32, 0], sizes = [256, 128], strides = [1, 1]} : vector<288x128xbf16> to vector<256x128xbf16>
    %88 = tpu.concatenate %79, %80, %81, %82, %83, %84, %85, %86, %87 in 1 : vector<256x128xbf16>, vector<256x128xbf16>, vector<256x128xbf16>, vector<256x128xbf16>, vector<256x128xbf16>, vector<256x128xbf16>, vector<256x128xbf16>, vector<256x128xbf16>, vector<256x128xbf16> -> vector<256x1152xbf16>
    %c0_32 = arith.constant 0 : index
    %c0_33 = arith.constant 0 : index
    %89 = vector.load %arg4[%c0_32, %c0_33] : memref<1152x128xbf16, #tpu.memory_space<vmem>>, vector<1152x128xbf16>
    %cst_34 = arith.constant dense<0.000000e+00> : vector<256x128xf32>
    %90 = tpu.matmul %88, %89, %cst_34 {dimension_numbers = #tpu.dot_dimension_numbers<[1], [0], [0], [1], [0, 0, 1, 1], [], []>} : vector<256x1152xbf16>, vector<1152x128xbf16>, vector<256x128xf32> -> vector<256x128xf32>
    %91 = vector.extract_strided_slice %64 {offsets = [0, 0], sizes = [1, 128], strides = [1, 1]} : vector<2x128xf32> to vector<1x128xf32>
    %92 = vector.broadcast %91 : vector<1x128xf32> to vector<256x128xf32>
    %93 = arith.mulf %90, %92 : vector<256x128xf32>
    %94 = vector.extract_strided_slice %64 {offsets = [1, 0], sizes = [1, 128], strides = [1, 1]} : vector<2x128xf32> to vector<1x128xf32>
    %95 = vector.broadcast %94 : vector<1x128xf32> to vector<256x128xf32>
    %96 = arith.addf %93, %95 : vector<256x128xf32>
    %cst_35 = arith.constant 0.000000e+00 : f32
    %97 = vector.broadcast %cst_35 : f32 to vector<256x128xf32>
    %98 = arith.maximumf %96, %97 : vector<256x128xf32>
    %99 = vector.shape_cast %98 : vector<256x128xf32> to vector<16x16x128xf32>
    %c0_36 = arith.constant 0 : index
    %c0_37 = arith.constant 0 : index
    %c0_38 = arith.constant 0 : index
    %c0_39 = arith.constant 0 : index
    %100 = vector.load %arg6[%c0_36, %c0_37, %c0_38, %c0_39] : memref<1x16x16x128xf32, #tpu.memory_space<vmem>>, vector<1x16x16x128xf32>
    %101 = vector.shape_cast %100 : vector<1x16x16x128xf32> to vector<16x16x128xf32>
    %102 = vector.shape_cast %99 : vector<16x16x128xf32> to vector<1x16x16x128xf32>
    tpu.vector_store %arg6[%c0_36, %c0_37, %c0_38, %c0_39], %102 {strides = array<i32>} : memref<1x16x16x128xf32, #tpu.memory_space<vmem>>, vector<1x16x16x128xf32>,
    return
  }
  func.func @transform_0(%arg0: i32) -> (i32, i32, i32, i32) {
    %c0_i32 = arith.constant 0 : i32
    %c0_i32_0 = arith.constant 0 : i32
    %c0_i32_1 = arith.constant 0 : i32
    %c0_i32_2 = arith.constant 0 : i32
    return %arg0, %c0_i32, %c0_i32_0, %c0_i32_1 : i32, i32, i32, i32
  }
  func.func @transform_1(%arg0: i32) -> (i32, i32) {
    %c0_i32 = arith.constant 0 : i32
    %c0_i32_0 = arith.constant 0 : i32
    %c0_i32_1 = arith.constant 0 : i32
    return %c0_i32, %c0_i32_0 : i32, i32
  }
  func.func @transform_2(%arg0: i32) -> (i32, i32) {
    %c0_i32 = arith.constant 0 : i32
    %c0_i32_0 = arith.constant 0 : i32
    %c0_i32_1 = arith.constant 0 : i32
    return %c0_i32, %c0_i32_0 : i32, i32
  }
  func.func @transform_3(%arg0: i32) -> (i32, i32) {
    %c0_i32 = arith.constant 0 : i32
    %c0_i32_0 = arith.constant 0 : i32
    %c0_i32_1 = arith.constant 0 : i32
    return %c0_i32, %c0_i32_0 : i32, i32
  }
  func.func @transform_4(%arg0: i32) -> (i32, i32) {
    %c0_i32 = arith.constant 0 : i32
    %c0_i32_0 = arith.constant 0 : i32
    %c0_i32_1 = arith.constant 0 : i32
    return %c0_i32, %c0_i32_0 : i32, i32
  }
  func.func @transform_5(%arg0: i32) -> (i32, i32, i32, i32) {
    %c0_i32 = arith.constant 0 : i32
    %c0_i32_0 = arith.constant 0 : i32
    %c0_i32_1 = arith.constant 0 : i32
    %c0_i32_2 = arith.constant 0 : i32
    return %arg0, %c0_i32, %c0_i32_0, %c0_i32_1 : i32, i32, i32, i32
  }
}

</mosaic_0001>

<bundles_post_ra>
// kernel: tpu_custom_call.1
= control target key start
LH: loop header
LB: loop body
LE: loop exit
PB: predicated region body
PF: predicated region fallthrough
CT: control target
= control target key end

     0   :  { %10 = vsyncpa [#allocation4], 0  ;;  %s10069_s0 = inlined_call_operand.hbm [shape: f32[2,16,16,128], index: 0, kind: input, shape index: {}]   ;;  %s10070_s1 = inlined_call_operand.hbm [shape: bf16[1152,128], index: 1, kind: input, shape index: {}]   ;;  %s10071_s2 = inlined_call_operand.vmem [shape: f32[2,128], index: 2, kind: input, shape index: {}]   ;;  %s10072_s3 = inlined_call_operand.hbm [shape: bf16[1152,128], index: 3, kind: input, shape index: {}]   ;;  %s10073_s4 = inlined_call_operand.vmem [shape: f32[2,128], index: 4, kind: input, shape index: {}]   ;;  %s10074_s5 = inlined_call_operand.hbm [shape: f32[2,16,16,128], index: 5, kind: output, shape index: {}]  }
   0x1   :  { %12 = vsyncpa [#allocation4 + $0x1], 0 }
   0x2   :  { %13 = vsyncpa [#allocation7], 0 }
   0x3   :  { %14 = vsyncpa [#allocation5], 0 }
   0x4   :  { %16 = vsyncpa [#allocation5 + $0x1], 0  ;;  %s6983_s18 = smov 0   ;;  %s6985_s19 = smov 0  }
   0x5   :  { %s6987_s20 = smov 0   ;;  %s6989_s21 = smov 0  }
   0x6 LB: > { %s7004_s22 = sadd.s32 4294967295, %s6938_s21   ;;  %s4782_s23 = sadd.s32 4294967294, %s6938_s21   ;;  %s6938_s21 = sphi %s6989_s21, %s10917_s21   ;;  %s6934_s20 = sphi %s6987_s20, %s10916_s20   ;;  %s6930_s19 = sphi %s6985_s19, %s10915_s19   ;;  %s6926_s18 = sphi %s6983_s18, %s10914_s18  }
   0x7   : > { %p42_p0 = scmp.ne.s32.totalorder %s6930_s19, %s6926_s18  ;;  %p10075_p1 = scmp.eq.s32.totalorder %s7004_s22, 0 }
   0x8   : > { %p156_p3 = scmp.eq.s32.totalorder %s4782_s23, 1  ;;  %p4783_p5 = scmp.ge.s32.totalorder %s6938_s21, 1 }
   0x9   : > { %p7013_p4 = por %p10075_p1, %p42_p0  ;;  %p163_p7 = scmp.lt.s32.totalorder %s6938_s21, 3 }
   0xa   : > { %p7018_p6 = por %p156_p3, %p42_p0  ;;  %s6940_s27 = smov [#allocation6]  }
   0xb   : > { %s10293_s24 = scalar_select %p7013_p4, 1, 0 }
   0xc   : > { %s10294_s25 = scalar_select %p7018_p6, 1, 0 }
   0xd   : > { %p7023_p8 = pnand %p4783_p5, %p163_p7  ;;  %s175_s28 = sshll.u32 %s6940_s27, 4  ;;  %s7027_s28 = int_to_ptr.vmem [resolvable:$true] %s175_s28 }
   0xe   : > { %s6941_s30 = smov [#allocation8]   ;;  %s6782_s9 = scalar_lea.hbm %s10070_s1, 9216 }
   0xf   : > { %p6574_p9 = pneg %p7023_p8  ;;  %s191_s6 = sshll.u32 %s6941_s30, 4  ;;  %s7038_s6 = int_to_ptr.vmem [resolvable:$true] %s191_s6 }
  0x10   : > { %p6783_p12 = scmp.ne.s32.totalorder %s10070_s1, %s6782_s9  ;;  %p6789_p5 = scmp.lt.u32.totalorder %s6782_s9, %s10070_s1 }
  0x11   : > { %p7034_p11 = pnand %p6574_p9, %p10075_p1 }
  0x13   : > { %p6784_p13 = pneg %p7034_p11 }
  0x15   : > { %p6785_p0 = pnand %p6784_p13, %p6783_p12 }
  0x17   : > { %p6786_p3 = pneg %p6785_p0 }
  0x19   : > { %p6791_p7 = pnand %p6789_p5, %p6786_p3 }
  0x1b   : > { %6794 = shalt.err (!%p6791_p7)
}
  0x1c   : > { %s6795_s14 = scalar_lea.vmem %s7027_s28, 9216  ;;  %p6803_p2 = scmp.lt.s32.totalorder %s7027_s28, %s7027_s28 }
  0x1d   : > { %p6796_p9 = scmp.ne.s32.totalorder %s7027_s28, %s6795_s14  ;;  %p6804_p12 = scmp.lt.s32.totalorder %s6795_s14, %s6795_s14 }
  0x1f   : > { %p6798_p10 = pnand %p6796_p9, %p6784_p13  ;;  %p6805_p0 = por %p6804_p12, %p6803_p2 }
  0x21   : > { %p6799_p1 = pneg %p6798_p10 }
  0x23   : > { %p6806_p6 = pnand %p6805_p0, %p6799_p1 }
  0x25   : > { %6809 = shalt.err (!%p6806_p6)
}
  0x26   : > { %s6942_s15 = smov 64   ;;  %s6943_s16 = smov 4  }
  0x27   : > { %6577 = dma.hbm_to_vmem [thread:$0]  (!%p7034_p11), %s10070_s1, 9216, %s7027_s28, [#allocation7], %s6942_s15, %s6942_s15, %s6943_s16  }
  0x28   : > { %s6810_s7 = scalar_lea.hbm %s10072_s3, 9216 }
  0x29   : > { %p6811_p2 = scmp.ne.s32.totalorder %s10072_s3, %s6810_s7  ;;  %p6817_p10 = scmp.lt.u32.totalorder %s6810_s7, %s10072_s3 }
  0x2b   : > { %p6813_p1 = pnand %p6811_p2, %p6784_p13 }
  0x2d   : > { %p6814_p6 = pneg %p6813_p1 }
  0x2f   : > { %p6819_p3 = pnand %p6817_p10, %p6814_p6 }
  0x31   : > { %6822 = shalt.err (!%p6819_p3)
}
  0x32   : > { %s6823_s28 = scalar_lea.vmem %s7038_s6, 9216  ;;  %p6831_p12 = scmp.lt.s32.totalorder %s7038_s6, %s7038_s6 }
  0x33   : > { %p6824_p5 = scmp.ne.s32.totalorder %s7038_s6, %s6823_s28  ;;  %p6832_p0 = scmp.lt.s32.totalorder %s6823_s28, %s6823_s28 }
  0x35   : > { %p6826_p7 = pnand %p6824_p5, %p6784_p13  ;;  %p6833_p2 = por %p6832_p0, %p6831_p12 }
  0x37   : > { %p6827_p9 = pneg %p6826_p7 }
  0x39   : > { %p6834_p1 = pnand %p6833_p2, %p6827_p9 }
  0x3b   : > { %6837 = shalt.err (!%p6834_p1)
}
  0x3c   : > { %6580 = dma.hbm_to_vmem [thread:$0]  (!%p7034_p11), %s10072_s3, 9216, %s7038_s6, [#allocation7], %s6942_s15, %s6942_s15, %s6943_s16  }
  0x3d   : > { %s7093_s14 = sadd.s32 1, %s6938_s21   ;;  %s29_s29 = sadd.s32 1, %s6934_s20 }
  0x3e   : > { %s26_s17 = ssub.s32 %s6938_s21, %s7093_s14  ;;  %p36_p13 = scmp.ne.s32.totalorder %s6934_s20, %s6930_s19 }
  0x3f   : > { %p27_p6 = scmp.eq.s32.totalorder %s26_s17, 0  ;;  %p37_p10 = scmp.eq.s32.totalorder %s6938_s21, 0 }
  0x40   : > { %p10297_p3 = scmp.eq.s32.totalorder %s7004_s22, 1  ;;  %p6591_p7 = scmp.lt.s32.totalorder %s6938_s21, 2 }
  0x41   : > { %s7109_s27 = scalar_select %p27_p6, %s6934_s20, %s29_s29  }
  0x42   : > { %p7103_p5 = por %p10297_p3, %p36_p13  ;;  %p38_p9 = por %p37_p10, %p36_p13 }
  0x43   : > { %s208_s30 = sand.u32 1, %s6934_s20   ;;  %s5520_s6 = sshll.u32 %s6938_s21, 12 }
  0x44   : > { %s10298_s23 = scalar_select %p7103_p5, 1, 0 }
  0x45   : > { %s4787_s7 = sshll.u32 %s208_s30, 8  ;;  %s7116_s8 = scalar_lea.hbm %s10069_s0, %s5520_s6 }
  0x46   : > { %s212_s9 = scalar_lea.vmem [#allocation3], %s4787_s7  ;;  %p7120_p11 = pnand %p6591_p7, %p38_p9 }
  0x47   : > { %s219_s10 = sshll.u32 %s212_s9, 4  ;;  %s7124_s28 = scalar_lea.sflag [#allocation4], %s208_s30  ;;  %s7118_s10 = int_to_ptr.vmem [resolvable:$true] %s219_s10 }
  0x48   : > { %s6838_s12 = scalar_lea.hbm %s7116_s8, 4096  ;;  %p6840_p0 = pneg %p7120_p11 }
  0x49   : > { %p6839_p12 = scmp.ne.s32.totalorder %s7116_s8, %s6838_s12  ;;  %s6843_s17 = scalar_lea.hbm %s10069_s0, 8192 }
  0x4a   : > { %p6844_p13 = scmp.lt.u32.totalorder %s7116_s8, %s10069_s0  ;;  %p6845_p6 = scmp.lt.u32.totalorder %s6843_s17, %s6838_s12 }
  0x4b   : > { %p6841_p2 = pnand %p6840_p0, %p6839_p12  ;;  %p6847_p3 = scmp.lt.u32.totalorder %s6838_s12, %s7116_s8 }
  0x4c   : > { %p6846_p10 = por %p6845_p6, %p6844_p13 }
  0x4d   : > { %p6842_p1 = pneg %p6841_p2 }
  0x4e   : > { %p6848_p7 = por %p6847_p3, %p6846_p10 }
  0x50   : > { %p6849_p9 = pnand %p6848_p7, %p6842_p1 }
  0x52   : > { %6852 = shalt.err (!%p6849_p9)
}
  0x53   : > { %s6853_s30 = scalar_lea.vmem %s7118_s10, 4096  ;;  %s6944_s15 = smov [#allocation3]  }
  0x54   : > { %p6854_p12 = scmp.ne.s32.totalorder %s7118_s10, %s6853_s30  ;;  %s6858_s16 = sshll.u32 %s6944_s15, 4  ;;  %s6859_s16 = int_to_ptr.vmem [resolvable:$false] %s6858_s16 }
  0x55   : > { %s6860_s9 = scalar_lea.vmem %s6859_s16, 8192  ;;  %p6861_p4 = scmp.lt.s32.totalorder %s7118_s10, %s6859_s16 }
  0x56   : > { %p6856_p2 = pnand %p6854_p12, %p6840_p0  ;;  %p6862_p13 = scmp.lt.s32.totalorder %s6860_s9, %s6853_s30 }
  0x58   : > { %p6857_p5 = pneg %p6856_p2  ;;  %p6863_p6 = por %p6862_p13, %p6861_p4 }
  0x5a   : > { %p6864_p10 = pnand %p6863_p6, %p6857_p5 }
  0x5c   : > { %6867 = shalt.err (!%p6864_p10)
}
  0x5d   : > { %s6945_s12 = smov 128   ;;  %s6946_s13 = smov 8  }
  0x5e   : > { %6584 = dma.hbm_to_vmem [thread:$0]  (!%p7120_p11), %s7116_s8, 4096, %s7118_s10, %s7124_s28, %s6945_s12, %s6945_s12, %s6946_s13  }
  0x5f   : > { %231 = sbr.rel (%p7023_p8) target bundleno = 1184 (0x4a0), region = 40 }
  0x66   : > { %s7155_s29 = sand.u32 1, %s6930_s19   ;;  %p10300_p4 = scmp.ne.s32.totalorder %s10293_s24, 0 }
  0x67   : > { %s4791_s17 = sshll.u32 %s7155_s29, 8  ;;  %s234_s7 = scalar_lea.sflag [#allocation4], %s7155_s29 }
  0x68   : > { %s7161_s6 = scalar_lea.vmem [#allocation3], %s4791_s17 }
  0x69   : > { %6913 = dma.done.wait (%p10300_p4), %s234_s7, 4096  }
  0x6a   : > { %6915 = vsyncadd (%p10300_p4), %s234_s7, 4294963200  ;;  %p10301_p5 = scmp.eq.s32.totalorder %s7004_s22, 0 }
  0x6c   : > { %6917 = dma.done.wait (%p10301_p5), [#allocation7], 18432   ;;  %p10302_p8 = pmov %p10301_p5 }
  0x6d   : > { %v10083_v0 = vmov 0.0|0.0   ;;  %v6638_v1 = vld [vmem:[#allocation6 + $0x40] sm:$0xff]   ;;  %v6642_v5 = vld [vmem:[#allocation6 + $0x48] sm:$0xff]   ;;  %v6646_v9 = vld [vmem:[#allocation6 + $0x50] sm:$0xff]   ;;  %v277_v17 = vlaneseq  ;;  %v6948_v26 = vmov 0.0   ;;  %vm10080_vm4 = vmmov 1  }
  0x6e   : > { %6919 = vsyncadd (%p10302_p8), [#allocation7], 4294948864  ;;  %1943 = vmatprep.mubr.bf16.mxu0 %v10083_v0  ;;  %v6639_v2 = vld [vmem:[#allocation6 + $0xc0] sm:$0xff]   ;;  %5522 = vmatprep.subr.bf16.mxu0 %v6638_v1  ;;  %v6643_v6 = vld [vmem:[#allocation6 + $0xc8] sm:$0xff]   ;;  %v7174_v27 = vrot.slane %v6948_v26, 7  ;;  %v7177_v31 = vrot.slane %v6948_v26, 1 }
  0x6f   : > { %v6640_v3 = vld [vmem:[#allocation6] sm:$0xff]   ;;  %5634 = vmatprep.subr.bf16.mxu1 %v6639_v2  ;;  %v6644_v7 = vld [vmem:[#allocation6 + $0x8] sm:$0xff]   ;;  %v6647_v10 = vld [vmem:[#allocation6 + $0xd0] sm:$0xff]   ;;  %v7172_v22 = vshrl.u32 %v277_v17, 7  ;;  %v10311_v54 = vmov 0  ;;  %v10314_v55 = vmov 0 }
  0x70   : > { %v6641_v4 = vld [vmem:[#allocation6 + $0x80] sm:$0xff]   ;;  %5523 = vmatpush3.bf16.msra.mxu0 %v6640_v3  ;;  %v6645_v8 = vld [vmem:[#allocation6 + $0x88] sm:$0xff]   ;;  %v6648_v11 = vld [vmem:[#allocation6 + $0x10] sm:$0xff]   ;;  %10304 = vst [vmem:[#allocation14_spill] sm:$0xff] %v7174_v27  ;;  %v7192_v46 = vpack.c.bf16 %v7174_v27, %v7174_v27  ;;  %v10317_v2 = vmov 0  ;;  %s9900_s11 = scalar_lea.vmem [#allocation9], %s4791_s17 }
  0x71   : > { %5635 = vmatpush3.bf16.msra.mxu1 %v6641_v4  ;;  %5524 = vmatprep.subr.bf16.mxu0 %v6642_v5  ;;  %v6649_v12 = vld [vmem:[#allocation6 + $0x90] sm:$0xff]   ;;  %v6650_v13 = vld [vmem:[#allocation6 + $0x58] sm:$0xff]   ;;  %v6654_v18 = vld [vmem:[#allocation6 + $0x60] sm:$0xff]   ;;  %10303 = vst [vmem:[#allocation13_spill] sm:$0xff] %v7172_v22  ;;  %v280_v29 = vadd.s32 16, %v7172_v22  ;;  %v279_v33 = vadd.s32 8, %v7172_v22 }
  0x72   : > { %5636 = vmatprep.subr.bf16.mxu1 %v6643_v6  ;;  %v6651_v14 = vld [vmem:[#allocation6 + $0xd8] sm:$0xff]   ;;  %v6655_v19 = vld [vmem:[#allocation6 + $0xe0] sm:$0xff]   ;;  %v6658_v23 = vld [vmem:[#allocation6 + $0x68] sm:$0xff]   ;;  %10305 = vst [vmem:[#allocation15_spill] sm:$0xff] %v7177_v31  ;;  %v318_v35 = vand.u32 15, %v7172_v22  ;;  %v282_v39 = vadd.s32 32, %v7172_v22 }
  0x73   : > { %v6652_v15 = vld [vmem:[#allocation6 + $0x18] sm:$0xff]   ;;  %v6656_v20 = vld [vmem:[#allocation6 + $0x20] sm:$0xff]   ;;  %v6659_v24 = vld [vmem:[#allocation6 + $0xe8] sm:$0xff]   ;;  %v332_v37 = vand.u32 15, %v280_v29  ;;  %v325_v41 = vand.u32 15, %v279_v33  ;;  %10310 = vst [vmem:[#allocation16_spill] sm:$0xff] %v7192_v46 }
  0x74   : > { %5525 = vmatpush3.bf16.msra.mxu0 %v6644_v7  ;;  %v6653_v16 = vld [vmem:[#allocation6 + $0x98] sm:$0xff]   ;;  %v6657_v21 = vld [vmem:[#allocation6 + $0xa0] sm:$0xff]   ;;  %v6660_v25 = vld [vmem:[#allocation6 + $0x28] sm:$0xff]   ;;  %vm7182_vm0 = vcmp.ne.s32.totalorder %v318_v35, 0  ;;  %vm10079_vm2 = vcmp.lt.s32.totalorder %v7172_v22, 1  ;;  %vm10078_vm3 = vcmp.lt.s32.totalorder %v7172_v22, 7 }
  0x75   : > { %5637 = vmatpush3.bf16.msra.mxu1 %v6645_v8  ;;  %5526 = vmatprep.subr.bf16.mxu0 %v6646_v9  ;;  %v6661_v28 = vld [vmem:[#allocation6 + $0xa8] sm:$0xff]   ;;  %v6662_v30 = vld [vmem:[#allocation6 + $0x70] sm:$0xff]   ;;  %v6666_v38 = vld [vmem:[#allocation6 + $0x78] sm:$0xff]   ;;  %vm7186_vm1 = vcmp.ne.s32.totalorder %v332_v37, 0  ;;  %v346_v49 = vand.u32 15, %v282_v39  ;;  %v281_v50 = vadd.s32 24, %v7172_v22 }
  0x76   : > { %5638 = vmatprep.subr.bf16.mxu1 %v6647_v10  ;;  %v6663_v32 = vld [vmem:[#allocation6 + $0xf0] sm:$0xff]   ;;  %v6667_v40 = vld [vmem:[#allocation6 + $0xf8] sm:$0xff]   ;;  %v818_v47 = vld [vmem:[%s7161_s6] sm:$0xff]  ;;  %vm783_vm6 = vcmp.ne.s32.totalorder %v325_v41, 15  ;;  %v284_v58 = vadd.s32 48, %v7172_v22  ;;  %v10324_v35 = vmov 0 }
  0x77   : > { %v6664_v34 = vld [vmem:[#allocation6 + $0x30] sm:$0xff]   ;;  %v6668_v42 = vld [vmem:[#allocation6 + $0x38] sm:$0xff]   ;;  %v819_v48 = vld [vmem:[%s7161_s6 + $0x8] sm:$0xff]  ;;  %v921_v51 = vrot.slane %v818_v47, 7  ;;  %v1102_v53 = vrot.slane %v818_v47, 1  ;;  %vm7234_vm9 = vcmp.ne.s32.totalorder %v346_v49, 0 }
  0x78   : > { %5527 = vmatpush3.bf16.msra.mxu0 %v6648_v11  ;;  %v6665_v36 = vld [vmem:[#allocation6 + $0xb0] sm:$0xff]   ;;  %v6669_v44 = vld [vmem:[#allocation6 + $0xb8] sm:$0xff]   ;;  %v922_v52 = vrot.slane %v819_v48, 7  ;;  %vm7202_vm5 = vmpackc.low %vm10080_vm4, %vm7182_vm0  ;;  %v7213_v57 = vpack.c.bf16 %v819_v48, %v818_v47  ;;  %v1103_v63 = vrot.slane %v819_v48, 1  ;;  %v339_v9 = vand.u32 15, %v281_v50  ;;  %s5521_s28 = sshll.u32 %s7004_s22, 12 }
  0x79   : > { %5639 = vmatpush3.bf16.msra.mxu1 %v6649_v12  ;;  %5528 = vmatprep.subr.bf16.mxu0 %v6650_v13  ;;  %v10312_v54 = vsel %vm7202_vm5, 4294967295, %v10311_v54  ;;  %vm7209_vm7 = vmpackc.low %vm10080_vm4, %vm7186_vm1  ;;  %v6670_v56 = vld [vmem:[#allocation6 + $0x140] sm:$0xff]   ;;  %v989_v60 = vsel %vm10079_vm2, %v7174_v27, %v921_v51  ;;  %v1170_v61 = vsel %vm10078_vm3, %v7177_v31, %v1102_v53  ;;  %v820_v5 = vld [vmem:[%s7161_s6 + $0x10] sm:$0xff]  ;;  %v360_v13 = vand.u32 15, %v284_v58  ;;  %s4690_s30 = sshll.u32 %s9900_s11, 4  ;;  %s10020_s9 = scalar_lea.hbm %s10074_s5, %s5521_s28  ;;  %s10022_s30 = int_to_ptr.vmem [resolvable:$true] %s4690_s30 }
  0x7a   : > { %5640 = vmatprep.subr.bf16.mxu1 %v6651_v14  ;;  %10313 = vst [vmem:[#allocation17_spill] sm:$0xff] %v10312_v54  ;;  %v10315_v55 = vsel %vm7209_vm7, 4294967295, %v10314_v55  ;;  %v988_v59 = vsel %vm10079_vm2, %v921_v51, %v922_v52  ;;  %v6671_v62 = vld [vmem:[#allocation6 + $0x100] sm:$0xff]   ;;  %vm7228_vm8 = vmpackc.low %vm783_vm6, %vm10080_vm4  ;;  %v4919_v3 = vpack.c.bf16 %v1170_v61, %v7177_v31  ;;  %v821_v6 = vld [vmem:[%s7161_s6 + $0x18] sm:$0xff]  ;;  %v923_v7 = vrot.slane %v820_v5, 7  ;;  %s4677_s22 = scalar_lea.sflag [#allocation5], %s7155_s29 }
  0x7b   : > { %10316 = vst [vmem:[#allocation18_spill] sm:$0xff] %v10315_v55  ;;  %v4871_v1 = vpack.c.bf16 %v988_v59, %v989_v60  ;;  %v10318_v2 = vsel %vm7228_vm8, 4294967295, %v10317_v2  ;;  %v924_v8 = vrot.slane %v821_v6, 7  ;;  %v1104_v10 = vrot.slane %v820_v5, 1  ;;  %v7241_v11 = vld [vmem:[%s7161_s6 + $0x20] sm:$0xff]  ;;  %v7244_v12 = vld [vmem:[%s7161_s6 + $0x28] sm:$0xff]  ;;  %vm7259_vm10 = vmpackc.low %vm10080_vm4, %vm7234_vm9 }
  0x7c   : > { %5529 = vmatpush3.bf16.msra.mxu0 %v6652_v15  ;;  %10319 = vst [vmem:[#allocation19_spill] sm:$0xff] %v10318_v2  ;;  %v925_v14 = vrot.slane %v7241_v11, 7  ;;  %v926_v15 = vrot.slane %v7244_v12, 7  ;;  %v987_v17 = vsel %vm10079_vm2, %v922_v52, %v923_v7  ;;  %v6673_v26 = vld [vmem:[#allocation6 + $0x108] sm:$0xff]   ;;  %vm785_vm11 = vcmp.ne.s32.totalorder %v339_v9, 15  ;;  %v7284_v33 = vld [vmem:[%s7161_s6 + $0x38] sm:$0xff] }
  0x7d   : > { %5641 = vmatpush3.bf16.msra.mxu1 %v6653_v16  ;;  %5530 = vmatprep.subr.bf16.mxu0 %v6654_v18  ;;  %v986_v16 = vsel %vm10079_vm2, %v923_v7, %v924_v8  ;;  %v10322_v18 = vmov 0  ;;  %vm752_vm12 = vcmp.ne.s32.totalorder %v360_v13, 0  ;;  %vm7291_vm13 = vmpackc.low %vm785_vm11, %vm10080_vm4  ;;  %v1106_v39 = vrot.slane %v7241_v11, 1  ;;  %v6675_v45 = vld [vmem:[#allocation6 + $0x110] sm:$0xff]   ;;  %v6676_v48 = vld [vmem:[#allocation6 + $0x158] sm:$0xff]   ;;  %s6868_s12 = scalar_lea.vmem %s10022_s30, 4096 }
  0x7e   : > { %5642 = vmatprep.subr.bf16.mxu1 %v6655_v19  ;;  %4917 = vmatprep.mubr.msk.bf16.mxu1 %vm7209_vm7, %v4871_v1  ;;  %v10323_v18 = vsel %vm7259_vm10, 4294967295, %v10322_v18  ;;  %v283_v19 = vadd.s32 40, %v7172_v22  ;;  %v985_v29 = vsel %vm10079_vm2, %v924_v8, %v925_v14  ;;  %v10325_v35 = vsel %vm7291_vm13, 4294967295, %v10324_v35  ;;  %vm7300_vm14 = vmpackc.low %vm10080_vm4, %vm752_vm12  ;;  %v7330_v59 = vld [vmem:[%s7161_s6 + $0x48] sm:$0xff]  ;;  %v6677_v60 = vld [vmem:[#allocation6 + $0x118] sm:$0xff]   ;;  %p6869_p11 = scmp.ne.s32.totalorder %s10022_s30, %s6868_s12  ;;  %p10911_p0 = scmp.ne.s32.totalorder %s10298_s23, 0 }
  0x7f   : > { %v10326_v41 = vmov 0  ;;  %v285_v47 = vadd.s32 56, %v7172_v22  ;;  %v7319_v51 = vpack.c.bf16 %v7244_v12, %v7241_v11  ;;  %v288_v58 = vadd.s32 80, %v7172_v22  ;;  %v6678_v7 = vld [vmem:[#allocation6 + $0x160] sm:$0xff]   ;;  %s6950_s13 = smov [#allocation9]  }
  0x80   : > { %5531 = vmatpush3.bf16.msra.mxu0 %v6656_v20  ;;  %v6672_v20 = vld [vmem:[#allocation6 + $0x148] sm:$0xff]   ;;  %v353_v37 = vand.u32 15, %v283_v19  ;;  %v10327_v41 = vsel %vm7300_vm14, 4294967295, %v10326_v41  ;;  %v1107_v4 = vrot.slane %v7244_v12, 1  ;;  %v930_v8 = vrot.slane %v7330_v59, 7  ;;  %v6679_v9 = vld [vmem:[#allocation6 + $0x120] sm:$0xff]   ;;  %p6870_p1 = pnand %p6869_p11, %p10911_p0 }
  0x81   : > { %5643 = vmatpush3.bf16.msra.mxu1 %v6657_v21  ;;  %5532 = vmatprep.subr.bf16.mxu0 %v6658_v23  ;;  %v7264_v21 = vpack.c.bf16 %v986_v16, %v987_v17  ;;  %v1168_v23 = vsel %vm10078_vm3, %v1103_v63, %v1104_v10  ;;  %10328 = vst [vmem:[#allocation20_spill] sm:$0xff] %v10327_v41  ;;  %v287_v11 = vadd.s32 72, %v7172_v22  ;;  %v290_v12 = vadd.s32 96, %v7172_v22  ;;  %v6680_v17 = vld [vmem:[#allocation6 + $0x168] sm:$0xff]   ;;  %s6872_s17 = sshll.u32 %s6950_s13, 4  ;;  %s6873_s17 = int_to_ptr.vmem [resolvable:$false] %s6872_s17 }
  0x82   : > { %5644 = vmatprep.subr.bf16.mxu1 %v6659_v24  ;;  %v1169_v24 = vsel %vm10078_vm3, %v1102_v53, %v1103_v63  ;;  %vm787_vm15 = vcmp.ne.s32.totalorder %v353_v37, 15  ;;  %v367_v63 = vand.u32 15, %v285_v47  ;;  %v289_v16 = vadd.s32 88, %v7172_v22  ;;  %p6871_p3 = pneg %p6870_p1  ;;  %s6874_s7 = scalar_lea.vmem %s6873_s17, 8192 }
  0x83   : > { %vm7336_vm1 = vmpackc.low %vm787_vm15, %vm10080_vm4  ;;  %v402_v37 = vand.u32 15, %v290_v12  ;;  %v7450_v12 = vld [vmem:[%s7161_s6 + $0x68] sm:$0xff]  ;;  %v7609_v2 = vadd.s32 192, %v7172_v22  ;;  %v7631_v31 = vadd.s32 184, %v7172_v22  ;;  %p6875_p7 = scmp.lt.s32.totalorder %s10022_s30, %s6873_s17  ;;  %p6876_p9 = scmp.lt.s32.totalorder %s6874_s7, %s6868_s12 }
  0x84   : > { %5533 = vmatpush3.bf16.msra.mxu0 %v6660_v25  ;;  %v7270_v25 = vpack.c.bf16 %v821_v6, %v820_v5  ;;  %vm789_vm9 = vcmp.ne.s32.totalorder %v367_v63, 15 }
  0x85   : > { %5645 = vmatpush3.bf16.msra.mxu1 %v6661_v28  ;;  %5534 = vmatprep.subr.bf16.mxu0 %v6662_v30  ;;  %v984_v28 = vsel %vm10079_vm2, %v925_v14, %v926_v15  ;;  %v286_v30 = vadd.s32 64, %v7172_v22  ;;  %v1165_v14 = vsel %vm10078_vm3, %v1106_v39, %v1107_v4  ;;  %vm7392_vm12 = vmpackc.low %vm789_vm9, %vm10080_vm4  ;;  %vm7434_vm9 = vcmp.ne.s32.totalorder %v402_v37, 0  ;;  %v7485_v37 = vld [vmem:[%s7161_s6 + $0x70] sm:$0xff]  ;;  %p6877_p12 = por %p6876_p9, %p6875_p7 }
  0x86   : > { %5646 = vmatprep.subr.bf16.mxu1 %v6663_v32  ;;  %v7281_v32 = vld [vmem:[%s7161_s6 + $0x30] sm:$0xff] }
  0x87   : > { %v927_v43 = vrot.slane %v7281_v32, 7  ;;  %v1108_v5 = vrot.slane %v7281_v32, 1  ;;  %p6878_p2 = pnand %p6877_p12, %p6871_p3 }
  0x88   : > { %5535 = vmatpush3.bf16.msra.mxu0 %v6664_v34  ;;  %v7288_v34 = vpack.c.bf16 %v1168_v23, %v1169_v24  ;;  %v7380_v24 = vld [vmem:[%s7161_s6 + $0x50] sm:$0xff]  ;;  %v10356_v23 = vmov 0 }
  0x89   : > { %5647 = vmatpush3.bf16.msra.mxu1 %v6665_v36  ;;  %5536 = vmatprep.subr.bf16.mxu0 %v6666_v38  ;;  %v7296_v36 = vpack.c.bf16 %v984_v28, %v985_v29  ;;  %v1105_v38 = vrot.slane %v821_v6, 1  ;;  %v983_v53 = vsel %vm10079_vm2, %v926_v15, %v927_v43  ;;  %v1164_v13 = vsel %vm10078_vm3, %v1107_v4, %v1108_v5  ;;  %v6681_v29 = vld [vmem:[#allocation6 + $0x128] sm:$0xff]  }
  0x8a   : > { %5648 = vmatprep.subr.bf16.mxu1 %v6667_v40  ;;  %v6674_v40 = vld [vmem:[#allocation6 + $0x150] sm:$0xff]   ;;  %v7368_v15 = vpack.c.bf16 %v7284_v33, %v7281_v32  ;;  %v292_v28 = vadd.s32 112, %v7172_v22  ;;  %v381_v32 = vand.u32 15, %v287_v11  ;;  %v931_v47 = vrot.slane %v7380_v24, 7 }
  0x8b   : > { %v1166_v49 = vsel %vm10078_vm3, %v1105_v38, %v1106_v39  ;;  %v1167_v50 = vsel %vm10078_vm3, %v1104_v10, %v1105_v38  ;;  %v388_v10 = vand.u32 15, %v288_v58  ;;  %v10337_v38 = vmov 0 }
  0x8c   : > { %5537 = vmatpush3.bf16.msra.mxu0 %v6668_v42  ;;  %v374_v42 = vand.u32 15, %v286_v30  ;;  %v7389_v30 = vpack.c.bf16 %v1164_v13, %v1165_v14  ;;  %v10338_v38 = vsel %vm7392_vm12, 4294967295, %v10337_v38  ;;  %v7419_v58 = vadd.s32 128, %v7172_v22  ;;  %v6686_v14 = vld [vmem:[#allocation6 + $0x1c8] sm:$0xff]  }
  0x8d   : > { %5649 = vmatpush3.bf16.msra.mxu1 %v6669_v44  ;;  %5746 = vmatprep.subr.bf16.mxu0 %v6670_v56  ;;  %v928_v44 = vrot.slane %v7284_v33, 7  ;;  %v7326_v56 = vld [vmem:[%s7161_s6 + $0x40] sm:$0xff]  ;;  %vm7375_vm11 = vcmp.ne.s32.totalorder %v388_v10, 0  ;;  %v979_v11 = vsel %vm10079_vm2, %v930_v8, %v931_v47  ;;  %v7453_v13 = vadd.s32 120, %v7172_v22 }
  0x8e   : > { %vm754_vm0 = vcmp.ne.s32.totalorder %v374_v42, 0  ;;  %v929_v6 = vrot.slane %v7326_v56, 7  ;;  %v1110_v42 = vrot.slane %v7326_v56, 1  ;;  %vm7404_vm15 = vmpackc.low %vm10080_vm4, %vm7375_vm11  ;;  %v7432_v4 = vpack.c.bf16 %v7330_v59, %v7326_v56 }
  0x8f   : > { %4869 = vmatmul.mubr.msk.bf16.vlgmr.msra.gmra.mrb[0].mxu0 %vm7202_vm5, %v7192_v46  ;;  %v982_v52 = vsel %vm10079_vm2, %v927_v43, %v928_v44  ;;  %vm7344_vm6 = vmpackc.low %vm10080_vm4, %vm754_vm0  ;;  %v395_v43 = vand.u32 15, %v289_v16  ;;  %vm7414_vm0 = vcmp.ne.s32.totalorder %v381_v32, 15  ;;  %v10350_v16 = vmov 0 }
  0x90   : > { %1951 = vmatprep.mubr.bf16.mxu0 %v7213_v57  ;;  %5747 = vmatpush3.bf16.msra.mxu0 %v6671_v62  ;;  %v7340_v62 = vpack.c.bf16 %v1166_v49, %v1167_v50  ;;  %v980_v19 = vsel %vm10079_vm2, %v929_v6, %v930_v8  ;;  %v416_v49 = vand.u32 15, %v292_v28  ;;  %v6683_v50 = vld [vmem:[#allocation6 + $0x130] sm:$0xff]   ;;  %10345 = vst [vmem:[#allocation25_spill] sm:$0xff] %v7432_v4  ;;  %v1111_v28 = vrot.slane %v7330_v59, 1  ;;  %v6691_v59 = vld [vmem:[#allocation6 + $0x198] sm:$0xff]  }
  0x91   : > { %4920 = vmatmul.mubr.msk.bf16.vlgmr.msra.gmra.mrb[0].mxu1 %vm7228_vm8, %v4919_v3  ;;  %5748 = vmatprep.subr.bf16.mxu0 %v6672_v20  ;;  %v7348_v3 = vpack.c.bf16 %v982_v52, %v983_v53  ;;  %v981_v20 = vsel %vm10079_vm2, %v928_v44, %v929_v6  ;;  %v6682_v44 = vld [vmem:[#allocation6 + $0x170] sm:$0xff]   ;;  %v6684_v52 = vld [vmem:[#allocation6 + $0x1c0] sm:$0xff]   ;;  %vm7445_vm11 = vcmp.ne.s32.totalorder %v395_v43, 15  ;;  %v430_v32 = vand.u32 15, %v7419_v58  ;;  %v6693_v58 = vld [vmem:[#allocation6 + $0x138] sm:$0xff]  }
  0x92   : > { %4923 = vmatprep.mubr.msk.bf16.mxu1 %vm7259_vm10, %v7264_v21  ;;  %v7397_v39 = vpack.c.bf16 %v980_v19, %v981_v20  ;;  %5858 = vmatprep.subr.bf16.mxu1 %v6684_v52  ;;  %v7467_v19 = vadd.s32 144, %v7172_v22  ;;  %v7501_v52 = vld [vmem:[%s7161_s6 + $0x88] sm:$0xff]  ;;  %v7557_v56 = vadd.s32 152, %v7172_v22  ;;  %v10382_v46 = vrot.slane %v7380_v24, 1 }
  0x93   : > { %10334 = vst [vmem:[#allocation22_spill] sm:$0xff] %v7348_v3 }
  0x94   : > { %5749 = vmatpush3.bf16.msra.mxu0 %v6673_v26  ;;  %v7383_v26 = vld [vmem:[%s7161_s6 + $0x58] sm:$0xff]  ;;  %10339 = vst [vmem:[#allocation23_spill] sm:$0xff] %v7397_v39 }
  0x95   : > { %5750 = vmatprep.subr.bf16.mxu0 %v6674_v40  ;;  %v1109_v40 = vrot.slane %v7284_v33, 1  ;;  %v291_v33 = vadd.s32 104, %v7172_v22  ;;  %v10379_v54 = vrot.slane %v7383_v26, 1 }
  0x97   : > { %4872 = vmatmul.mubr.msk.bf16.gmra.mrb[4].mxu0 %vm7209_vm7, %v4871_v1  ;;  %v10331_v1 = vmov 0  ;;  %v1163_v63 = vsel %vm10078_vm3, %v1108_v5, %v1109_v40  ;;  %v7612_v5 = vld [vmem:[%s7161_s6 + $0xb8] sm:$0xff]  ;;  %v10381_v8 = vmov %v10379_v54 }
  0x98   : > { %1959 = vmatprep.mubr.bf16.mxu0 %v7270_v25  ;;  %5751 = vmatpush3.bf16.msra.mxu0 %v6675_v45  ;;  %v10332_v1 = vsel %vm7344_vm6, 4294967295, %v10331_v1  ;;  %v10340_v45 = vmov 0 }
  0x99   : > { %4926 = vmatmul.mubr.msk.bf16.gmra.mrb[4].mxu1 %vm7291_vm13, %v7288_v34  ;;  %5752 = vmatprep.subr.bf16.mxu0 %v6676_v48  ;;  %10333 = vst [vmem:[#allocation21_spill] sm:$0xff] %v10332_v1  ;;  %v10341_v45 = vsel %vm7404_vm15, 4294967295, %v10340_v45  ;;  %v932_v48 = vrot.slane %v7383_v26, 7  ;;  %v10400_v1 = vmov 0 }
  0x9a   : > { %4929 = vmatprep.mubr.msk.bf16.mxu1 %vm7300_vm14, %v7296_v36  ;;  %10342 = vst [vmem:[#allocation24_spill] sm:$0xff] %v10341_v45  ;;  %v7657_v45 = vld [vmem:[%s7161_s6 + $0xc8] sm:$0xff] }
  0x9b   : > { %v978_v10 = vsel %vm10079_vm2, %v931_v47, %v932_v48  ;;  %vm7462_vm2 = vcmp.ne.s32.totalorder %v416_v49, 0  ;;  %v7493_v47 = vld [vmem:[%s7161_s6 + $0x78] sm:$0xff]  ;;  %v6687_v49 = vld [vmem:[#allocation6 + $0x188] sm:$0xff]  }
  0x9c   : > { %5753 = vmatpush3.bf16.msra.mxu0 %v6677_v60  ;;  %v1162_v60 = vsel %vm10078_vm3, %v1109_v40, %v1110_v42  ;;  %vm7458_vm3 = vmpackc.low %vm7414_vm0, %vm10080_vm4  ;;  %v7488_v40 = vpack.c.bf16 %v978_v10, %v979_v11  ;;  %v7518_v11 = vadd.s32 136, %v7172_v22  ;;  %v7539_v10 = vld [vmem:[%s7161_s6 + $0x90] sm:$0xff] }
  0x9d   : > { %5754 = vmatprep.subr.bf16.mxu0 %v6678_v7  ;;  %v7439_v7 = vld [vmem:[%s7161_s6 + $0x60] sm:$0xff]  ;;  %v10351_v16 = vsel %vm7458_vm3, 4294967295, %v10350_v16  ;;  %v7472_v20 = vpack.c.bf16 %v1162_v60, %v1163_v63  ;;  %vm7477_vm0 = vmpackc.low %vm10080_vm4, %vm7434_vm9  ;;  %v6688_v60 = vld [vmem:[#allocation6 + $0x1d0] sm:$0xff]   ;;  %vm10360_vm9 = vcmp.lt.s32.totalorder %v7172_v22, 7 }
  0x9e   : > { %10352 = vst [vmem:[#allocation26_spill] sm:$0xff] %v10351_v16  ;;  %v10357_v23 = vsel %vm7477_vm0, 4294967295, %v10356_v23  ;;  %10359 = vst [vmem:[#allocation29_spill] sm:$0xff] %v7488_v40  ;;  %v933_v43 = vrot.slane %v7439_v7, 7  ;;  %v6689_v63 = vld [vmem:[#allocation6 + $0x190] sm:$0xff]   ;;  %v10378_v55 = vrot.slane %v7439_v7, 1 }
  0x9f   : > { %4875 = vmatmul.mubr.msk.bf16.gmra.mrb[8].mxu0 %vm7259_vm10, %v7264_v21  ;;  %10355 = vst [vmem:[#allocation27_spill] sm:$0xff] %v7472_v20  ;;  %10358 = vst [vmem:[#allocation28_spill] sm:$0xff] %v10357_v23  ;;  %v6700_v16 = vld [vmem:[#allocation6 + $0x1f8] sm:$0xff]  }
  0xa0   : > { %1967 = vmatprep.mubr.bf16.mxu0 %v7319_v51  ;;  %5755 = vmatpush3.bf16.msra.mxu0 %v6679_v9  ;;  %v6685_v9 = vld [vmem:[#allocation6 + $0x180] sm:$0xff]   ;;  %vm10362_vm4 = vmmov %vm10360_vm9 }
  0xa1   : > { %4932 = vmatmul.mubr.msk.bf16.gmra.mrb[8].mxu1 %vm7336_vm1, %v7340_v62  ;;  %5756 = vmatprep.subr.bf16.mxu0 %v6680_v17  ;;  %v409_v17 = vand.u32 15, %v291_v33 }
  0xa2   : > { %4935 = vmatprep.mubr.msk.bf16.mxu1 %vm7344_vm6, %v7348_v3  ;;  %5859 = vmatpush3.bf16.msra.mxu1 %v6685_v9  ;;  %v7514_v9 = vpack.c.bf16 %v7383_v26, %v7380_v24 }
  0xa3   : > { %5860 = vmatprep.subr.bf16.mxu1 %v6686_v14  ;;  %v1161_v14 = vsel %vm10362_vm4, %v1110_v42, %v1111_v28  ;;  %vm7533_vm7 = vcmp.ne.s32.totalorder %v409_v17, 15  ;;  %v444_v42 = vand.u32 15, %v7467_v19  ;;  %v6690_v17 = vld [vmem:[#allocation6 + $0x1d8] sm:$0xff]   ;;  %vm7550_vm4 = vcmp.ne.s32.totalorder %v430_v32, 0  ;;  %v7560_v19 = vld [vmem:[%s7161_s6 + $0xa0] sm:$0xff] }
  0xa4   : > { %5757 = vmatpush3.bf16.msra.mxu0 %v6681_v29  ;;  %v10088_v29 = vrot.slane %v7380_v24, 1  ;;  %10361 = vst [vmem:[#allocation30_spill] sm:$0xff] %v7514_v9  ;;  %v437_v32 = vand.u32 15, %v7518_v11  ;;  %v7604_v11 = vpack.c.bf16 %v7450_v12, %v7439_v7  ;;  %v10387_v24 = vand.u32 15, %v7453_v13 }
  0xa5   : > { %5758 = vmatprep.subr.bf16.mxu0 %v6682_v44  ;;  %v10087_v44 = vrot.slane %v7450_v12, 7 }
  0xa6   : > { %5861 = vmatpush3.bf16.msra.mxu1 %v6687_v49  ;;  %v1160_v6 = vsel %vm10360_vm9, %v1111_v28, %v10088_v29  ;;  %vm10363_vm9 = vcmp.lt.s32.totalorder %v7172_v22, 1  ;;  %v7597_v29 = vadd.s32 168, %v7172_v22  ;;  %10377 = vst [vmem:[#allocation34_spill] sm:$0xff] %v7604_v11 }
  0xa7   : > { %4878 = vmatmul.mubr.msk.bf16.gmra.mrb[12].mxu0 %vm7300_vm14, %v7296_v36  ;;  %v976_v49 = vsel %vm10363_vm9, %v933_v43, %v10087_v44  ;;  %vm10364_vm8 = vmmov %vm10363_vm9  ;;  %5862 = vmatprep.subr.bf16.mxu1 %v6688_v60  ;;  %v7545_v44 = vadd.s32 160, %v7172_v22  ;;  %v7565_v28 = vpack.c.bf16 %v1160_v6, %v1161_v14  ;;  %v7571_v60 = vld [vmem:[%s7161_s6 + $0xa8] sm:$0xff]  ;;  %v7585_v14 = vadd.s32 176, %v7172_v22 }
  0xa8   : > { %1975 = vmatprep.mubr.bf16.mxu0 %v7368_v15  ;;  %5759 = vmatpush3.bf16.msra.mxu0 %v6683_v50  ;;  %v7498_v50 = vld [vmem:[%s7161_s6 + $0x80] sm:$0xff]  ;;  %v977_v0 = vsel %vm10364_vm8, %v932_v48, %v933_v43  ;;  %v7548_v48 = vld [vmem:[%s7161_s6 + $0x98] sm:$0xff]  ;;  %vm10370_vm8 = vmmov 1  }
  0xa9   : > { %4938 = vmatmul.mubr.msk.bf16.gmra.mrb[12].mxu1 %vm7392_vm12, %v7389_v30  ;;  %10369 = vst [vmem:[#allocation31_spill] sm:$0xff] %v7565_v28  ;;  %vm7576_vm9 = vmpackc.low %vm7445_vm11, %vm10370_vm8  ;;  %v7581_v6 = vpack.c.bf16 %v976_v49, %v977_v0  ;;  %v7600_v0 = vld [vmem:[%s7161_s6 + $0xb0] sm:$0xff]  ;;  %v6692_v49 = vld [vmem:[#allocation6 + $0x178] sm:$0xff]   ;;  %v472_v26 = vand.u32 15, %v7585_v14 }
  0xaa   : > { %4941 = vmatprep.mubr.msk.bf16.mxu1 %vm7404_vm15, %v7397_v39  ;;  %5863 = vmatpush3.bf16.msra.mxu1 %v6689_v63  ;;  %v10371_v63 = vmov 0  ;;  %vm7590_vm5 = vmpackc.low %vm10370_vm8, %vm7462_vm2  ;;  %vm10380_vm2 = vcmp.lt.s32.totalorder %v7172_v22, 7  ;;  %v6697_v14 = vld [vmem:[#allocation6 + $0x1a8] sm:$0xff]   ;;  %v7723_v43 = vld [vmem:[%s7161_s6 + $0xe0] sm:$0xff] }
  0xab   : > { %5864 = vmatprep.subr.bf16.mxu1 %v6690_v17  ;;  %v10372_v63 = vsel %vm7576_vm9, 4294967295, %v10371_v63  ;;  %v10374_v17 = vmov 0  ;;  %v1158_v53 = vsel %vm10380_vm2, %v10379_v54, %v10378_v55  ;;  %vm10383_vm11 = vmmov %vm10380_vm2  ;;  %5760 = vmatprep.subr.bf16.mxu0 %v6692_v49  ;;  %v10385_v54 = vrot.slane %v7485_v37, 7  ;;  %v6696_v49 = vld [vmem:[#allocation6 + $0x1e8] sm:$0xff]  }
  0xac   : > { %10373 = vst [vmem:[#allocation32_spill] sm:$0xff] %v10372_v63  ;;  %v10375_v17 = vsel %vm7590_vm5, 4294967295, %v10374_v17  ;;  %v1159_v27 = vsel %vm10383_vm11, %v10382_v46, %v10381_v8  ;;  %vm10386_vm2 = vcmp.lt.s32.totalorder %v7172_v22, 1  ;;  %vm7644_vm11 = vcmp.ne.s32.totalorder %v10387_v24, 15  ;;  %5761 = vmatpush3.bf16.msra.mxu0 %v6693_v58  ;;  %v6695_v63 = vld [vmem:[#allocation6 + $0x1a0] sm:$0xff]  }
  0xad   : > { %10376 = vst [vmem:[#allocation33_spill] sm:$0xff] %v10375_v17  ;;  %v7651_v8 = vadd.s32 208, %v7172_v22  ;;  %v10390_v13 = vmov %v10385_v54  ;;  %v10437_v58 = vrot.slane %v7485_v37, 1 }
  0xae   : > { %5865 = vmatpush3.bf16.msra.mxu1 %v6691_v59  ;;  %v7654_v59 = vld [vmem:[%s7161_s6 + $0xc0] sm:$0xff] }
  0xaf   : > { %4881 = vmatmul.mubr.msk.bf16.gmra.mrb[16].mxu0 %vm7344_vm6, %v7348_v3  ;;  %v10458_v3 = vrot.slane %v7539_v10, 1 }
  0xb0   : > { %1983 = vmatprep.mubr.bf16.mxu0 %v7432_v4  ;;  %v7701_v4 = vld [vmem:[%s7161_s6 + $0xd8] sm:$0xff] }
  0xb1   : > { %4944 = vmatmul.mubr.msk.bf16.gmra.mrb[16].mxu1 %vm7458_vm3, %v7472_v20  ;;  %vm7782_vm3 = vcmp.ne.s32.totalorder %v472_v26, 0  ;;  %v10441_v26 = vrot.slane %v7539_v10, 7 }
  0xb2   : > { %4947 = vmatprep.mubr.msk.bf16.mxu1 %vm7477_vm0, %v7488_v40 }
  0xb7   : > { %4884 = vmatmul.mubr.msk.bf16.gmra.mrb[20].mxu0 %vm7404_vm15, %v7397_v39  ;;  %vm7670_vm15 = vcmp.ne.s32.totalorder %v444_v42, 0  ;;  %v7733_v42 = vld [vmem:[%s7161_s6 + $0xe8] sm:$0xff]  ;;  %v10407_v39 = vrot.slane %v7439_v7, 1  ;;  %v10414_v7 = vrot.slane %v7498_v50, 7 }
  0xb8   : > { %1991 = vmatprep.mubr.bf16.mxu0 %v7514_v9  ;;  %v10384_v9 = vrot.slane %v7493_v47, 7 }
  0xb9   : > { %4950 = vmatmul.mubr.msk.bf16.gmra.mrb[20].mxu1 %vm7576_vm9, %v7565_v28  ;;  %v7668_v28 = vpack.c.bf16 %v1158_v53, %v1159_v27  ;;  %v10395_v27 = vmov 0  ;;  %vm7692_vm9 = vcmp.ne.s32.totalorder %v437_v32, 15  ;;  %v10403_v32 = vrot.slane %v7485_v37, 1 }
  0xba   : > { %4953 = vmatprep.mubr.msk.bf16.mxu1 %vm7590_vm5, %v7581_v6  ;;  %v974_v55 = vsel %vm10386_vm2, %v10385_v54, %v10384_v9  ;;  %v6694_v9 = vld [vmem:[#allocation6 + $0x1e0] sm:$0xff]   ;;  %v10391_v54 = vrot.slane %v7450_v12, 7  ;;  %v10434_v53 = vrot.slane %v7493_v47, 1 }
  0xbb   : > { %10392 = vst [vmem:[#allocation35_spill] sm:$0xff] %v7668_v28  ;;  %5866 = vmatprep.subr.bf16.mxu1 %v6694_v9 }
  0xbc   : > { %v975_v24 = vsel %vm10386_vm2, %v10391_v54, %v10390_v13  ;;  %v7677_v13 = vadd.s32 200, %v7172_v22  ;;  %v7680_v54 = vld [vmem:[%s7161_s6 + $0xd0] sm:$0xff]  ;;  %vm7688_vm2 = vmpackc.low %vm7533_vm7, %vm10370_vm8  ;;  %5867 = vmatpush3.bf16.msra.mxu1 %v6695_v63  ;;  %v7730_v63 = vadd.s32 216, %v7172_v22  ;;  %v10436_v46 = vmov %v10434_v53 }
  0xbd   : > { %v10396_v27 = vsel %vm7688_vm2, 4294967295, %v10395_v27  ;;  %v7704_v33 = vpack.c.bf16 %v974_v55, %v975_v24  ;;  %5868 = vmatprep.subr.bf16.mxu1 %v6696_v49  ;;  %vm7710_vm7 = vmpackc.low %vm10370_vm8, %vm7550_vm4  ;;  %v6698_v55 = vld [vmem:[#allocation6 + $0x1f0] sm:$0xff]   ;;  %v7720_v49 = vadd.s32 224, %v7172_v22  ;;  %v10404_v24 = vrot.slane %v7450_v12, 1 }
  0xbe   : > { %10397 = vst [vmem:[#allocation36_spill] sm:$0xff] %v10396_v27  ;;  %v10401_v1 = vsel %vm7710_vm7, 4294967295, %v10400_v1  ;;  %vm10405_vm4 = vcmp.lt.s32.totalorder %v7172_v22, 7  ;;  %v10410_v27 = vand.u32 15, %v7545_v44  ;;  %v10413_v12 = vrot.slane %v7501_v52, 7 }
  0xbf   : > { %4887 = vmatmul.mubr.msk.bf16.gmra.mrb[24].mxu0 %vm7477_vm0, %v7488_v40  ;;  %10402 = vst [vmem:[#allocation37_spill] sm:$0xff] %v10401_v1  ;;  %v1156_v9 = vsel %vm10405_vm4, %v10404_v24, %v10403_v32  ;;  %vm10408_vm0 = vmmov %vm10405_vm4  ;;  %v7752_v40 = vpack.c.bf16 %v7493_v47, %v7485_v37  ;;  %v6699_v32 = vld [vmem:[#allocation6 + $0x1b0] sm:$0xff]  }
  0xc0   : > { %1999 = vmatprep.mubr.bf16.mxu0 %v7604_v11  ;;  %v10406_v11 = vmov %v10404_v24  ;;  %5869 = vmatpush3.bf16.msra.mxu1 %v6697_v14  ;;  %v10417_v24 = vrot.slane %v7493_v47, 7  ;;  %v7780_v14 = vadd.s32 240, %v7172_v22  ;;  %v10444_v47 = vrot.slane %v7501_v52, 7 }
  0xc1   : > { %4956 = vmatmul.mubr.msk.bf16.gmra.mrb[24].mxu1 %vm7688_vm2, %v7668_v28  ;;  %v1157_v23 = vsel %vm10408_vm0, %v10407_v39, %v10406_v11  ;;  %10409 = vst [vmem:[#allocation38_spill] sm:$0xff] %v7752_v40  ;;  %vm7756_vm2 = vcmp.ne.s32.totalorder %v10410_v27, 0  ;;  %vm10415_vm0 = vcmp.lt.s32.totalorder %v7172_v22, 1  ;;  %v10416_v11 = vmov %v10414_v7  ;;  %5870 = vmatprep.subr.bf16.mxu1 %v6698_v55 }
  0xc2   : > { %4959 = vmatprep.mubr.msk.bf16.mxu1 %vm7710_vm7, %v7704_v33  ;;  %v972_v39 = vsel %vm10415_vm0, %v10414_v7, %v10413_v12  ;;  %vm10418_vm4 = vmmov %vm10415_vm0  ;;  %v10419_v27 = vand.u32 15, %v7557_v56  ;;  %v10424_v56 = vmov 0  ;;  %v7798_v55 = vpack.c.bf16 %v1156_v9, %v1157_v23  ;;  %v6701_v7 = vld [vmem:[#allocation6 + $0x1b8] sm:$0xff]  }
  0xc3   : > { %v973_v44 = vsel %vm10418_vm4, %v10417_v24, %v10416_v11  ;;  %vm7794_vm0 = vmpackc.low %vm7644_vm11, %vm10370_vm8  ;;  %v10427_v23 = vmov 0  ;;  %v7818_v24 = vadd.s32 232, %v7172_v22  ;;  %v7850_v11 = vpack.c.bf16 %v7501_v52, %v7498_v50 }
  0xc4   : > { %vm7775_vm6 = vcmp.ne.s32.totalorder %v10419_v27, 15  ;;  %v10425_v56 = vsel %vm7794_vm0, 4294967295, %v10424_v56  ;;  %v7803_v27 = vld [vmem:[#allocation6 + $0x200] sm:$0xff]   ;;  %v7806_v20 = vpack.c.bf16 %v972_v39, %v973_v44  ;;  %5871 = vmatpush3.bf16.msra.mxu1 %v6699_v32  ;;  %vm7812_vm11 = vmpackc.low %vm10370_vm8, %vm7670_vm15  ;;  %v10430_v32 = vmov 0 }
  0xc5   : > { %10426 = vst [vmem:[#allocation39_spill] sm:$0xff] %v10425_v56  ;;  %v10428_v23 = vsel %vm7812_vm11, 4294967295, %v10427_v23  ;;  %5872 = vmatprep.subr.bf16.mxu1 %v6700_v16  ;;  %6466 = vmatprep.subr.bf16.mxu0 %v7803_v27  ;;  %vm7824_vm4 = vmpackc.low %vm7692_vm9, %vm10370_vm8  ;;  %v10433_v16 = vrot.slane %v7498_v50, 1  ;;  %vm10435_vm15 = vcmp.lt.s32.totalorder %v7172_v22, 7  ;;  %v10440_v9 = vrot.slane %v7548_v48, 7 }
  0xc6   : > { %10429 = vst [vmem:[#allocation40_spill] sm:$0xff] %v10428_v23  ;;  %v10431_v32 = vsel %vm7824_vm4, 4294967295, %v10430_v32  ;;  %vm10438_vm9 = vmmov %vm10435_vm15  ;;  %v10455_v28 = vmov 0 }
  0xc7   : > { %4890 = vmatmul.mubr.msk.bf16.gmra.mrb[28].mxu0 %vm7590_vm5, %v7581_v6  ;;  %10432 = vst [vmem:[#allocation41_spill] sm:$0xff] %v10431_v32  ;;  %v1154_v44 = vsel %vm10435_vm15, %v10434_v53, %v10433_v16  ;;  %v1155_v39 = vsel %vm10438_vm9, %v10437_v58, %v10436_v46  ;;  %10439 = vst [vmem:[#allocation42_spill] sm:$0xff] %v7850_v11  ;;  %vm10442_vm5 = vcmp.lt.s32.totalorder %v7172_v22, 1  ;;  %v10443_v16 = vmov %v10441_v26 }
  0xc8   : > { %2007 = vmatprep.mubr.bf16.mxu0 %v7752_v40  ;;  %5873 = vmatpush3.bf16.msra.mxu1 %v6701_v7  ;;  %v970_v40 = vsel %vm10442_vm5, %v10441_v26, %v10440_v9  ;;  %vm10445_vm15 = vmmov %vm10442_vm5  ;;  %v10446_v46 = vand.u32 15, %v7597_v29  ;;  %v7873_v7 = vpack.c.bf16 %v1154_v44, %v1155_v39  ;;  %v10449_v26 = vmov 0 }
  0xc9   : > { %4962 = vmatmul.mubr.msk.bf16.gmra.mrb[28].mxu1 %vm7794_vm0, %v7798_v55  ;;  %v971_v37 = vsel %vm10445_vm15, %v10444_v47, %v10443_v16  ;;  %vm7878_vm5 = vmpackc.low %vm10370_vm8, %vm7756_vm2  ;;  %v7884_v29 = vadd.s32 256, %v7172_v22  ;;  %v10452_v39 = vmov 0  ;;  %v10462_v16 = vrot.slane %v7498_v50, 1 }
  0xca   : > { %4965 = vmatprep.mubr.msk.bf16.mxu1 %vm7812_vm11, %v7806_v20  ;;  %vm7866_vm9 = vcmp.ne.s32.totalorder %v10446_v46, 15  ;;  %v10450_v26 = vsel %vm7878_vm5, 4294967295, %v10449_v26  ;;  %v7887_v53 = vpack.c.bf16 %v970_v40, %v971_v37  ;;  %vm7892_vm15 = vmpackc.low %vm7775_vm6, %vm10370_vm8  ;;  %v10459_v40 = vrot.slane %v7501_v52, 1 }
  0xcb   : > { %10451 = vst [vmem:[#allocation43_spill] sm:$0xff] %v10450_v26  ;;  %v10453_v39 = vsel %vm7892_vm15, 4294967295, %v10452_v39  ;;  %vm7899_vm2 = vmpackc.low %vm10370_vm8, %vm7782_vm3  ;;  %vm10460_vm6 = vcmp.lt.s32.totalorder %v7172_v22, 7  ;;  %v7923_v37 = vpack.c.bf16 %v7548_v48, %v7539_v10  ;;  %v10465_v46 = vand.u32 15, %v7609_v2 }
  0xcc   : > { %10454 = vst [vmem:[#allocation44_spill] sm:$0xff] %v10453_v39  ;;  %v10456_v28 = vsel %vm7899_vm2, 4294967295, %v10455_v28  ;;  %v1152_v12 = vsel %vm10460_vm6, %v10459_v40, %v10458_v3  ;;  %v10461_v44 = vmov %v10459_v40  ;;  %vm10463_vm3 = vmmov %vm10460_vm6  ;;  %v10469_v3 = vrot.slane %v7560_v19, 7 }
  0xcd   : > { %10457 = vst [vmem:[#allocation45_spill] sm:$0xff] %v10456_v28  ;;  %v1153_v47 = vsel %vm10463_vm3, %v10462_v16, %v10461_v44  ;;  %10464 = vst [vmem:[#allocation46_spill] sm:$0xff] %v7923_v37  ;;  %vm10470_vm6 = vcmp.lt.s32.totalorder %v7172_v22, 1  ;;  %v10472_v40 = vrot.slane %v7548_v48, 7  ;;  %v10474_v2 = vand.u32 15, %v7631_v31 }
  0xce   : > { %v10471_v52 = vmov %v10469_v3  ;;  %vm10473_vm3 = vmmov %vm10470_vm6  ;;  %v10480_v31 = vmov 0  ;;  %v10509_v9 = vmov 0 }
  0xcf   : > { %4893 = vmatmul.mubr.msk.bf16.gmra.mrb[32].mxu0 %vm7710_vm7, %v7704_v33  ;;  %vm7927_vm7 = vcmp.ne.s32.totalorder %v10465_v46, 0  ;;  %v969_v44 = vsel %vm10473_vm3, %v10472_v40, %v10471_v52  ;;  %v10477_v46 = vand.u32 15, %v7651_v8  ;;  %v7971_v8 = vld [vmem:[%s7161_s6 + $0xf0] sm:$0xff]  ;;  %vm10485_vm3 = vcmp.lt.s32.totalorder %v7172_v22, 7 }
  0xd0   : > { %2015 = vmatprep.mubr.bf16.mxu0 %v7850_v11  ;;  %v10468_v11 = vrot.slane %v7571_v60, 7  ;;  %v10487_v52 = vrot.slane %v7539_v10, 1 }
  0xd1   : > { %4968 = vmatmul.mubr.msk.bf16.gmra.mrb[32].mxu1 %vm7824_vm4, %v7873_v7  ;;  %vm7945_vm4 = vcmp.ne.s32.totalorder %v10474_v2, 15  ;;  %vm7951_vm0 = vcmp.ne.s32.totalorder %v10477_v46, 0  ;;  %v10490_v2 = vrot.slane %v7612_v5, 7  ;;  %v10491_v46 = vrot.slane %v7600_v0, 7 }
  0xd2   : > { %4971 = vmatprep.mubr.msk.bf16.mxu1 %vm7878_vm5, %v7887_v53  ;;  %v968_v50 = vsel %vm10470_vm6, %v10469_v3, %v10468_v11  ;;  %v7958_v11 = vpack.c.bf16 %v1152_v12, %v1153_v47  ;;  %vm7966_vm6 = vmpackc.low %vm7866_vm9, %vm10370_vm8  ;;  %v10483_v12 = vrot.slane %v7560_v19, 1  ;;  %v10484_v47 = vrot.slane %v7548_v48, 1 }
  0xd3   : > { %v7961_v3 = vpack.c.bf16 %v968_v50, %v969_v44  ;;  %v10481_v31 = vsel %vm7966_vm6, 4294967295, %v10480_v31  ;;  %vm10488_vm9 = vmmov %vm10485_vm3  ;;  %v7993_v44 = vpack.c.bf16 %v7571_v60, %v7560_v19  ;;  %v10494_v48 = vrot.slane %v7571_v60, 7 }
  0xd4   : > { %10482 = vst [vmem:[#allocation47_spill] sm:$0xff] %v10481_v31  ;;  %v1150_v58 = vsel %vm10485_vm3, %v10484_v47, %v10483_v12  ;;  %v10486_v50 = vmov %v10484_v47  ;;  %v10493_v12 = vmov %v10491_v46  ;;  %v10496_v47 = vand.u32 15, %v7677_v13 }
  0xd5   : > { %v1151_v40 = vsel %vm10488_vm9, %v10487_v52, %v10486_v50  ;;  %10489 = vst [vmem:[#allocation48_spill] sm:$0xff] %v7993_v44  ;;  %v10499_v52 = vand.u32 15, %v7720_v49  ;;  %v10502_v13 = vmov 0  ;;  %v951_v49 = vrot.slane %v7971_v8, 7 }
  0xd6   : > { %vm8009_vm9 = vcmp.ne.s32.totalorder %v10496_v47, 15  ;;  %v10519_v47 = vrot.slane %v7657_v45, 7  ;;  %v10538_v50 = vrot.slane %v7612_v5, 1 }
  0xd7   : > { %4896 = vmatmul.mubr.msk.bf16.gmra.mrb[36].mxu0 %vm7812_vm11, %v7806_v20  ;;  %vm10492_vm11 = vcmp.lt.s32.totalorder %v7172_v22, 1 }
  0xd8   : > { %2023 = vmatprep.mubr.bf16.mxu0 %v7923_v37  ;;  %v966_v37 = vsel %vm10492_vm11, %v10491_v46, %v10490_v2  ;;  %vm10495_vm3 = vmmov %vm10492_vm11  ;;  %v8022_v2 = vpack.c.bf16 %v1150_v58, %v1151_v40  ;;  %v542_v46 = vand.u32 15, %v7884_v29  ;;  %v10506_v58 = vmov 0 }
  0xd9   : > { %4974 = vmatmul.mubr.msk.bf16.gmra.mrb[36].mxu1 %vm7892_vm15, %v7958_v11  ;;  %v967_v10 = vsel %vm10495_vm3, %v10494_v48, %v10493_v12  ;;  %vm8015_vm15 = vcmp.ne.s32.totalorder %v10499_v52, 0  ;;  %vm8027_vm11 = vmpackc.low %vm10370_vm8, %vm7927_vm7  ;;  %v10512_v29 = vrot.slane %v7600_v0, 1  ;;  %v10516_v40 = vrot.slane %v7560_v19, 1 }
  0xda   : > { %4977 = vmatprep.mubr.msk.bf16.mxu1 %vm7899_vm2, %v7961_v3  ;;  %v10503_v13 = vsel %vm8027_vm11, 4294967295, %v10502_v13  ;;  %v8034_v12 = vpack.c.bf16 %v966_v37, %v967_v10  ;;  %vm8039_vm3 = vmpackc.low %vm7945_vm4, %vm10370_vm8  ;;  %v10513_v37 = vrot.slane %v7571_v60, 1  ;;  %vm10514_vm4 = vcmp.lt.s32.totalorder %v7172_v22, 7 }
  0xdb   : > { %10504 = vst [vmem:[#allocation49_spill] sm:$0xff] %v10503_v13  ;;  %v10507_v58 = vsel %vm8039_vm3, 4294967295, %v10506_v58  ;;  %vm8046_vm7 = vmpackc.low %vm10370_vm8, %vm7951_vm0  ;;  %v8070_v10 = vpack.c.bf16 %v7612_v5, %v7600_v0  ;;  %v10520_v52 = vrot.slane %v7654_v59, 7  ;;  %v10523_v60 = vrot.slane %v7612_v5, 7 }
  0xdc   : > { %10505 = vst [vmem:[#allocation50_spill] sm:$0xff] %v8034_v12  ;;  %10508 = vst [vmem:[#allocation51_spill] sm:$0xff] %v10507_v58  ;;  %v10510_v9 = vsel %vm8046_vm7, 4294967295, %v10509_v9  ;;  %v1148_v1 = vsel %vm10514_vm4, %v10513_v37, %v10512_v29  ;;  %v10515_v16 = vmov %v10513_v37  ;;  %v10525_v37 = vand.u32 15, %v7730_v63 }
  0xdd   : > { %10511 = vst [vmem:[#allocation52_spill] sm:$0xff] %v10510_v9  ;;  %vm10517_vm0 = vmmov %vm10514_vm4  ;;  %v10522_v29 = vmov %v10520_v52  ;;  %v10548_v5 = vrot.slane %v7657_v45, 7  ;;  %v10564_v13 = vrot.slane %v7723_v43, 7 }
  0xde   : > { %v1149_v48 = vsel %vm10517_vm0, %v10516_v40, %v10515_v16  ;;  %10518 = vst [vmem:[#allocation53_spill] sm:$0xff] %v8070_v10  ;;  %vm8086_vm0 = vcmp.ne.s32.totalorder %v10525_v37, 15  ;;  %v10544_v37 = vrot.slane %v7701_v4, 7  ;;  %v10557_v16 = vrot.slane %v7657_v45, 1 }
  0xdf   : > { %4899 = vmatmul.mubr.msk.bf16.gmra.mrb[40].mxu0 %vm7878_vm5, %v7887_v53  ;;  %vm10521_vm5 = vcmp.lt.s32.totalorder %v7172_v22, 1  ;;  %v8093_v40 = vpack.c.bf16 %v1148_v1, %v1149_v48  ;;  %v10540_v1 = vmov %v10538_v50  ;;  %v10541_v48 = vrot.slane %v7600_v0, 1 }
  0xe0   : > { %2031 = vmatprep.mubr.bf16.mxu0 %v7993_v44  ;;  %v964_v44 = vsel %vm10521_vm5, %v10520_v52, %v10519_v47  ;;  %vm10524_vm4 = vmmov %vm10521_vm5  ;;  %v10528_v47 = vand.u32 15, %v7780_v14  ;;  %v10534_v14 = vmov 0 }
  0xe1   : > { %4980 = vmatmul.mubr.msk.bf16.gmra.mrb[40].mxu1 %vm7966_vm6, %v8022_v2  ;;  %v965_v19 = vsel %vm10524_vm4, %v10523_v60, %v10522_v29  ;;  %vm8107_vm4 = vmpackc.low %vm8009_vm9, %vm10370_vm8  ;;  %v10531_v29 = vmov 0  ;;  %vm10539_vm9 = vcmp.lt.s32.totalorder %v7172_v22, 7 }
  0xe2   : > { %4983 = vmatprep.mubr.msk.bf16.mxu1 %vm8027_vm11, %v8034_v12  ;;  %vm8097_vm5 = vcmp.ne.s32.totalorder %v10528_v47, 0  ;;  %v8102_v63 = vpack.c.bf16 %v964_v44, %v965_v19  ;;  %v10532_v29 = vsel %vm8107_vm4, 4294967295, %v10531_v29  ;;  %v10537_v44 = vrot.slane %v7654_v59, 1 }
  0xe3   : > { %10533 = vst [vmem:[#allocation54_spill] sm:$0xff] %v10532_v29  ;;  %v8138_v19 = vpack.c.bf16 %v7657_v45, %v7654_v59  ;;  %v10545_v47 = vrot.slane %v7680_v54, 7  ;;  %v10566_v45 = vrot.slane %v7701_v4, 7  ;;  %v6725_v29 = vld [vmem:[#allocation8 + $0x80] sm:$0xff]  }
  0xe4   : > { %v1146_v23 = vsel %vm10539_vm9, %v10538_v50, %v10537_v44  ;;  %v8153_v50 = vld [vmem:[%s7161_s6 + $0xf8] sm:$0xff] }
  0xe5   : > { %10543 = vst [vmem:[#allocation56_spill] sm:$0xff] %v8138_v19  ;;  %v10547_v44 = vmov %v10545_v47 }
  0xe7   : > { %4902 = vmatmul.mubr.msk.bf16.gmra.mrb[44].mxu0 %vm7899_vm2, %v7961_v3  ;;  %vm8114_vm2 = vmpackc.low %vm10370_vm8, %vm8015_vm15 }
  0xe8   : > { %2039 = vmatprep.mubr.bf16.mxu0 %v8070_v10  ;;  %v10535_v14 = vsel %vm8114_vm2, 4294967295, %v10534_v14  ;;  %vm10542_vm15 = vmmov %vm10539_vm9 }
  0xe9   : > { %10536 = vst [vmem:[#allocation55_spill] sm:$0xff] %v10535_v14  ;;  %4986 = vmatmul.mubr.msk.bf16.gmra.mrb[44].mxu1 %vm8039_vm3, %v8093_v40  ;;  %v1147_v60 = vsel %vm10542_vm15, %v10541_v48, %v10540_v1  ;;  %vm10546_vm3 = vcmp.lt.s32.totalorder %v7172_v22, 1  ;;  %vm8173_vm15 = vmpackc.low %vm10370_vm8, %vm8097_vm5 }
  0xea   : > { %4989 = vmatprep.mubr.msk.bf16.mxu1 %vm8046_vm7, %v8102_v63  ;;  %v962_v10 = vsel %vm10546_vm3, %v10545_v47, %v10544_v37  ;;  %vm10549_vm9 = vmmov %vm10546_vm3  ;;  %v8158_v1 = vpack.c.bf16 %v1146_v23, %v1147_v60  ;;  %v10550_v37 = vmov 0  ;;  %v10553_v47 = vmov 0 }
  0xeb   : > { %v963_v0 = vsel %vm10549_vm9, %v10548_v5, %v10547_v44  ;;  %vm8166_vm3 = vmpackc.low %vm8086_vm0, %vm10370_vm8  ;;  %v10554_v47 = vsel %vm8173_vm15, 4294967295, %v10553_v47  ;;  %v309_v60 = vadd.s32 248, %v7172_v22  ;;  %vm10558_vm0 = vcmp.lt.s32.totalorder %v7172_v22, 7 }
  0xec   : > { %v8161_v48 = vpack.c.bf16 %v962_v10, %v963_v0  ;;  %v10551_v37 = vsel %vm8166_vm3, 4294967295, %v10550_v37  ;;  %10555 = vst [vmem:[#allocation58_spill] sm:$0xff] %v10554_v47  ;;  %v10556_v10 = vrot.slane %v7680_v54, 1  ;;  %v10559_v44 = vmov %v10557_v16  ;;  %vm10561_vm5 = vmmov %vm10558_vm0 }
  0xed   : > { %10552 = vst [vmem:[#allocation57_spill] sm:$0xff] %v10551_v37  ;;  %v10560_v5 = vrot.slane %v7654_v59, 1  ;;  %v8199_v23 = vpack.c.bf16 %v7701_v4, %v7680_v54  ;;  %v10646_v47 = vrot.slane %v8153_v50, 7 }
  0xee   : > { %v1144_v52 = vsel %vm10558_vm0, %v10557_v16, %v10556_v10  ;;  %v10565_v10 = vmov %v10564_v13  ;;  %vm10567_vm0 = vmmov %vm10549_vm9  ;;  %v10568_v16 = vand.u32 15, %v7818_v24  ;;  %v10571_v24 = vrot.slane %v7723_v43, 1 }
  0xef   : > { %4905 = vmatmul.mubr.msk.bf16.gmra.mrb[48].mxu0 %vm8027_vm11, %v8034_v12  ;;  %v1145_v0 = vsel %vm10561_vm5, %v10560_v5, %v10559_v44  ;;  %10562 = vst [vmem:[#allocation59_spill] sm:$0xff] %v8199_v23  ;;  %v961_v59 = vsel %vm10567_vm0, %v10566_v45, %v10565_v10  ;;  %v8247_v45 = vpack.c.bf16 %v7733_v42, %v7723_v43  ;;  %v10588_v44 = vrot.slane %v7723_v43, 1  ;;  %v6703_v43 = vld [vmem:[#allocation6 + $0x208] sm:$0xff]  }
  0xf0   : > { %2047 = vmatprep.mubr.bf16.mxu0 %v8138_v19  ;;  %v10563_v19 = vrot.slane %v7733_v42, 7  ;;  %vm8215_vm5 = vcmp.ne.s32.totalorder %v10568_v16, 15  ;;  %v8222_v5 = vpack.c.bf16 %v1144_v52, %v1145_v0 }
  0xf1   : > { %4992 = vmatmul.mubr.msk.bf16.gmra.mrb[48].mxu1 %vm8107_vm4, %v8158_v1 }
  0xf2   : > { %4995 = vmatprep.mubr.msk.bf16.mxu1 %vm8114_vm2, %v8161_v48  ;;  %v960_v12 = vsel %vm10549_vm9, %v10564_v13, %v10563_v19  ;;  %v10572_v19 = vrot.slane %v7701_v4, 1  ;;  %vm10573_vm9 = vcmp.lt.s32.totalorder %v7172_v22, 7 }
  0xf3   : > { %v8225_v13 = vpack.c.bf16 %v960_v12, %v961_v59  ;;  %v10575_v12 = vrot.slane %v7680_v54, 1  ;;  %vm10576_vm0 = vmmov %vm10573_vm9  ;;  %v10577_v59 = vrot.slane %v8153_v50, 7  ;;  %v10581_v54 = vmov 0 }
  0xf4   : > { %v1142_v52 = vsel %vm10573_vm9, %v10572_v19, %v10571_v24  ;;  %v10574_v0 = vmov %v10572_v19 }
  0xf5   : > { %v1143_v10 = vsel %vm10576_vm0, %v10575_v12, %v10574_v0  ;;  %vm8265_vm0 = vmpackc.low %vm8215_vm5, %vm10370_vm8  ;;  %vm10587_vm5 = vcmp.lt.s32.totalorder %v7172_v22, 7  ;;  %v10590_v12 = vmov 0 }
  0xf6   : > { %v8260_v4 = vpack.c.bf16 %v1142_v52, %v1143_v10  ;;  %v10582_v54 = vsel %vm8265_vm0, 4294967295, %v10581_v54  ;;  %v535_v52 = vand.u32 15, %v309_v60  ;;  %v6704_v10 = vld [vmem:[#allocation6 + $0x210] sm:$0xff]  }
  0xf7   : > { %4908 = vmatmul.mubr.msk.bf16.gmra.mrb[52].mxu0 %vm8046_vm7, %v8102_v63  ;;  %vm10578_vm7 = vcmp.lt.s32.totalorder %v7172_v22, 1  ;;  %10583 = vst [vmem:[#allocation60_spill] sm:$0xff] %v10582_v54 }
  0xf8   : > { %2055 = vmatprep.mubr.bf16.mxu0 %v8199_v23  ;;  %v958_v16 = vsel %vm10578_vm7, %v951_v49, %v10577_v59  ;;  %v10579_v23 = vrot.slane %v7733_v42, 7  ;;  %vm10580_vm9 = vmmov %vm10578_vm7  ;;  %v6708_v59 = vld [vmem:[#allocation6 + $0x230] sm:$0xff]  }
  0xf9   : > { %4998 = vmatmul.mubr.msk.bf16.gmra.mrb[52].mxu1 %vm8166_vm3, %v8222_v5  ;;  %vm778_vm3 = vcmp.ne.s32.totalorder %v542_v46, 0  ;;  %v10189_v46 = vrot.slane %v7971_v8, 1 }
  0xfa   : > { %5001 = vmatprep.mubr.msk.bf16.mxu1 %vm8173_vm15, %v8225_v13  ;;  %v959_v24 = vsel %vm10580_vm9, %v10579_v23, %v951_v49  ;;  %v1131_v49 = vrot.slane %v7733_v42, 1  ;;  %vm8275_vm7 = vmpackc.low %vm10370_vm8, %vm778_vm3  ;;  %v10584_v23 = vmov 0  ;;  %vm813_vm9 = vcmp.ne.s32.totalorder %v535_v52, 15  ;;  %v10600_v52 = vld [vmem:[#allocation31_spill] sm:$0xff] }
  0xfb   : > { %v8270_v19 = vpack.c.bf16 %v958_v16, %v959_v24  ;;  %v10585_v23 = vsel %vm8275_vm7, 4294967295, %v10584_v23  ;;  %vm10589_vm3 = vmmov %vm10587_vm5  ;;  %v10596_v16 = vld [vmem:[#allocation22_spill] sm:$0xff]  ;;  %v10597_v24 = vld [vmem:[#allocation21_spill] sm:$0xff] }
  0xfc   : > { %10586 = vst [vmem:[#allocation61_spill] sm:$0xff] %v10585_v23  ;;  %v1140_v42 = vsel %vm10587_vm5, %v1131_v49, %v10189_v46  ;;  %v1141_v0 = vsel %vm10589_vm3, %v10588_v44, %v1131_v49  ;;  %vm10598_vm3 = vnez %v10597_v24  ;;  %v10599_v49 = vld [vmem:[#allocation25_spill] sm:$0xff]  ;;  %v10604_v44 = vld [vmem:[#allocation24_spill] sm:$0xff]  ;;  %v6714_v23 = vld [vmem:[#allocation8 + $0x50] sm:$0xff]  }
  0xfd   : > { %v8296_v60 = vpack.c.bf16 %v1140_v42, %v1141_v0  ;;  %v10603_v42 = vld [vmem:[#allocation23_spill] sm:$0xff]  ;;  %v10606_v0 = vld [vmem:[#allocation30_spill] sm:$0xff] }
  0xff   : > { %4911 = vmatmul.mubr.msk.bf16.gmra.mrb[56].mxu0 %vm8114_vm2, %v8161_v48  ;;  %vm8299_vm2 = vmpackc.low %vm813_vm9, %vm10370_vm8 }
 0x100   : > { %2063 = vmatprep.mubr.bf16.mxu0 %v8247_v45  ;;  %v10591_v12 = vsel %vm8299_vm2, 4294967295, %v10590_v12 }
 0x101   : > { %5004 = vmatmul.mubr.msk.bf16.gmra.mrb[56].mxu1 %vm8265_vm0, %v8260_v4  ;;  %10592 = vst [vmem:[#allocation62_spill] sm:$0xff] %v10591_v12  ;;  %v6723_v12 = vld [vmem:[#allocation8 + $0x30] sm:$0xff]  }
 0x102   : > { %5007 = vmatprep.mubr.msk.bf16.mxu1 %vm8275_vm7, %v8270_v19 }
 0x107   : > { %4914 = vmatmul.mubr.msk.bf16.gmra.mrb[60].mxu0 %vm8173_vm15, %v8225_v13 }
 0x108   : > { %5013 = vmatprep.mubr.msk.bf16.mxu0 %vm7291_vm13, %v7288_v34  ;;  %v6705_v34 = vld [vmem:[#allocation6 + $0x218] sm:$0xff]  }
 0x109   : > { %5010 = vmatmul.mubr.msk.bf16.gmra.mrb[60].mxu1 %vm8299_vm2, %v8296_v60 }
 0x10a   : > { %2426 = vmatprep.mubr.bf16.mxu1 %v7270_v25 }
 0x10f   : > { %2266 = vmatmul.mubr.bf16.vlgmr.msra.gmra.mrb[64].mxu0 %v7213_v57  ;;  %v6706_v57 = vld [vmem:[#allocation6 + $0x220] sm:$0xff]  }
 0x110   : > { %6467 = vmatpush3.bf16.msra.mxu0 %v7803_v27  ;;  %5016 = vmatprep.mubr.msk.bf16.mxu0 %vm7336_vm1, %v7340_v62  ;;  %v10593_v27 = vld [vmem:[#allocation27_spill] sm:$0xff] }
 0x111   : > { %6468 = vmatprep.subr.bf16.mxu0 %v6703_v43  ;;  %5061 = vmatmul.mubr.msk.bf16.vlgmr.msra.gmra.mrb[64].mxu1 %vm7259_vm10, %v7264_v21  ;;  %v6707_v21 = vld [vmem:[#allocation6 + $0x228] sm:$0xff]   ;;  %vm10615_vm10 = vnez %v10375_v17  ;;  %v6710_v17 = vld [vmem:[#allocation8 + $0x40] sm:$0xff]  }
 0x112   : > { %2434 = vmatprep.mubr.bf16.mxu1 %v7319_v51  ;;  %5994 = vmatprep.subr.bf16.mxu1 %v6710_v17 }
 0x114   : > { %6469 = vmatpush3.bf16.msra.mxu0 %v6703_v43  ;;  %v10607_v43 = vld [vmem:[#allocation35_spill] sm:$0xff] }
 0x115   : > { %6470 = vmatprep.subr.bf16.mxu0 %v6704_v10 }
 0x117   : > { %2274 = vmatmul.mubr.bf16.gmra.mrb[68].mxu0 %v7270_v25  ;;  %v10594_v25 = vld [vmem:[#allocation26_spill] sm:$0xff] }
 0x118   : > { %5019 = vmatprep.mubr.msk.bf16.mxu0 %vm7392_vm12, %v7389_v30  ;;  %6471 = vmatpush3.bf16.msra.mxu0 %v6704_v10  ;;  %vm10595_vm5 = vnez %v10594_v25  ;;  %v10608_v10 = vld [vmem:[#allocation36_spill] sm:$0xff] }
 0x119   : > { %6472 = vmatprep.subr.bf16.mxu0 %v6705_v34  ;;  %5064 = vmatmul.mubr.msk.bf16.gmra.mrb[68].mxu1 %vm7300_vm14, %v7296_v36  ;;  %v6709_v36 = vld [vmem:[#allocation6 + $0x238] sm:$0xff]   ;;  %vm10605_vm14 = vnez %v10604_v44 }
 0x11a   : > { %2442 = vmatprep.mubr.bf16.mxu1 %v7368_v15 }
 0x11c   : > { %6473 = vmatpush3.bf16.msra.mxu0 %v6705_v34  ;;  %v10611_v34 = vld [vmem:[#allocation28_spill] sm:$0xff] }
 0x11d   : > { %6474 = vmatprep.subr.bf16.mxu0 %v6706_v57  ;;  %vm10612_vm13 = vnez %v10611_v34  ;;  %v6711_v34 = vld [vmem:[#allocation8] sm:$0xff]  }
 0x11e   : > { %5995 = vmatpush3.bf16.msra.mxu1 %v6711_v34  ;;  %v1133_v34 = vrot.slane %v8153_v50, 1 }
 0x11f   : > { %2282 = vmatmul.mubr.bf16.gmra.mrb[72].mxu0 %v7319_v51  ;;  %v10601_v51 = vld [vmem:[#allocation32_spill] sm:$0xff] }
 0x120   : > { %5022 = vmatprep.mubr.msk.bf16.mxu0 %vm10595_vm5, %v10593_v27  ;;  %6475 = vmatpush3.bf16.msra.mxu0 %v6706_v57  ;;  %vm10602_vm9 = vnez %v10601_v51  ;;  %v10613_v57 = vld [vmem:[#allocation34_spill] sm:$0xff] }
 0x121   : > { %6476 = vmatprep.subr.bf16.mxu0 %v6707_v21  ;;  %5067 = vmatmul.mubr.msk.bf16.gmra.mrb[72].mxu1 %vm10598_vm3, %v10596_v16  ;;  %vm10609_vm3 = vnez %v10608_v10  ;;  %v10620_v16 = vld [vmem:[#allocation42_spill] sm:$0xff] }
 0x122   : > { %2450 = vmatprep.mubr.bf16.mxu1 %v10599_v49 }
 0x124   : > { %6477 = vmatpush3.bf16.msra.mxu0 %v6707_v21  ;;  %v10616_v21 = vld [vmem:[#allocation38_spill] sm:$0xff] }
 0x125   : > { %6478 = vmatprep.subr.bf16.mxu0 %v6708_v59 }
 0x127   : > { %2290 = vmatmul.mubr.bf16.gmra.mrb[76].mxu0 %v7368_v15  ;;  %v10610_v15 = vld [vmem:[#allocation29_spill] sm:$0xff] }
 0x128   : > { %5025 = vmatprep.mubr.msk.bf16.mxu0 %vm10602_vm9, %v10600_v52  ;;  %6479 = vmatpush3.bf16.msra.mxu0 %v6708_v59  ;;  %v10618_v59 = vld [vmem:[#allocation37_spill] sm:$0xff] }
 0x129   : > { %6480 = vmatprep.subr.bf16.mxu0 %v6709_v36  ;;  %5070 = vmatmul.mubr.msk.bf16.gmra.mrb[76].mxu1 %vm10605_vm14, %v10603_v42  ;;  %vm10614_vm14 = vnez %v10425_v56 }
 0x12a   : > { %2458 = vmatprep.mubr.bf16.mxu1 %v10606_v0 }
 0x12c   : > { %6481 = vmatpush3.bf16.msra.mxu0 %v6709_v36  ;;  %v10630_v36 = vld [vmem:[#allocation50_spill] sm:$0xff] }
 0x12f   : > { %2298 = vmatmul.mubr.bf16.gmra.mrb[80].mxu0 %v10599_v49  ;;  %v10624_v49 = vld [vmem:[#allocation46_spill] sm:$0xff] }
 0x130   : > { %5028 = vmatprep.mubr.msk.bf16.mxu0 %vm10609_vm3, %v10607_v43  ;;  %vm10617_vm3 = vnez %v10431_v32 }
 0x131   : > { %5073 = vmatmul.mubr.msk.bf16.gmra.mrb[80].mxu1 %vm10612_vm13, %v10610_v15  ;;  %vm10619_vm13 = vnez %v10618_v59 }
 0x132   : > { %2466 = vmatprep.mubr.bf16.mxu1 %v10613_v57 }
 0x137   : > { %2306 = vmatmul.mubr.bf16.gmra.mrb[84].mxu0 %v10606_v0 }
 0x138   : > { %5031 = vmatprep.mubr.msk.bf16.mxu0 %vm10614_vm14, %v7798_v55  ;;  %vm10621_vm14 = vnez %v10453_v39 }
 0x139   : > { %5076 = vmatmul.mubr.msk.bf16.gmra.mrb[84].mxu1 %vm10615_vm10, %v7581_v6  ;;  %v10622_v6 = vld [vmem:[#allocation40_spill] sm:$0xff] }
 0x13a   : > { %2474 = vmatprep.mubr.bf16.mxu1 %v10616_v21  ;;  %vm10623_vm10 = vnez %v10622_v6 }
 0x13f   : > { %2314 = vmatmul.mubr.bf16.gmra.mrb[88].mxu0 %v10613_v57 }
 0x140   : > { %5034 = vmatprep.mubr.msk.bf16.mxu0 %vm10617_vm3, %v7873_v7 }
 0x141   : > { %5079 = vmatmul.mubr.msk.bf16.gmra.mrb[88].mxu1 %vm10619_vm13, %v7704_v33  ;;  %vm10625_vm13 = vnez %v10450_v26  ;;  %v10626_v33 = vld [vmem:[#allocation48_spill] sm:$0xff] }
 0x142   : > { %2482 = vmatprep.mubr.bf16.mxu1 %v10620_v16 }
 0x147   : > { %2322 = vmatmul.mubr.bf16.gmra.mrb[92].mxu0 %v10616_v21  ;;  %v10632_v21 = vld [vmem:[#allocation56_spill] sm:$0xff] }
 0x148   : > { %5037 = vmatprep.mubr.msk.bf16.mxu0 %vm10621_vm14, %v7958_v11  ;;  %vm10627_vm14 = vnez %v10507_v58  ;;  %v6730_v58 = vld [vmem:[#allocation8 + $0xd0] sm:$0xff]  }
 0x149   : > { %5082 = vmatmul.mubr.msk.bf16.gmra.mrb[92].mxu1 %vm10623_vm10, %v7806_v20  ;;  %vm10628_vm10 = vnez %v10456_v28  ;;  %v10629_v20 = vld [vmem:[#allocation53_spill] sm:$0xff] }
 0x14a   : > { %2490 = vmatprep.mubr.bf16.mxu1 %v10624_v49 }
 0x14f   : > { %2330 = vmatmul.mubr.bf16.gmra.mrb[96].mxu0 %v10620_v16 }
 0x150   : > { %5040 = vmatprep.mubr.msk.bf16.mxu0 %vm7966_vm6, %v8022_v2 }
 0x151   : > { %5085 = vmatmul.mubr.msk.bf16.gmra.mrb[96].mxu1 %vm10625_vm13, %v7887_v53 }
 0x152   : > { %2498 = vmatprep.mubr.bf16.mxu1 %v10626_v33 }
 0x157   : > { %2338 = vmatmul.mubr.bf16.gmra.mrb[100].mxu0 %v10624_v49 }
 0x158   : > { %5043 = vmatprep.mubr.msk.bf16.mxu0 %vm10627_vm14, %v8093_v40 }
 0x159   : > { %5088 = vmatmul.mubr.msk.bf16.gmra.mrb[100].mxu1 %vm10628_vm10, %v7961_v3  ;;  %vm10633_vm10 = vnez %v10551_v37 }
 0x15a   : > { %2506 = vmatprep.mubr.bf16.mxu1 %v10629_v20 }
 0x15f   : > { %2346 = vmatmul.mubr.bf16.gmra.mrb[104].mxu0 %v10626_v33 }
 0x160   : > { %5046 = vmatprep.mubr.msk.bf16.mxu0 %vm8107_vm4, %v8158_v1 }
 0x161   : > { %5091 = vmatmul.mubr.msk.bf16.gmra.mrb[104].mxu1 %vm8027_vm11, %v10630_v36  ;;  %vm10634_vm11 = vnez %v10510_v9 }
 0x162   : > { %v5538_v53 = vpop.f32.mrb[0].mxu0  ;;  %2514 = vmatprep.mubr.bf16.mxu1 %v10632_v21 }
 0x163   : > { %v5539_v0 = vpop.f32.mrb[1].mxu0 }
 0x164   : > { %v5540_v15 = vadd.f32 %v5539_v0, %v5538_v53  ;;  %v5541_v57 = vpop.f32.mrb[2].mxu0  ;;  %v5650_v3 = vpop.f32.mrb[0].mxu1 }
 0x165   : > { %v5542_v16 = vpop.f32.mrb[3].mxu0  ;;  %v5651_v46 = vpop.f32.mrb[1].mxu1 }
 0x166   : > { %v5543_v49 = vadd.f32 %v5542_v16, %v5541_v57  ;;  %v5652_v33 = vadd.f32 %v5651_v46, %v5650_v3  ;;  %v5653_v28 = vpop.f32.mrb[2].mxu1  ;;  %v10635_v16 = vld [vmem:[#allocation59_spill] sm:$0xff] }
 0x167   : > { %2354 = vmatmul.mubr.bf16.gmra.mrb[108].mxu0 %v10629_v20  ;;  %v5654_v26 = vpop.f32.mrb[3].mxu1 }
 0x168   : > { %5049 = vmatprep.mubr.msk.bf16.mxu0 %vm10633_vm10, %v8222_v5  ;;  %v5655_v42 = vadd.f32 %v5654_v26, %v5653_v28  ;;  %v8403_v6 = vadd.f32 %v5652_v33, %v5540_v15 }
 0x169   : > { %5094 = vmatmul.mubr.msk.bf16.gmra.mrb[108].mxu1 %vm10634_vm11, %v8102_v63  ;;  %vm10636_vm11 = vnez %v10535_v14 }
 0x16a   : > { %v5544_v36 = vpop.f32.mrb[4].mxu0  ;;  %2522 = vmatprep.mubr.bf16.mxu1 %v10635_v16  ;;  %v8409_v46 = vadd.f32 %v5655_v42, %v5543_v49  ;;  %v311_v49 = vadd.s32 264, %v7172_v22 }
 0x16b   : > { %v5545_v53 = vpop.f32.mrb[5].mxu0 }
 0x16c   : > { %v5546_v0 = vadd.f32 %v5545_v53, %v5544_v36  ;;  %v5547_v57 = vpop.f32.mrb[6].mxu0  ;;  %v5656_v3 = vpop.f32.mrb[4].mxu1 }
 0x16d   : > { %v5548_v20 = vpop.f32.mrb[7].mxu0  ;;  %v5657_v26 = vpop.f32.mrb[5].mxu1 }
 0x16e   : > { %v5549_v59 = vadd.f32 %v5548_v20, %v5547_v57  ;;  %v5658_v28 = vadd.f32 %v5657_v26, %v5656_v3  ;;  %v5659_v15 = vpop.f32.mrb[6].mxu1 }
 0x16f   : > { %2362 = vmatmul.mubr.bf16.gmra.mrb[112].mxu0 %v10632_v21  ;;  %v5660_v63 = vpop.f32.mrb[7].mxu1 }
 0x170   : > { %5052 = vmatprep.mubr.msk.bf16.mxu0 %vm8265_vm0, %v8260_v4  ;;  %v5661_v33 = vadd.f32 %v5660_v63, %v5659_v15  ;;  %v8416_v36 = vadd.f32 %v5658_v28, %v5546_v0  ;;  %v549_v15 = vand.u32 15, %v311_v49 }
 0x171   : > { %5097 = vmatmul.mubr.msk.bf16.gmra.mrb[112].mxu1 %vm10636_vm11, %v8161_v48  ;;  %v1297_v48 = vpack.c.bf16 %v8153_v50, %v7971_v8  ;;  %vm10638_vm11 = vcmp.lt.s32.totalorder %v7172_v22, 7 }
 0x172   : > { %v5550_v42 = vpop.f32.mrb[8].mxu0  ;;  %2530 = vmatprep.mubr.bf16.mxu1 %v8247_v45  ;;  %v8422_v20 = vadd.f32 %v5661_v33, %v5549_v59  ;;  %v10637_v33 = vld [vmem:[#allocation15_spill] sm:$0xff]  ;;  %vm10640_vm13 = vmmov %vm10638_vm11  ;;  %vm815_vm0 = vcmp.ne.s32.totalorder %v549_v15, 15 }
 0x173   : > { %v5551_v21 = vpop.f32.mrb[9].mxu0 }
 0x174   : > { %v5552_v53 = vadd.f32 %v5551_v21, %v5550_v42  ;;  %v5553_v57 = vpop.f32.mrb[10].mxu0  ;;  %v5662_v3 = vpop.f32.mrb[8].mxu1  ;;  %v1138_v42 = vsel %vm10638_vm11, %v1133_v34, %v10637_v33  ;;  %v10639_v21 = vrot.slane %v7971_v8, 1  ;;  %vm10647_vm11 = vcmp.lt.s32.totalorder %v7172_v22, 1 }
 0x175   : > { %v5554_v17 = vpop.f32.mrb[11].mxu0  ;;  %v5663_v63 = vpop.f32.mrb[9].mxu1 }
 0x176   : > { %v5555_v26 = vadd.f32 %v5554_v17, %v5553_v57  ;;  %v5664_v0 = vadd.f32 %v5663_v63, %v5662_v3  ;;  %v5665_v28 = vpop.f32.mrb[10].mxu1  ;;  %v1139_v49 = vsel %vm10640_vm13, %v10639_v21, %v1133_v34  ;;  %vm8448_vm13 = vmpackc.low %vm815_vm0, %vm10370_vm8  ;;  %v10641_v34 = vmov 0 }
 0x177   : > { %2370 = vmatmul.mubr.bf16.gmra.mrb[116].mxu0 %v10635_v16  ;;  %v5666_v59 = vpop.f32.mrb[11].mxu1  ;;  %v8443_v9 = vpack.c.bf16 %v1138_v42, %v1139_v49  ;;  %v10642_v34 = vsel %vm8448_vm13, 4294967295, %v10641_v34 }
 0x178   : > { %5055 = vmatprep.mubr.msk.bf16.mxu0 %vm8299_vm2, %v8296_v60  ;;  %v5667_v16 = vadd.f32 %v5666_v59, %v5665_v28  ;;  %v8438_v17 = vadd.f32 %v5664_v0, %v5552_v53  ;;  %10643 = vst [vmem:[#allocation27_spill] sm:$0xff] %v10642_v34  ;;  %v312_v53 = vadd.s32 272, %v7172_v22  ;;  %v6712_v28 = vld [vmem:[#allocation8 + $0x48] sm:$0xff]  }
 0x179   : > { %5100 = vmatmul.mubr.msk.bf16.gmra.mrb[116].mxu1 %vm8173_vm15, %v8225_v13  ;;  %v6713_v13 = vld [vmem:[#allocation8 + $0x8] sm:$0xff]   ;;  %5996 = vmatprep.subr.bf16.mxu1 %v6712_v28  ;;  %vm10654_vm15 = vnez %v10582_v54 }
 0x17a   : > { %v5556_v57 = vpop.f32.mrb[12].mxu0  ;;  %2538 = vmatprep.mubr.bf16.mxu1 %v1297_v48  ;;  %v8445_v44 = vadd.f32 %v5667_v16, %v5555_v26  ;;  %v556_v49 = vand.u32 15, %v312_v53  ;;  %5997 = vmatpush3.bf16.msra.mxu1 %v6713_v13 }
 0x17b   : > { %v5557_v3 = vpop.f32.mrb[13].mxu0  ;;  %5998 = vmatprep.subr.bf16.mxu1 %v6714_v23 }
 0x17c   : > { %v5558_v63 = vadd.f32 %v5557_v3, %v5556_v57  ;;  %v5559_v14 = vpop.f32.mrb[14].mxu0  ;;  %v5668_v15 = vpop.f32.mrb[12].mxu1  ;;  %vm780_vm0 = vcmp.ne.s32.totalorder %v556_v49, 0 }
 0x17d   : > { %v5560_v8 = vpop.f32.mrb[15].mxu0  ;;  %v5669_v59 = vpop.f32.mrb[13].mxu1 }
 0x17e   : > { %v5561_v0 = vadd.f32 %v5560_v8, %v5559_v14  ;;  %v5670_v21 = vadd.f32 %v5669_v59, %v5668_v15  ;;  %v5671_v42 = vpop.f32.mrb[14].mxu1  ;;  %v10644_v15 = vmov 0.0|0.0   ;;  %v10645_v59 = vld [vmem:[#allocation14_spill] sm:$0xff] }
 0x17f   : > { %2378 = vmatmul.mubr.bf16.gmra.mrb[120].mxu0 %v8247_v45  ;;  %v5672_v26 = vpop.f32.mrb[15].mxu1  ;;  %v957_v53 = vsel %vm10647_vm11, %v10646_v47, %v10645_v59  ;;  %vm10651_vm11 = vnez %v10608_v10 }
 0x180   : > { %5058 = vmatprep.mubr.msk.bf16.mxu0 %vm8448_vm13, %v8443_v9  ;;  %v5673_v16 = vadd.f32 %v5672_v26, %v5671_v42  ;;  %v8457_v3 = vadd.f32 %v5670_v21, %v5558_v63 }
 0x181   : > { %5103 = vmatmul.mubr.msk.bf16.gmra.mrb[120].mxu1 %vm8275_vm7, %v8270_v19  ;;  %v5105_v19 = vpack.c.bf16 %v10645_v59, %v957_v53  ;;  %vm8472_vm7 = vmpackc.low %vm10370_vm8, %vm780_vm0  ;;  %vm10652_vm0 = vnez %v10425_v56 }
 0x182   : > { %v5562_v57 = vpop.f32.mrb[16].mxu0  ;;  %2546 = vmatprep.mubr.bf16.mxu1 %v10644_v15  ;;  %v8468_v28 = vadd.f32 %v5673_v16, %v5561_v0 }
 0x183   : > { %v5563_v14 = vpop.f32.mrb[17].mxu0 }
 0x184   : > { %v5564_v45 = vadd.f32 %v5563_v14, %v5562_v57  ;;  %v5565_v8 = vpop.f32.mrb[18].mxu0  ;;  %v5674_v63 = vpop.f32.mrb[16].mxu1  ;;  %v10648_v14 = vmov 0 }
 0x185   : > { %v5566_v13 = vpop.f32.mrb[19].mxu0  ;;  %v5675_v42 = vpop.f32.mrb[17].mxu1  ;;  %v10649_v14 = vsel %vm8472_vm7, 4294967295, %v10648_v14 }
 0x186   : > { %v5567_v21 = vadd.f32 %v5566_v13, %v5565_v8  ;;  %v5676_v26 = vadd.f32 %v5675_v42, %v5674_v63  ;;  %v5677_v57 = vpop.f32.mrb[18].mxu1  ;;  %10650 = vst [vmem:[#allocation26_spill] sm:$0xff] %v10649_v14  ;;  %v6721_v14 = vld [vmem:[#allocation8 + $0x28] sm:$0xff]  }
 0x187   : > { %2386 = vmatmul.mubr.bf16.gmra.mrb[124].mxu0 %v1297_v48  ;;  %v5678_v50 = vpop.f32.mrb[19].mxu1 }
 0x188   : > { %6482 = vmatprep.mubr.msk.bf16.mxu0 %vm7336_vm1, %v7340_v62  ;;  %v5679_v47 = vadd.f32 %v5678_v50, %v5677_v57  ;;  %v8479_v49 = vadd.f32 %v5676_v26, %v5564_v45  ;;  %v6715_v62 = vld [vmem:[#allocation8 + $0x10] sm:$0xff]  }
 0x189   : > { %5106 = vmatmul.mubr.msk.bf16.gmra.mrb[124].mxu1 %vm8472_vm7, %v5105_v19  ;;  %vm10653_vm7 = vnez %v10453_v39  ;;  %v10659_v39 = vld [vmem:[#allocation16_spill] sm:$0xff] }
 0x18a   : > { %v5568_v0 = vpop.f32.mrb[20].mxu0  ;;  %v8483_v53 = vadd.f32 %v5679_v47, %v5567_v21  ;;  %3767 = vmatprep.mubr.bf16.mxu1 %v10644_v15  ;;  %5999 = vmatpush3.bf16.msra.mxu1 %v6715_v62 }
 0x18b   : > { %v5569_v48 = vpop.f32.mrb[21].mxu0 }
 0x18c   : > { %v5570_v16 = vadd.f32 %v5569_v48, %v5568_v0  ;;  %v5571_v8 = vpop.f32.mrb[22].mxu0  ;;  %v5680_v63 = vpop.f32.mrb[20].mxu1 }
 0x18d   : > { %v5572_v13 = vpop.f32.mrb[23].mxu0  ;;  %v5681_v24 = vpop.f32.mrb[21].mxu1 }
 0x18e   : > { %v5573_v42 = vadd.f32 %v5572_v13, %v5571_v8  ;;  %v5682_v45 = vadd.f32 %v5681_v24, %v5680_v63  ;;  %v5683_v26 = vpop.f32.mrb[22].mxu1 }
 0x18f   : > { %6483 = vmatmul.mubr.msk.bf16.vlgmr.msra.gmra.mrb[128].mxu0 %vm7392_vm12, %v7389_v30  ;;  %v5684_v21 = vpop.f32.mrb[23].mxu1 }
 0x190   : > { %6486 = vmatprep.mubr.msk.bf16.mxu0 %vm10595_vm5, %v10593_v27  ;;  %v5685_v19 = vadd.f32 %v5684_v21, %v5683_v26  ;;  %v8492_v50 = vadd.f32 %v5682_v45, %v5570_v16 }
 0x192   : > { %v5574_v57 = vpop.f32.mrb[24].mxu0  ;;  %v8494_v8 = vadd.f32 %v5685_v19, %v5573_v42 }
 0x193   : > { %v5575_v47 = vpop.f32.mrb[25].mxu0 }
 0x194   : > { %v5576_v0 = vadd.f32 %v5575_v47, %v5574_v57  ;;  %v5577_v48 = vpop.f32.mrb[26].mxu0  ;;  %v5686_v30 = vpop.f32.mrb[24].mxu1 }
 0x195   : > { %v5578_v13 = vpop.f32.mrb[27].mxu0  ;;  %v5687_v63 = vpop.f32.mrb[25].mxu1 }
 0x196   : > { %v5579_v24 = vadd.f32 %v5578_v13, %v5577_v48  ;;  %v5688_v23 = vadd.f32 %v5687_v63, %v5686_v30  ;;  %v5689_v27 = vpop.f32.mrb[26].mxu1  ;;  %v6717_v30 = vld [vmem:[#allocation8 + $0x18] sm:$0xff]  }
 0x197   : > { %6487 = vmatmul.mubr.msk.bf16.gmra.mrb[132].mxu0 %vm10602_vm9, %v10600_v52  ;;  %v5690_v16 = vpop.f32.mrb[27].mxu1  ;;  %v6716_v52 = vld [vmem:[#allocation8 + $0x58] sm:$0xff]  }
 0x198   : > { %6490 = vmatprep.mubr.msk.bf16.mxu0 %vm10651_vm11, %v10607_v43  ;;  %v5691_v62 = vadd.f32 %v5690_v16, %v5689_v27  ;;  %v8502_v26 = vadd.f32 %v5688_v23, %v5576_v0  ;;  %6000 = vmatprep.subr.bf16.mxu1 %v6716_v52 }
 0x199   : > { %6001 = vmatpush3.bf16.msra.mxu1 %v6717_v30 }
 0x19a   : > { %v5580_v45 = vpop.f32.mrb[28].mxu0  ;;  %v8504_v57 = vadd.f32 %v5691_v62, %v5579_v24 }
 0x19b   : > { %v5581_v42 = vpop.f32.mrb[29].mxu0 }
 0x19c   : > { %v5582_v21 = vadd.f32 %v5581_v42, %v5580_v45  ;;  %v5583_v19 = vpop.f32.mrb[30].mxu0  ;;  %v5692_v48 = vpop.f32.mrb[28].mxu1 }
 0x19d   : > { %v5584_v47 = vpop.f32.mrb[31].mxu0  ;;  %v5693_v63 = vpop.f32.mrb[29].mxu1 }
 0x19e   : > { %v5585_v13 = vadd.f32 %v5584_v47, %v5583_v19  ;;  %v5694_v43 = vadd.f32 %v5693_v63, %v5692_v48  ;;  %v5695_v27 = vpop.f32.mrb[30].mxu1 }
 0x19f   : > { %6491 = vmatmul.mubr.msk.bf16.gmra.mrb[136].mxu0 %vm10652_vm0, %v7798_v55  ;;  %v5696_v0 = vpop.f32.mrb[31].mxu1 }
 0x1a0   : > { %6494 = vmatprep.mubr.msk.bf16.mxu0 %vm10617_vm3, %v7873_v7  ;;  %v5697_v24 = vadd.f32 %v5696_v0, %v5695_v27  ;;  %v8512_v16 = vadd.f32 %v5694_v43, %v5582_v21 }
 0x1a2   : > { %v5586_v23 = vpop.f32.mrb[32].mxu0  ;;  %v8514_v19 = vadd.f32 %v5697_v24, %v5585_v13 }
 0x1a3   : > { %v5587_v62 = vpop.f32.mrb[33].mxu0 }
 0x1a4   : > { %v5588_v45 = vadd.f32 %v5587_v62, %v5586_v23  ;;  %v5589_v42 = vpop.f32.mrb[34].mxu0  ;;  %v5698_v55 = vpop.f32.mrb[32].mxu1 }
 0x1a5   : > { %v5590_v47 = vpop.f32.mrb[35].mxu0  ;;  %v5699_v63 = vpop.f32.mrb[33].mxu1 }
 0x1a6   : > { %v5591_v48 = vadd.f32 %v5590_v47, %v5589_v42  ;;  %v5700_v7 = vadd.f32 %v5699_v63, %v5698_v55  ;;  %v5701_v52 = vpop.f32.mrb[34].mxu1  ;;  %v6719_v55 = vld [vmem:[#allocation8 + $0x20] sm:$0xff]  }
 0x1a7   : > { %6495 = vmatmul.mubr.msk.bf16.gmra.mrb[140].mxu0 %vm10653_vm7, %v7958_v11  ;;  %v5702_v21 = vpop.f32.mrb[35].mxu1  ;;  %v6718_v11 = vld [vmem:[#allocation8 + $0x60] sm:$0xff]  }
 0x1a8   : > { %6498 = vmatprep.mubr.msk.bf16.mxu0 %vm7966_vm6, %v8022_v2  ;;  %v8522_v30 = vadd.f32 %v5700_v7, %v5588_v45  ;;  %v5703_v43 = vadd.f32 %v5702_v21, %v5701_v52  ;;  %6002 = vmatprep.subr.bf16.mxu1 %v6718_v11 }
 0x1a9   : > { %6003 = vmatpush3.bf16.msra.mxu1 %v6719_v55 }
 0x1aa   : > { %v5592_v13 = vpop.f32.mrb[36].mxu0  ;;  %v8524_v0 = vadd.f32 %v5703_v43, %v5591_v48 }
 0x1ab   : > { %v5593_v27 = vpop.f32.mrb[37].mxu0 }
 0x1ac   : > { %v5594_v24 = vadd.f32 %v5593_v27, %v5592_v13  ;;  %v5595_v23 = vpop.f32.mrb[38].mxu0  ;;  %v5704_v42 = vpop.f32.mrb[36].mxu1 }
 0x1ad   : > { %v5596_v62 = vpop.f32.mrb[39].mxu0  ;;  %v5705_v63 = vpop.f32.mrb[37].mxu1 }
 0x1ae   : > { %v5597_v47 = vadd.f32 %v5596_v62, %v5595_v23  ;;  %v5706_v2 = vadd.f32 %v5705_v63, %v5704_v42  ;;  %v5707_v45 = vpop.f32.mrb[38].mxu1 }
 0x1af   : > { %6499 = vmatmul.mubr.msk.bf16.gmra.mrb[144].mxu0 %vm10627_vm14, %v8093_v40  ;;  %v5708_v48 = vpop.f32.mrb[39].mxu1 }
 0x1b0   : > { %6502 = vmatprep.mubr.msk.bf16.mxu0 %vm8107_vm4, %v8158_v1  ;;  %v8532_v7 = vadd.f32 %v5706_v2, %v5594_v24  ;;  %v5709_v52 = vadd.f32 %v5708_v48, %v5707_v45 }
 0x1b2   : > { %v5598_v21 = vpop.f32.mrb[40].mxu0  ;;  %v8534_v13 = vadd.f32 %v5709_v52, %v5597_v47  ;;  %v313_v47 = vadd.s32 280, %v7172_v22 }
 0x1b3   : > { %v5599_v43 = vpop.f32.mrb[41].mxu0 }
 0x1b4   : > { %v5600_v27 = vadd.f32 %v5599_v43, %v5598_v21  ;;  %v5601_v23 = vpop.f32.mrb[42].mxu0  ;;  %v5710_v40 = vpop.f32.mrb[40].mxu1 }
 0x1b5   : > { %v5602_v62 = vpop.f32.mrb[43].mxu0  ;;  %v5711_v63 = vpop.f32.mrb[41].mxu1 }
 0x1b6   : > { %v5603_v42 = vadd.f32 %v5602_v62, %v5601_v23  ;;  %v5712_v1 = vadd.f32 %v5711_v63, %v5710_v40  ;;  %v5713_v11 = vpop.f32.mrb[42].mxu1  ;;  %v6720_v63 = vld [vmem:[#allocation8 + $0x68] sm:$0xff]  }
 0x1b7   : > { %6503 = vmatmul.mubr.msk.bf16.gmra.mrb[148].mxu0 %vm10633_vm10, %v8222_v5  ;;  %v5714_v24 = vpop.f32.mrb[43].mxu1  ;;  %v563_v5 = vand.u32 15, %v313_v47  ;;  %6004 = vmatprep.subr.bf16.mxu1 %v6720_v63 }
 0x1b8   : > { %6506 = vmatprep.mubr.msk.bf16.mxu0 %vm10654_vm15, %v8260_v4  ;;  %v8543_v55 = vadd.f32 %v5712_v1, %v5600_v27  ;;  %v5715_v2 = vadd.f32 %v5714_v24, %v5713_v11  ;;  %6005 = vmatpush3.bf16.msra.mxu1 %v6721_v14 }
 0x1b9   : > { %vm817_vm15 = vcmp.ne.s32.totalorder %v563_v5, 15 }
 0x1ba   : > { %v5604_v45 = vpop.f32.mrb[44].mxu0  ;;  %v8545_v52 = vadd.f32 %v5715_v2, %v5603_v42  ;;  %v8557_v2 = vpack.c.bf16 %v10637_v33, %v10637_v33 }
 0x1bb   : > { %v5605_v48 = vpop.f32.mrb[45].mxu0 }
 0x1bc   : > { %v5606_v21 = vadd.f32 %v5605_v48, %v5604_v45  ;;  %v5607_v43 = vpop.f32.mrb[46].mxu0  ;;  %v5716_v62 = vpop.f32.mrb[44].mxu1  ;;  %10655 = vst [vmem:[#allocation22_spill] sm:$0xff] %v8557_v2 }
 0x1bd   : > { %v5608_v23 = vpop.f32.mrb[47].mxu0  ;;  %v5717_v15 = vpop.f32.mrb[45].mxu1 }
 0x1be   : > { %v5609_v40 = vadd.f32 %v5608_v23, %v5607_v43  ;;  %v5718_v4 = vadd.f32 %v5717_v15, %v5716_v62  ;;  %v5719_v27 = vpop.f32.mrb[46].mxu1 }
 0x1bf   : > { %6507 = vmatmul.mubr.msk.bf16.gmra.mrb[152].mxu0 %vm8299_vm2, %v8296_v60  ;;  %v5720_v42 = vpop.f32.mrb[47].mxu1  ;;  %vm8562_vm2 = vmpackc.low %vm817_vm15, %vm10370_vm8  ;;  %vm10663_vm15 = vcmp.lt.s32.totalorder %v7172_v22, 7 }
 0x1c0   : > { %6510 = vmatprep.mubr.msk.bf16.mxu0 %vm8448_vm13, %v8443_v9  ;;  %v8553_v1 = vadd.f32 %v5718_v4, %v5606_v21  ;;  %v5721_v11 = vadd.f32 %v5720_v42, %v5719_v27  ;;  %v10656_v9 = vmov 0  ;;  %vm10678_vm13 = vcmp.lt.s32.totalorder %v7172_v22, 1 }
 0x1c1   : > { %v10657_v9 = vsel %vm8562_vm2, 4294967295, %v10656_v9  ;;  %vm10680_vm10 = vmmov %vm10678_vm13 }
 0x1c2   : > { %v5610_v24 = vpop.f32.mrb[48].mxu0  ;;  %v8559_v60 = vadd.f32 %v5721_v11, %v5609_v40  ;;  %10658 = vst [vmem:[#allocation25_spill] sm:$0xff] %v10657_v9 }
 0x1c3   : > { %v5611_v47 = vpop.f32.mrb[49].mxu0 }
 0x1c4   : > { %v5612_v15 = vadd.f32 %v5611_v47, %v5610_v24  ;;  %v5613_v45 = vpop.f32.mrb[50].mxu0  ;;  %v5722_v14 = vpop.f32.mrb[48].mxu1 }
 0x1c5   : > { %v5614_v48 = vpop.f32.mrb[51].mxu0  ;;  %v5723_v43 = vpop.f32.mrb[49].mxu1 }
 0x1c6   : > { %v5615_v21 = vadd.f32 %v5614_v48, %v5613_v45  ;;  %v5724_v23 = vadd.f32 %v5723_v43, %v5722_v14  ;;  %v5725_v5 = vpop.f32.mrb[50].mxu1  ;;  %v6722_v48 = vld [vmem:[#allocation8 + $0x70] sm:$0xff]  }
 0x1c7   : > { %6511 = vmatmul.mubr.msk.bf16.gmra.mrb[156].mxu0 %vm8562_vm2, %v8557_v2  ;;  %v5726_v62 = vpop.f32.mrb[51].mxu1  ;;  %6006 = vmatprep.subr.bf16.mxu1 %v6722_v48 }
 0x1c8   : > { %v8569_v40 = vadd.f32 %v5724_v23, %v5612_v15  ;;  %v5727_v63 = vadd.f32 %v5726_v62, %v5725_v5  ;;  %6007 = vmatpush3.bf16.msra.mxu1 %v6723_v12 }
 0x1ca   : > { %v5616_v4 = vpop.f32.mrb[52].mxu0  ;;  %v8571_v42 = vadd.f32 %v5727_v63, %v5615_v21 }
 0x1cb   : > { %v5617_v27 = vpop.f32.mrb[53].mxu0 }
 0x1cc   : > { %v5618_v11 = vadd.f32 %v5617_v27, %v5616_v4  ;;  %v5619_v24 = vpop.f32.mrb[54].mxu0  ;;  %v5728_v34 = vpop.f32.mrb[52].mxu1 }
 0x1cd   : > { %v5620_v47 = vpop.f32.mrb[55].mxu0  ;;  %v5729_v54 = vpop.f32.mrb[53].mxu1 }
 0x1ce   : > { %v5621_v45 = vadd.f32 %v5620_v47, %v5619_v24  ;;  %v5730_v9 = vadd.f32 %v5729_v54, %v5728_v34  ;;  %v5731_v2 = vpop.f32.mrb[54].mxu1  ;;  %v6724_v47 = vld [vmem:[#allocation8 + $0xc0] sm:$0xff]  }
 0x1cf   : > { %v5732_v14 = vpop.f32.mrb[55].mxu1  ;;  %6106 = vmatprep.subr.bf16.mxu0 %v6724_v47  ;;  %v6729_v47 = vld [vmem:[#allocation8 + $0x38] sm:$0xff]  }
 0x1d0   : > { %v8573_v15 = vadd.f32 %v5730_v9, %v5618_v11  ;;  %v5733_v43 = vadd.f32 %v5732_v14, %v5731_v2  ;;  %6107 = vmatpush3.bf16.msra.mxu0 %v6725_v29  ;;  %v6726_v11 = vld [vmem:[#allocation8 + $0xc8] sm:$0xff]  }
 0x1d1   : > { %6108 = vmatprep.subr.bf16.mxu0 %v6726_v11  ;;  %v6732_v11 = vld [vmem:[#allocation8 + $0xd8] sm:$0xff]  }
 0x1d2   : > { %v5622_v23 = vpop.f32.mrb[56].mxu0  ;;  %v8575_v21 = vadd.f32 %v5733_v43, %v5621_v45  ;;  %v6727_v45 = vld [vmem:[#allocation8 + $0x88] sm:$0xff]  }
 0x1d3   : > { %v5623_v5 = vpop.f32.mrb[57].mxu0 }
 0x1d4   : > { %v5624_v62 = vadd.f32 %v5623_v5, %v5622_v23  ;;  %v5625_v63 = vpop.f32.mrb[58].mxu0  ;;  %v5734_v27 = vpop.f32.mrb[56].mxu1  ;;  %6109 = vmatpush3.bf16.msra.mxu0 %v6727_v45  ;;  %v6733_v45 = vld [vmem:[#allocation8 + $0x98] sm:$0xff]  }
 0x1d5   : > { %v5626_v4 = vpop.f32.mrb[59].mxu0  ;;  %v5735_v37 = vpop.f32.mrb[57].mxu1  ;;  %6110 = vmatprep.subr.bf16.mxu0 %v6730_v58 }
 0x1d6   : > { %v5627_v24 = vadd.f32 %v5626_v4, %v5625_v63  ;;  %v5736_v54 = vadd.f32 %v5735_v37, %v5734_v27  ;;  %v5737_v34 = vpop.f32.mrb[58].mxu1  ;;  %v6728_v27 = vld [vmem:[#allocation8 + $0x78] sm:$0xff]  }
 0x1d7   : > { %v5738_v48 = vpop.f32.mrb[59].mxu1  ;;  %6008 = vmatprep.subr.bf16.mxu1 %v6728_v27 }
 0x1d8   : > { %v8577_v12 = vadd.f32 %v5736_v54, %v5624_v62  ;;  %v5739_v2 = vadd.f32 %v5738_v48, %v5737_v34  ;;  %v6731_v62 = vld [vmem:[#allocation8 + $0x90] sm:$0xff]   ;;  %6009 = vmatpush3.bf16.msra.mxu1 %v6729_v47 }
 0x1d9   : > { %6111 = vmatpush3.bf16.msra.mxu0 %v6731_v62 }
 0x1da   : > { %v5628_v9 = vpop.f32.mrb[60].mxu0  ;;  %v8579_v43 = vadd.f32 %v5739_v2, %v5627_v24  ;;  %6112 = vmatprep.subr.bf16.mxu0 %v6732_v11 }
 0x1db   : > { %v5629_v14 = vpop.f32.mrb[61].mxu0 }
 0x1dc   : > { %v5630_v23 = vadd.f32 %v5629_v14, %v5628_v9  ;;  %v5631_v5 = vpop.f32.mrb[62].mxu0  ;;  %v5740_v4 = vpop.f32.mrb[60].mxu1 }
 0x1dd   : > { %v5632_v63 = vpop.f32.mrb[63].mxu0  ;;  %v5741_v29 = vpop.f32.mrb[61].mxu1  ;;  %6113 = vmatpush3.bf16.msra.mxu0 %v6733_v45 }
 0x1de   : > { %v5633_v37 = vadd.f32 %v5632_v63, %v5631_v5  ;;  %v5742_v54 = vadd.f32 %v5741_v29, %v5740_v4  ;;  %v5743_v34 = vpop.f32.mrb[62].mxu1  ;;  %v10660_v4 = vld [vmem:[#allocation17_spill] sm:$0xff] }
 0x1df   : > { %v5744_v48 = vpop.f32.mrb[63].mxu1  ;;  %vm10661_vm8 = vnez %v10660_v4  ;;  %v6734_v29 = vld [vmem:[#allocation8 + $0xe0] sm:$0xff]   ;;  %v6737_v4 = vld [vmem:[#allocation8 + $0xa8] sm:$0xff]  }
 0x1e0   : > { %v8581_v24 = vadd.f32 %v5742_v54, %v5630_v23  ;;  %v5745_v2 = vadd.f32 %v5744_v48, %v5743_v34  ;;  %5229 = vmatmul.mubr.msk.bf16.vlgmr.msra.gmra.mrb[128].mxu1 %vm10661_vm8, %v10659_v39  ;;  %v6735_v54 = vld [vmem:[#allocation8 + $0xa0] sm:$0xff]   ;;  %6114 = vmatprep.subr.bf16.mxu0 %v6734_v29  ;;  %v6736_v39 = vld [vmem:[#allocation8 + $0xe8] sm:$0xff]   ;;  %v6739_v29 = vld [vmem:[#allocation8 + $0xf0] sm:$0xff]   ;;  %vm10665_vm8 = vcmp.lt.s32.totalorder %v7172_v22, 1 }
 0x1e1   : > { %6115 = vmatpush3.bf16.msra.mxu0 %v6735_v54  ;;  %v6741_v54 = vld [vmem:[#allocation8 + $0xb0] sm:$0xff]  }
 0x1e2   : > { %v5762_v9 = vpop.f32.mrb[64].mxu0  ;;  %v8583_v5 = vadd.f32 %v5745_v2, %v5633_v37  ;;  %6116 = vmatprep.subr.bf16.mxu0 %v6736_v39  ;;  %v6742_v39 = vld [vmem:[#allocation8 + $0xf8] sm:$0xff]  }
 0x1e3   : > { %v5763_v14 = vpop.f32.mrb[65].mxu0 }
 0x1e4   : > { %v5764_v63 = vadd.f32 %v5763_v14, %v5762_v9  ;;  %v5765_v31 = vpop.f32.mrb[66].mxu0  ;;  %v5874_v23 = vpop.f32.mrb[64].mxu1 }
 0x1e5   : > { %v5766_v58 = vpop.f32.mrb[67].mxu0  ;;  %v5875_v62 = vpop.f32.mrb[65].mxu1  ;;  %6117 = vmatpush3.bf16.msra.mxu0 %v6737_v4  ;;  %v6743_v4 = vld [vmem:[#allocation8 + $0xb8] sm:$0xff]  }
 0x1e6   : > { %v2268_v27 = vadd.f32 %v5764_v63, %v8403_v6  ;;  %v5767_v47 = vadd.f32 %v5766_v58, %v5765_v31  ;;  %v5876_v37 = vadd.f32 %v5875_v62, %v5874_v23  ;;  %v5877_v48 = vpop.f32.mrb[66].mxu1  ;;  %6118 = vmatprep.subr.bf16.mxu0 %v6739_v29 }
 0x1e7   : > { %v5878_v2 = vpop.f32.mrb[67].mxu1 }
 0x1e8   : > { %v2271_v34 = vadd.f32 %v5767_v47, %v8409_v46  ;;  %v5879_v9 = vadd.f32 %v5878_v2, %v5877_v48  ;;  %v8590_v14 = vadd.f32 %v5876_v37, %v2268_v27 }
 0x1e9   : > { %6119 = vmatpush3.bf16.msra.mxu0 %v6741_v54 }
 0x1ea   : > { %v5768_v11 = vpop.f32.mrb[68].mxu0  ;;  %v8592_v31 = vadd.f32 %v5879_v9, %v2271_v34  ;;  %6120 = vmatprep.subr.bf16.mxu0 %v6742_v39 }
 0x1eb   : > { %v5769_v45 = vpop.f32.mrb[69].mxu0 }
 0x1ec   : > { %v5770_v6 = vadd.f32 %v5769_v45, %v5768_v11  ;;  %v5771_v63 = vpop.f32.mrb[70].mxu0  ;;  %v5880_v23 = vpop.f32.mrb[68].mxu1 }
 0x1ed   : > { %v5772_v58 = vpop.f32.mrb[71].mxu0  ;;  %v5881_v62 = vpop.f32.mrb[69].mxu1  ;;  %6121 = vmatpush3.bf16.msra.mxu0 %v6743_v4 }
 0x1ee   : > { %v2276_v46 = vadd.f32 %v5770_v6, %v8416_v36  ;;  %v5773_v47 = vadd.f32 %v5772_v58, %v5771_v63  ;;  %v5882_v37 = vadd.f32 %v5881_v62, %v5880_v23  ;;  %v5883_v48 = vpop.f32.mrb[70].mxu1  ;;  %v6738_v58 = vld [vmem:[#allocation8 + $0x140] sm:$0xff]  }
 0x1ef   : > { %v5884_v2 = vpop.f32.mrb[71].mxu1  ;;  %6218 = vmatprep.subr.bf16.mxu1 %v6738_v58 }
 0x1f0   : > { %v2279_v27 = vadd.f32 %v5773_v47, %v8422_v20  ;;  %v5885_v11 = vadd.f32 %v5884_v2, %v5883_v48  ;;  %v8596_v9 = vadd.f32 %v5882_v37, %v2276_v46  ;;  %v6740_v20 = vld [vmem:[#allocation8 + $0x100] sm:$0xff]  }
 0x1f1   : > { %6219 = vmatpush3.bf16.msra.mxu1 %v6740_v20 }
 0x1f2   : > { %v5774_v34 = vpop.f32.mrb[72].mxu0  ;;  %v8598_v63 = vadd.f32 %v5885_v11, %v2279_v27 }
 0x1f3   : > { %v5775_v45 = vpop.f32.mrb[73].mxu0 }
 0x1f4   : > { %v5776_v36 = vadd.f32 %v5775_v45, %v5774_v34  ;;  %v5777_v6 = vpop.f32.mrb[74].mxu0  ;;  %v5886_v47 = vpop.f32.mrb[72].mxu1 }
 0x1f5   : > { %v5778_v32 = vpop.f32.mrb[75].mxu0  ;;  %v5887_v62 = vpop.f32.mrb[73].mxu1 }
 0x1f6   : > { %v2284_v23 = vadd.f32 %v5776_v36, %v8438_v17  ;;  %v5779_v29 = vadd.f32 %v5778_v32, %v5777_v6  ;;  %v5888_v54 = vadd.f32 %v5887_v62, %v5886_v47  ;;  %v5889_v37 = vpop.f32.mrb[74].mxu1 }
 0x1f7   : > { %v5890_v48 = vpop.f32.mrb[75].mxu1 }
 0x1f8   : > { %v2287_v46 = vadd.f32 %v5779_v29, %v8445_v44  ;;  %v5891_v2 = vadd.f32 %v5890_v48, %v5889_v37  ;;  %v8602_v11 = vadd.f32 %v5888_v54, %v2284_v23 }
 0x1fa   : > { %v5780_v27 = vpop.f32.mrb[76].mxu0  ;;  %v8604_v4 = vadd.f32 %v5891_v2, %v2287_v46 }
 0x1fb   : > { %v5781_v34 = vpop.f32.mrb[77].mxu0 }
 0x1fc   : > { %v5782_v39 = vadd.f32 %v5781_v34, %v5780_v27  ;;  %v5783_v45 = vpop.f32.mrb[78].mxu0  ;;  %v5892_v36 = vpop.f32.mrb[76].mxu1 }
 0x1fd   : > { %v5784_v17 = vpop.f32.mrb[79].mxu0  ;;  %v5893_v58 = vpop.f32.mrb[77].mxu1 }
 0x1fe   : > { %v2292_v32 = vadd.f32 %v5782_v39, %v8457_v3  ;;  %v5785_v6 = vadd.f32 %v5784_v17, %v5783_v45  ;;  %v5894_v20 = vadd.f32 %v5893_v58, %v5892_v36  ;;  %v5895_v47 = vpop.f32.mrb[78].mxu1  ;;  %v6744_v45 = vld [vmem:[#allocation8 + $0x148] sm:$0xff]  }
 0x1ff   : > { %v5896_v29 = vpop.f32.mrb[79].mxu1  ;;  %v6745_v17 = vld [vmem:[#allocation8 + $0x108] sm:$0xff]   ;;  %6220 = vmatprep.subr.bf16.mxu1 %v6744_v45 }
 0x200   : > { %v2295_v44 = vadd.f32 %v5785_v6, %v8468_v28  ;;  %v5897_v62 = vadd.f32 %v5896_v29, %v5895_v47  ;;  %v8608_v23 = vadd.f32 %v5894_v20, %v2292_v32  ;;  %6221 = vmatpush3.bf16.msra.mxu1 %v6745_v17 }
 0x202   : > { %v5786_v37 = vpop.f32.mrb[80].mxu0  ;;  %v8610_v46 = vadd.f32 %v5897_v62, %v2295_v44 }
 0x203   : > { %v5787_v54 = vpop.f32.mrb[81].mxu0 }
 0x204   : > { %v5788_v48 = vadd.f32 %v5787_v54, %v5786_v37  ;;  %v5789_v27 = vpop.f32.mrb[82].mxu0  ;;  %v5898_v34 = vpop.f32.mrb[80].mxu1 }
 0x205   : > { %v5790_v2 = vpop.f32.mrb[83].mxu0  ;;  %v5899_v28 = vpop.f32.mrb[81].mxu1 }
 0x206   : > { %v2300_v3 = vadd.f32 %v5788_v48, %v8479_v49  ;;  %v5791_v39 = vadd.f32 %v5790_v2, %v5789_v27  ;;  %v5900_v6 = vadd.f32 %v5899_v28, %v5898_v34  ;;  %v5901_v58 = vpop.f32.mrb[82].mxu1 }
 0x207   : > { %v5902_v32 = vpop.f32.mrb[83].mxu1 }
 0x208   : > { %v2303_v36 = vadd.f32 %v5791_v39, %v8483_v53  ;;  %v5903_v20 = vadd.f32 %v5902_v32, %v5901_v58  ;;  %v8614_v29 = vadd.f32 %v5900_v6, %v2300_v3 }
 0x20a   : > { %v5792_v47 = vpop.f32.mrb[84].mxu0  ;;  %v8616_v49 = vadd.f32 %v5903_v20, %v2303_v36  ;;  %v6746_v20 = vld [vmem:[#allocation8 + $0x150] sm:$0xff]  }
 0x20b   : > { %v5793_v44 = vpop.f32.mrb[85].mxu0  ;;  %6222 = vmatprep.subr.bf16.mxu1 %v6746_v20 }
 0x20c   : > { %v5794_v62 = vadd.f32 %v5793_v44, %v5792_v47  ;;  %v5795_v37 = vpop.f32.mrb[86].mxu0  ;;  %v5904_v27 = vpop.f32.mrb[84].mxu1 }
 0x20d   : > { %v5796_v54 = vpop.f32.mrb[87].mxu0  ;;  %v5905_v53 = vpop.f32.mrb[85].mxu1 }
 0x20e   : > { %v2308_v48 = vadd.f32 %v5794_v62, %v8492_v50  ;;  %v5797_v2 = vadd.f32 %v5796_v54, %v5795_v37  ;;  %v5906_v39 = vadd.f32 %v5905_v53, %v5904_v27  ;;  %v5907_v45 = vpop.f32.mrb[86].mxu1  ;;  %v6747_v50 = vld [vmem:[#allocation8 + $0x110] sm:$0xff]  }
 0x20f   : > { %v5908_v17 = vpop.f32.mrb[87].mxu1  ;;  %6223 = vmatpush3.bf16.msra.mxu1 %v6747_v50 }
 0x210   : > { %v2311_v34 = vadd.f32 %v5797_v2, %v8494_v8  ;;  %v5909_v28 = vadd.f32 %v5908_v17, %v5907_v45  ;;  %v8620_v3 = vadd.f32 %v5906_v39, %v2308_v48 }
 0x212   : > { %v5798_v58 = vpop.f32.mrb[88].mxu0  ;;  %v8622_v36 = vadd.f32 %v5909_v28, %v2311_v34 }
 0x213   : > { %v5799_v6 = vpop.f32.mrb[89].mxu0 }
 0x214   : > { %v5800_v32 = vadd.f32 %v5799_v6, %v5798_v58  ;;  %v5801_v47 = vpop.f32.mrb[90].mxu0  ;;  %v5910_v37 = vpop.f32.mrb[88].mxu1 }
 0x215   : > { %v5802_v44 = vpop.f32.mrb[91].mxu0  ;;  %v5911_v8 = vpop.f32.mrb[89].mxu1 }
 0x216   : > { %v2316_v62 = vadd.f32 %v5800_v32, %v8502_v26  ;;  %v5803_v54 = vadd.f32 %v5802_v44, %v5801_v47  ;;  %v5912_v2 = vadd.f32 %v5911_v8, %v5910_v37  ;;  %v5913_v48 = vpop.f32.mrb[90].mxu1 }
 0x217   : > { %v5914_v53 = vpop.f32.mrb[91].mxu1 }
 0x218   : > { %v2319_v27 = vadd.f32 %v5803_v54, %v8504_v57  ;;  %v5915_v39 = vadd.f32 %v5914_v53, %v5913_v48  ;;  %v8626_v17 = vadd.f32 %v5912_v2, %v2316_v62 }
 0x21a   : > { %v5804_v45 = vpop.f32.mrb[92].mxu0  ;;  %v8628_v6 = vadd.f32 %v5915_v39, %v2319_v27 }
 0x21b   : > { %v5805_v34 = vpop.f32.mrb[93].mxu0 }
 0x21c   : > { %v5806_v28 = vadd.f32 %v5805_v34, %v5804_v45  ;;  %v5807_v58 = vpop.f32.mrb[94].mxu0  ;;  %v5916_v47 = vpop.f32.mrb[92].mxu1 }
 0x21d   : > { %v5808_v26 = vpop.f32.mrb[95].mxu0  ;;  %v5917_v44 = vpop.f32.mrb[93].mxu1 }
 0x21e   : > { %v2324_v32 = vadd.f32 %v5806_v28, %v8512_v16  ;;  %v5809_v20 = vadd.f32 %v5808_v26, %v5807_v58  ;;  %v5918_v50 = vadd.f32 %v5917_v44, %v5916_v47  ;;  %v5919_v37 = vpop.f32.mrb[94].mxu1  ;;  %v6748_v58 = vld [vmem:[#allocation8 + $0x158] sm:$0xff]  }
 0x21f   : > { %v5920_v54 = vpop.f32.mrb[95].mxu1  ;;  %6224 = vmatprep.subr.bf16.mxu1 %v6748_v58 }
 0x220   : > { %v2327_v57 = vadd.f32 %v5809_v20, %v8514_v19  ;;  %v5921_v8 = vadd.f32 %v5920_v54, %v5919_v37  ;;  %v8632_v62 = vadd.f32 %v5918_v50, %v2324_v32  ;;  %v6749_v32 = vld [vmem:[#allocation8 + $0x118] sm:$0xff]   ;;  %v6750_v50 = vld [vmem:[#allocation8 + $0x1c0] sm:$0xff]  }
 0x221   : > { %6225 = vmatpush3.bf16.msra.mxu1 %v6749_v32  ;;  %6330 = vmatprep.subr.bf16.mxu0 %v6750_v50 }
 0x222   : > { %v5810_v48 = vpop.f32.mrb[96].mxu0  ;;  %v8634_v27 = vadd.f32 %v5921_v8, %v2327_v57 }
 0x223   : > { %v5811_v2 = vpop.f32.mrb[97].mxu0 }
 0x224   : > { %v5812_v53 = vadd.f32 %v5811_v2, %v5810_v48  ;;  %v5813_v45 = vpop.f32.mrb[98].mxu0  ;;  %v5922_v34 = vpop.f32.mrb[96].mxu1 }
 0x225   : > { %v5814_v39 = vpop.f32.mrb[99].mxu0  ;;  %v5923_v26 = vpop.f32.mrb[97].mxu1 }
 0x226   : > { %v2332_v16 = vadd.f32 %v5812_v53, %v8522_v30  ;;  %v5815_v28 = vadd.f32 %v5814_v39, %v5813_v45  ;;  %v5924_v47 = vadd.f32 %v5923_v26, %v5922_v34  ;;  %v5925_v20 = vpop.f32.mrb[98].mxu1  ;;  %v6752_v30 = vld [vmem:[#allocation8 + $0x160] sm:$0xff]  }
 0x227   : > { %v5926_v44 = vpop.f32.mrb[99].mxu1  ;;  %v6753_v45 = vld [vmem:[#allocation8 + $0x120] sm:$0xff]   ;;  %6226 = vmatprep.subr.bf16.mxu1 %v6752_v30 }
 0x228   : > { %v2335_v19 = vadd.f32 %v5815_v28, %v8524_v0  ;;  %v5927_v37 = vadd.f32 %v5926_v44, %v5925_v20  ;;  %v8638_v48 = vadd.f32 %v5924_v47, %v2332_v16  ;;  %6227 = vmatpush3.bf16.msra.mxu1 %v6753_v45 }
 0x22a   : > { %v5816_v54 = vpop.f32.mrb[100].mxu0  ;;  %v8640_v53 = vadd.f32 %v5927_v37, %v2335_v19 }
 0x22b   : > { %v5817_v57 = vpop.f32.mrb[101].mxu0 }
 0x22c   : > { %v5818_v8 = vadd.f32 %v5817_v57, %v5816_v54  ;;  %v5819_v2 = vpop.f32.mrb[102].mxu0  ;;  %v5928_v34 = vpop.f32.mrb[100].mxu1 }
 0x22d   : > { %v5820_v0 = vpop.f32.mrb[103].mxu0  ;;  %v5929_v58 = vpop.f32.mrb[101].mxu1 }
 0x22e   : > { %v2340_v39 = vadd.f32 %v5818_v8, %v8532_v7  ;;  %v5821_v28 = vadd.f32 %v5820_v0, %v5819_v2  ;;  %v5930_v26 = vadd.f32 %v5929_v58, %v5928_v34  ;;  %v5931_v47 = vpop.f32.mrb[102].mxu1 }
 0x22f   : > { %v5932_v20 = vpop.f32.mrb[103].mxu1 }
 0x230   : > { %v2343_v16 = vadd.f32 %v5821_v28, %v8534_v13  ;;  %v5933_v44 = vadd.f32 %v5932_v20, %v5931_v47  ;;  %v8644_v50 = vadd.f32 %v5930_v26, %v2340_v39  ;;  %v6756_v20 = vld [vmem:[#allocation8 + $0x168] sm:$0xff]  }
 0x231   : > { %6228 = vmatprep.subr.bf16.mxu1 %v6756_v20 }
 0x232   : > { %v5822_v32 = vpop.f32.mrb[104].mxu0  ;;  %v8646_v57 = vadd.f32 %v5933_v44, %v2343_v16 }
 0x233   : > { %v5823_v19 = vpop.f32.mrb[105].mxu0 }
 0x234   : > { %v5824_v37 = vadd.f32 %v5823_v19, %v5822_v32  ;;  %v5825_v54 = vpop.f32.mrb[106].mxu0  ;;  %v5934_v8 = vpop.f32.mrb[104].mxu1  ;;  %v6757_v19 = vld [vmem:[#allocation8 + $0x128] sm:$0xff]  }
 0x235   : > { %v5826_v30 = vpop.f32.mrb[107].mxu0  ;;  %v5935_v45 = vpop.f32.mrb[105].mxu1  ;;  %6229 = vmatpush3.bf16.msra.mxu1 %v6757_v19 }
 0x236   : > { %v2348_v7 = vadd.f32 %v5824_v37, %v8543_v55  ;;  %v5827_v2 = vadd.f32 %v5826_v30, %v5825_v54  ;;  %v5936_v0 = vadd.f32 %v5935_v45, %v5934_v8  ;;  %v5937_v34 = vpop.f32.mrb[106].mxu1 }
 0x237   : > { %v5938_v28 = vpop.f32.mrb[107].mxu1 }
 0x238   : > { %v2351_v13 = vadd.f32 %v5827_v2, %v8545_v52  ;;  %v5939_v58 = vadd.f32 %v5938_v28, %v5937_v34  ;;  %v8650_v39 = vadd.f32 %v5936_v0, %v2348_v7 }
 0x23a   : > { %v5828_v47 = vpop.f32.mrb[108].mxu0  ;;  %v8652_v44 = vadd.f32 %v5939_v58, %v2351_v13 }
 0x23b   : > { %v5829_v26 = vpop.f32.mrb[109].mxu0 }
 0x23c   : > { %v5830_v32 = vadd.f32 %v5829_v26, %v5828_v47  ;;  %v5831_v16 = vpop.f32.mrb[110].mxu0  ;;  %v5940_v54 = vpop.f32.mrb[108].mxu1 }
 0x23d   : > { %v5832_v55 = vpop.f32.mrb[111].mxu0  ;;  %v5941_v30 = vpop.f32.mrb[109].mxu1 }
 0x23e   : > { %v2356_v37 = vadd.f32 %v5830_v32, %v8553_v1  ;;  %v5833_v52 = vadd.f32 %v5832_v55, %v5831_v16  ;;  %v5942_v2 = vadd.f32 %v5941_v30, %v5940_v54  ;;  %v5943_v7 = vpop.f32.mrb[110].mxu1 }
 0x23f   : > { %v5944_v45 = vpop.f32.mrb[111].mxu1 }
 0x240   : > { %v2359_v8 = vadd.f32 %v5833_v52, %v8559_v60  ;;  %v5945_v0 = vadd.f32 %v5944_v45, %v5943_v7  ;;  %v8656_v28 = vadd.f32 %v5942_v2, %v2356_v37  ;;  %v6760_v45 = vld [vmem:[#allocation8 + $0x170] sm:$0xff]  }
 0x241   : > { %6230 = vmatprep.subr.bf16.mxu1 %v6760_v45 }
 0x242   : > { %v5834_v34 = vpop.f32.mrb[112].mxu0  ;;  %v8658_v26 = vadd.f32 %v5945_v0, %v2359_v8 }
 0x243   : > { %v5835_v13 = vpop.f32.mrb[113].mxu0 }
 0x244   : > { %v5836_v58 = vadd.f32 %v5835_v13, %v5834_v34  ;;  %v5837_v47 = vpop.f32.mrb[114].mxu0  ;;  %v5946_v32 = vpop.f32.mrb[112].mxu1  ;;  %v6761_v13 = vld [vmem:[#allocation8 + $0x130] sm:$0xff]  }
 0x245   : > { %v5838_v20 = vpop.f32.mrb[115].mxu0  ;;  %v5947_v19 = vpop.f32.mrb[113].mxu1  ;;  %6231 = vmatpush3.bf16.msra.mxu1 %v6761_v13 }
 0x246   : > { %v2364_v1 = vadd.f32 %v5836_v58, %v8569_v40  ;;  %v5839_v16 = vadd.f32 %v5838_v20, %v5837_v47  ;;  %v5948_v55 = vadd.f32 %v5947_v19, %v5946_v32  ;;  %v5949_v54 = vpop.f32.mrb[114].mxu1 }
 0x247   : > { %v5950_v52 = vpop.f32.mrb[115].mxu1 }
 0x248   : > { %v2367_v60 = vadd.f32 %v5839_v16, %v8571_v42  ;;  %v5951_v30 = vadd.f32 %v5950_v52, %v5949_v54  ;;  %v8662_v37 = vadd.f32 %v5948_v55, %v2364_v1 }
 0x24a   : > { %v5840_v7 = vpop.f32.mrb[116].mxu0  ;;  %v8664_v0 = vadd.f32 %v5951_v30, %v2367_v60 }
 0x24b   : > { %v5841_v2 = vpop.f32.mrb[117].mxu0 }
 0x24c   : > { %v5842_v34 = vadd.f32 %v5841_v2, %v5840_v7  ;;  %v5843_v8 = vpop.f32.mrb[118].mxu0  ;;  %v5952_v47 = vpop.f32.mrb[116].mxu1 }
 0x24d   : > { %v5844_v40 = vpop.f32.mrb[119].mxu0  ;;  %v5953_v20 = vpop.f32.mrb[117].mxu1 }
 0x24e   : > { %v2372_v58 = vadd.f32 %v5842_v34, %v8573_v15  ;;  %v5845_v42 = vadd.f32 %v5844_v40, %v5843_v8  ;;  %v5954_v16 = vadd.f32 %v5953_v20, %v5952_v47  ;;  %v5955_v1 = vpop.f32.mrb[118].mxu1 }
 0x24f   : > { %v5956_v19 = vpop.f32.mrb[119].mxu1 }
 0x250   : > { %v2375_v32 = vadd.f32 %v5845_v42, %v8575_v21  ;;  %v5957_v55 = vadd.f32 %v5956_v19, %v5955_v1  ;;  %v8668_v52 = vadd.f32 %v5954_v16, %v2372_v58  ;;  %v6764_v19 = vld [vmem:[#allocation8 + $0x178] sm:$0xff]  }
 0x251   : > { %6232 = vmatprep.subr.bf16.mxu1 %v6764_v19 }
 0x252   : > { %v5846_v54 = vpop.f32.mrb[120].mxu0  ;;  %v8670_v2 = vadd.f32 %v5957_v55, %v2375_v32 }
 0x253   : > { %v5847_v60 = vpop.f32.mrb[121].mxu0 }
 0x254   : > { %v5848_v30 = vadd.f32 %v5847_v60, %v5846_v54  ;;  %v5849_v7 = vpop.f32.mrb[122].mxu0  ;;  %v5958_v34 = vpop.f32.mrb[120].mxu1  ;;  %v6765_v60 = vld [vmem:[#allocation8 + $0x138] sm:$0xff]  }
 0x255   : > { %v5850_v45 = vpop.f32.mrb[123].mxu0  ;;  %v5959_v13 = vpop.f32.mrb[121].mxu1  ;;  %6233 = vmatpush3.bf16.msra.mxu1 %v6765_v60 }
 0x256   : > { %v2380_v15 = vadd.f32 %v5848_v30, %v8577_v12  ;;  %v5851_v8 = vadd.f32 %v5850_v45, %v5849_v7  ;;  %v5960_v40 = vadd.f32 %v5959_v13, %v5958_v34  ;;  %v5961_v47 = vpop.f32.mrb[122].mxu1  ;;  %v10238_v30 = vsub.s32 0, %v7172_v22 }
 0x257   : > { %v5962_v42 = vpop.f32.mrb[123].mxu1 }
 0x258   : > { %v2383_v21 = vadd.f32 %v5851_v8, %v8579_v43  ;;  %v5963_v20 = vadd.f32 %v5962_v42, %v5961_v47  ;;  %v8674_v58 = vadd.f32 %v5960_v40, %v2380_v15  ;;  %v882_v15 = vld [vmem:[%s10071_s2] sm:$0x3]  ;;  %v10237_v8 = vsub.s32 1, %v7172_v22 }
 0x259   : > { %v8687_v42 = vrot.slane %v882_v15, %v10238_v30 }
 0x25a   : > { %v5852_v1 = vpop.f32.mrb[124].mxu0  ;;  %v8676_v55 = vadd.f32 %v5963_v20, %v2383_v21  ;;  %v8694_v19 = vrot.slane %v882_v15, %v10237_v8 }
 0x25b   : > { %v5853_v16 = vpop.f32.mrb[125].mxu0 }
 0x25c   : > { %v5854_v54 = vadd.f32 %v5853_v16, %v5852_v1  ;;  %v5855_v32 = vpop.f32.mrb[126].mxu0  ;;  %v5964_v7 = vpop.f32.mrb[124].mxu1 }
 0x25d   : > { %v5856_v12 = vpop.f32.mrb[127].mxu0  ;;  %v5965_v34 = vpop.f32.mrb[125].mxu1 }
 0x25e   : > { %v2388_v43 = vadd.f32 %v5854_v54, %v8581_v24  ;;  %v5857_v45 = vadd.f32 %v5856_v12, %v5855_v32  ;;  %v5966_v21 = vadd.f32 %v5965_v34, %v5964_v7  ;;  %v5967_v40 = vpop.f32.mrb[126].mxu1 }
 0x25f   : > { %v5968_v47 = vpop.f32.mrb[127].mxu1 }
 0x260   : > { %v2391_v13 = vadd.f32 %v5857_v45, %v8583_v5  ;;  %v5969_v24 = vadd.f32 %v5968_v47, %v5967_v40  ;;  %v8689_v1 = vadd.f32 %v5966_v21, %v2388_v43 }
 0x262   : > { %v6484_v20 = vpop.f32.mrb[128].mxu0  ;;  %v8697_v60 = vadd.f32 %v5969_v24, %v2391_v13 }
 0x263   : > { %v2598_v16 = vadd.f32 %v6484_v20, %v8596_v9  ;;  %v2589_v54 = vpop.f32.mrb[129].mxu0 }
 0x264   : > { %v2590_v5 = vadd.f32 %v2589_v54, %v8590_v14  ;;  %v6485_v32 = vpop.f32.mrb[130].mxu0  ;;  %v8716_v54 = vld [vmem:[#allocation8 + $0x200] sm:$0xff]  }
 0x265   : > { %v2722_v12 = vmul.f32 %v8687_v42, %v2598_v16  ;;  %v2601_v7 = vadd.f32 %v6485_v32, %v8598_v63  ;;  %v2592_v45 = vpop.f32.mrb[131].mxu0  ;;  %10662 = vst [vmem:[#allocation31_spill] sm:$0xff] %v8716_v54  ;;  %6514 = vmatprep.subr.bf16.mxu1 %v8716_v54 }
 0x266   : > { %v2720_v43 = vmul.f32 %v8687_v42, %v2590_v5  ;;  %v2593_v34 = vadd.f32 %v2592_v45, %v8592_v31 }
 0x267   : > { %v2758_v9 = vadd.f32 %v8694_v19, %v2722_v12  ;;  %v2723_v15 = vmul.f32 %v8687_v42, %v2601_v7 }
 0x268   : > { %v2756_v21 = vadd.f32 %v8694_v19, %v2720_v43  ;;  %v2721_v14 = vmul.f32 %v8687_v42, %v2593_v34 }
 0x269   : > { %v8707_v40 = vmax.f32 %v2758_v9, 0.0  ;;  %v2759_v13 = vadd.f32 %v8694_v19, %v2723_v15 }
 0x26a   : > { %v8710_v47 = vmax.f32 %v2756_v21, 0.0  ;;  %v2757_v63 = vadd.f32 %v8694_v19, %v2721_v14  ;;  %v6488_v24 = vpop.f32.mrb[132].mxu0 }
 0x26b   : > { %v8713_v20 = vmax.f32 %v2759_v13, 0.0  ;;  %v2614_v31 = vadd.f32 %v6488_v24, %v8608_v23  ;;  %v2605_v16 = vpop.f32.mrb[133].mxu0  ;;  %v2893_v43 = vrot.slane %v8707_v40, 7 }
 0x26c   : > { %v2891_v5 = vrot.slane %v8710_v47, 7  ;;  %v10239_v32 = vrot.slane %v8710_v47, 1  ;;  %v8720_v12 = vmax.f32 %v2757_v63, 0.0  ;;  %v2606_v7 = vadd.f32 %v2605_v16, %v8602_v11  ;;  %v6489_v45 = vpop.f32.mrb[134].mxu0 }
 0x26d   : > { %v2726_v34 = vmul.f32 %v8687_v42, %v2614_v31  ;;  %v2617_v9 = vadd.f32 %v6489_v45, %v8610_v46  ;;  %v2608_v15 = vpop.f32.mrb[135].mxu0  ;;  %v10242_v21 = vrot.slane %v8713_v20, 7  ;;  %v8758_v30 = vpack.c.bf16 %v8713_v20, %v8707_v40 }
 0x26e   : > { %v3066_v23 = vsel %vm10663_vm15, %v10637_v33, %v10239_v32  ;;  %v2892_v11 = vrot.slane %v8720_v12, 7  ;;  %v2724_v14 = vmul.f32 %v8687_v42, %v2606_v7  ;;  %v2609_v24 = vadd.f32 %v2608_v15, %v8604_v4  ;;  %vm10666_vm15 = vmmov %vm10665_vm8  ;;  %v6751_v15 = vld [vmem:[#allocation8 + $0x180] sm:$0xff]  }
 0x26f   : > { %v5279_v13 = vpack.c.bf16 %v3066_v23, %v10637_v33  ;;  %v2762_v63 = vadd.f32 %v8694_v19, %v2726_v34  ;;  %v2727_v46 = vmul.f32 %v8687_v42, %v2617_v9  ;;  %v8742_v16 = vpack.c.bf16 %v8720_v12, %v8710_v47  ;;  %10667 = vst [vmem:[#allocation23_spill] sm:$0xff] %v8758_v30 }
 0x270   : > { %v2760_v31 = vadd.f32 %v8694_v19, %v2724_v14  ;;  %v2957_v45 = vsel %vm10665_vm8, %v2891_v5, %v2892_v11  ;;  %v2958_v7 = vsel %vm10666_vm15, %v10645_v59, %v2891_v5  ;;  %v2725_v9 = vmul.f32 %v8687_v42, %v2609_v24  ;;  %vm10668_vm15 = vmmov %vm10665_vm8  ;;  %v10669_v59 = vld [vmem:[#allocation18_spill] sm:$0xff] }
 0x271   : > { %10664 = vst [vmem:[#allocation32_spill] sm:$0xff] %v8742_v16  ;;  %v8749_v23 = vmax.f32 %v2762_v63, 0.0  ;;  %v2763_v34 = vadd.f32 %v8694_v19, %v2727_v46  ;;  %v5231_v4 = vpack.c.bf16 %v2957_v45, %v2958_v7  ;;  %3775 = vmatprep.mubr.bf16.mxu1 %v8742_v16  ;;  %v2955_v5 = vsel %vm10665_vm8, %v2893_v43, %v10242_v21  ;;  %v6754_v46 = vld [vmem:[#allocation8 + $0x1c8] sm:$0xff]  }
 0x272   : > { %v8753_v14 = vmax.f32 %v2760_v31, 0.0  ;;  %v6492_v8 = vpop.f32.mrb[136].mxu0  ;;  %v2956_v63 = vsel %vm10668_vm15, %v2892_v11, %v2893_v43  ;;  %v3000_v45 = vrot.slane %v8720_v12, 1  ;;  %v2761_v7 = vadd.f32 %v8694_v19, %v2725_v9  ;;  %v10671_v12 = vld [vmem:[#allocation19_spill] sm:$0xff]  ;;  %v6755_v43 = vld [vmem:[#allocation8 + $0x188] sm:$0xff]  }
 0x273   : > { %v2621_v32 = vpop.f32.mrb[137].mxu0  ;;  %vm10670_vm2 = vnez %v10669_v59  ;;  %v2630_v11 = vadd.f32 %v6492_v8, %v8620_v3  ;;  %vm10672_vm8 = vnez %v10671_v12  ;;  %v8782_v54 = vmax.f32 %v2763_v34, 0.0 }
 0x274   : > { %5232 = vmatmul.mubr.msk.bf16.gmra.mrb[132].mxu1 %vm10670_vm2, %v5231_v4  ;;  %5277 = vmatprep.mubr.msk.bf16.mxu0 %vm10670_vm2, %v5231_v4  ;;  %v2622_v24 = vadd.f32 %v2621_v32, %v8614_v29  ;;  %v6493_v31 = vpop.f32.mrb[138].mxu0  ;;  %v2895_v9 = vrot.slane %v8753_v14, 7  ;;  %v8784_v59 = vmax.f32 %v2761_v7, 0.0  ;;  %v8790_v32 = vpack.c.bf16 %v2955_v5, %v2956_v63 }
 0x275   : > { %3783 = vmatprep.mubr.bf16.mxu1 %v8758_v30  ;;  %5280 = vmatmul.mubr.msk.bf16.vlgmr.msra.gmra.mrb[160].mxu0 %vm10672_vm8, %v5279_v13  ;;  %v2633_v4 = vadd.f32 %v6493_v31, %v8622_v36  ;;  %v2624_v21 = vpop.f32.mrb[139].mxu0  ;;  %v2730_v3 = vmul.f32 %v8687_v42, %v2630_v11  ;;  %v6758_v13 = vld [vmem:[#allocation8 + $0x1d0] sm:$0xff]   ;;  %vm10673_vm2 = vnez %v10323_v18  ;;  %vm10675_vm15 = vcmp.lt.s32.totalorder %v7172_v22, 7 }
 0x276   : > { %6331 = vmatpush3.bf16.msra.mxu0 %v6751_v15  ;;  %v2728_v29 = vmul.f32 %v8687_v42, %v2622_v24  ;;  %v2625_v8 = vadd.f32 %v2624_v21, %v8616_v49  ;;  %v2896_v7 = vrot.slane %v8784_v59, 7  ;;  %v8797_v36 = vpack.c.bf16 %v8784_v59, %v8753_v14  ;;  %5283 = vmatprep.mubr.msk.bf16.mxu0 %vm10673_vm2, %v8790_v32  ;;  %vm10677_vm8 = vmmov %vm10675_vm15 }
 0x277   : > { %6332 = vmatprep.subr.bf16.mxu0 %v6754_v46  ;;  %v2731_v12 = vmul.f32 %v8687_v42, %v2633_v4  ;;  %v2766_v15 = vadd.f32 %v8694_v19, %v2730_v3  ;;  %v10674_v21 = vrot.slane %v8707_v40, 1  ;;  %v10676_v46 = vrot.slane %v8710_v47, 1 }
 0x278   : > { %v2764_v24 = vadd.f32 %v8694_v19, %v2728_v29  ;;  %v2729_v49 = vmul.f32 %v8687_v42, %v2625_v8  ;;  %v2953_v11 = vsel %vm10678_vm13, %v2895_v9, %v2896_v7  ;;  %v10679_v4 = vrot.slane %v8713_v20, 7  ;;  %v6759_v29 = vld [vmem:[#allocation8 + $0x190] sm:$0xff]  }
 0x279   : > { %v3064_v5 = vsel %vm10675_vm15, %v3000_v45, %v10674_v21  ;;  %v2767_v63 = vadd.f32 %v8694_v19, %v2731_v12  ;;  %v3065_v31 = vsel %vm10677_vm8, %v10676_v46, %v3000_v45  ;;  %v8820_v8 = vmax.f32 %v2766_v15, 0.0  ;;  %v6762_v45 = vld [vmem:[#allocation8 + $0x1d8] sm:$0xff]   ;;  %vm10686_vm15 = vmmov %vm10677_vm8  ;;  %v6766_v15 = vld [vmem:[#allocation8 + $0x1e0] sm:$0xff]  }
 0x27a   : > { %v2954_v3 = vsel %vm10680_vm10, %v10679_v4, %v2895_v9  ;;  %6333 = vmatpush3.bf16.msra.mxu0 %v6755_v43  ;;  %v8822_v21 = vmax.f32 %v2764_v24, 0.0  ;;  %v2765_v12 = vadd.f32 %v8694_v19, %v2729_v49  ;;  %v6496_v47 = vpop.f32.mrb[140].mxu0  ;;  %v8825_v34 = vpack.c.bf16 %v3064_v5, %v3065_v31 }
 0x27b   : > { %6334 = vmatprep.subr.bf16.mxu0 %v6758_v13  ;;  %v2646_v30 = vadd.f32 %v6496_v47, %v8632_v62  ;;  %v2637_v16 = vpop.f32.mrb[141].mxu0  ;;  %v8832_v43 = vpack.c.bf16 %v2953_v11, %v2954_v3  ;;  %v8836_v9 = vpack.c.bf16 %v8782_v54, %v8749_v23  ;;  %v3004_v13 = vrot.slane %v8784_v59, 1 }
 0x27c   : > { %5235 = vmatmul.mubr.msk.bf16.gmra.mrb[136].mxu1 %vm10673_vm2, %v8790_v32  ;;  %v8841_v49 = vmax.f32 %v2767_v63, 0.0  ;;  %v6497_v62 = vpop.f32.mrb[142].mxu0  ;;  %vm10682_vm10 = vnez %v10325_v35  ;;  %v8849_v11 = vmax.f32 %v2765_v12, 0.0  ;;  %vm10683_vm13 = vnez %v10327_v41  ;;  %v6763_v63 = vld [vmem:[#allocation8 + $0x198] sm:$0xff]   ;;  %v6776_v35 = vld [vmem:[#allocation8 + $0x210] sm:$0xff]  }
 0x27d   : > { %10681 = vst [vmem:[#allocation30_spill] sm:$0xff] %v8836_v9  ;;  %3791 = vmatprep.mubr.bf16.mxu1 %v8797_v36  ;;  %5286 = vmatmul.mubr.msk.bf16.gmra.mrb[164].mxu0 %vm10682_vm10, %v8825_v34  ;;  %v2734_v4 = vmul.f32 %v8687_v42, %v2646_v30  ;;  %v2640_v59 = vpop.f32.mrb[143].mxu0  ;;  %v2638_v3 = vadd.f32 %v2637_v16, %v8626_v17  ;;  %v10684_v5 = vrot.slane %v8753_v14, 1  ;;  %v10685_v12 = vrot.slane %v8713_v20, 1 }
 0x27e   : > { %5289 = vmatprep.mubr.msk.bf16.mxu0 %vm10683_vm13, %v8832_v43  ;;  %6335 = vmatpush3.bf16.msra.mxu0 %v6759_v29  ;;  %v2649_v47 = vadd.f32 %v6497_v62, %v8634_v27  ;;  %v2641_v24 = vadd.f32 %v2640_v59, %v8628_v6  ;;  %v10253_v29 = vrot.slane %v8849_v11, 7  ;;  %v10688_v27 = vrot.slane %v8707_v40, 1 }
 0x27f   : > { %v3062_v30 = vsel %vm10686_vm15, %v10685_v12, %v10684_v5  ;;  %6336 = vmatprep.subr.bf16.mxu0 %v6762_v45  ;;  %v2770_v46 = vadd.f32 %v8694_v19, %v2734_v4  ;;  %v10687_v17 = vmov %v10685_v12  ;;  %v2732_v16 = vmul.f32 %v8687_v42, %v2638_v3 }
 0x280   : > { %v3063_v6 = vsel %vm10677_vm8, %v10688_v27, %v10687_v17  ;;  %v2735_v62 = vmul.f32 %v8687_v42, %v2649_v47  ;;  %v2733_v45 = vmul.f32 %v8687_v42, %v2641_v24  ;;  %v10689_v12 = vrot.slane %v8782_v54, 7 }
 0x281   : > { %v8876_v5 = vpack.c.bf16 %v3062_v30, %v3063_v6  ;;  %v8878_v59 = vmax.f32 %v2770_v46, 0.0  ;;  %v10690_v4 = vrot.slane %v8749_v23, 7  ;;  %vm10691_vm15 = vcmp.lt.s32.totalorder %v7172_v22, 1  ;;  %v6767_v6 = vld [vmem:[#allocation8 + $0x1a0] sm:$0xff]  }
 0x282   : > { %vm10693_vm8 = vmmov %vm10691_vm15  ;;  %v8892_v47 = vpack.c.bf16 %v8849_v11, %v8822_v21  ;;  %6337 = vmatpush3.bf16.msra.mxu0 %v6763_v63  ;;  %v2768_v46 = vadd.f32 %v8694_v19, %v2732_v16  ;;  %v2771_v24 = vadd.f32 %v8694_v19, %v2735_v62  ;;  %v2769_v30 = vadd.f32 %v8694_v19, %v2733_v45  ;;  %v6500_v17 = vpop.f32.mrb[144].mxu0  ;;  %v6768_v62 = vld [vmem:[#allocation8 + $0x1e8] sm:$0xff]  }
 0x283   : > { %v2951_v40 = vsel %vm10691_vm15, %v10690_v4, %v10689_v12  ;;  %v10692_v20 = vmov %v10690_v4  ;;  %6338 = vmatprep.subr.bf16.mxu0 %v6766_v15  ;;  %v2662_v4 = vadd.f32 %v6500_v17, %v8644_v50  ;;  %v10694_v63 = vrot.slane %v8749_v23, 1  ;;  %v10696_v15 = vld [vmem:[#allocation21_spill] sm:$0xff] }
 0x284   : > { %v2952_v3 = vsel %vm10693_vm8, %v2896_v7, %v10692_v20  ;;  %v2653_v20 = vpop.f32.mrb[145].mxu0  ;;  %5238 = vmatmul.mubr.msk.bf16.gmra.mrb[140].mxu1 %vm10683_vm13, %v8832_v43  ;;  %vm10695_vm15 = vcmp.lt.s32.totalorder %v7172_v22, 7  ;;  %v8910_v45 = vmax.f32 %v2768_v46, 0.0  ;;  %vm10697_vm8 = vnez %v10696_v15  ;;  %v10864_v18 = vld [vmem:[#allocation30_spill] sm:$0xff] }
 0x285   : > { %v8897_v27 = vpack.c.bf16 %v2951_v40, %v2952_v3  ;;  %v3060_v16 = vsel %vm10695_vm15, %v3004_v13, %v10694_v63  ;;  %v8912_v40 = vmax.f32 %v2771_v24, 0.0  ;;  %v2654_v3 = vadd.f32 %v2653_v20, %v8638_v48  ;;  %v6501_v50 = vpop.f32.mrb[146].mxu0  ;;  %3799 = vmatprep.mubr.bf16.mxu1 %v8836_v9  ;;  %5292 = vmatmul.mubr.msk.bf16.gmra.mrb[168].mxu0 %vm7336_vm1, %v8876_v5 }
 0x286   : > { %v2738_v17 = vmul.f32 %v8687_v42, %v2662_v4  ;;  %v2665_v63 = vadd.f32 %v6501_v50, %v8646_v57  ;;  %v2656_v7 = vpop.f32.mrb[147].mxu0  ;;  %v10698_v46 = vrot.slane %v8753_v14, 1  ;;  %v10699_v24 = vrot.slane %v8822_v21, 7  ;;  %6339 = vmatpush3.bf16.msra.mxu0 %v6767_v6  ;;  %v6769_v14 = vld [vmem:[#allocation8 + $0x1a8] sm:$0xff]  }
 0x287   : > { %5295 = vmatprep.mubr.msk.bf16.mxu0 %vm10697_vm8, %v8897_v27  ;;  %vm10700_vm13 = vcmp.lt.s32.totalorder %v7172_v22, 1  ;;  %v8937_v12 = vmax.f32 %v2769_v30, 0.0  ;;  %v2736_v9 = vmul.f32 %v8687_v42, %v2654_v3  ;;  %6340 = vmatprep.subr.bf16.mxu0 %v6768_v62  ;;  %v2657_v57 = vadd.f32 %v2656_v7, %v8640_v53 }
 0x288   : > { %v3061_v48 = vsel %vm10695_vm15, %v10698_v46, %v3004_v13  ;;  %v2949_v20 = vsel %vm10700_vm13, %v10699_v24, %v10253_v29  ;;  %v2774_v46 = vadd.f32 %v8694_v19, %v2738_v17  ;;  %v6771_v24 = vld [vmem:[#allocation8 + $0x1f0] sm:$0xff]   ;;  %v2739_v4 = vmul.f32 %v8687_v42, %v2665_v63 }
 0x289   : > { %v8945_v29 = vpack.c.bf16 %v3060_v16, %v3061_v48  ;;  %v10701_v30 = vrot.slane %v8822_v21, 7  ;;  %v10702_v6 = vrot.slane %v8782_v54, 7  ;;  %v2772_v17 = vadd.f32 %v8694_v19, %v2736_v9 }
 0x28a   : > { %v8953_v13 = vmax.f32 %v2774_v46, 0.0  ;;  %v8960_v62 = vpack.c.bf16 %v8841_v49, %v8820_v8  ;;  %v2775_v53 = vadd.f32 %v8694_v19, %v2739_v4  ;;  %v2737_v7 = vmul.f32 %v8687_v42, %v2657_v57  ;;  %v6504_v16 = vpop.f32.mrb[148].mxu0  ;;  %6341 = vmatpush3.bf16.msra.mxu0 %v6769_v14 }
 0x28b   : > { %v2950_v31 = vsel %vm10700_vm13, %v10702_v6, %v10701_v30  ;;  %v10705_v63 = vrot.slane %v8822_v21, 1  ;;  %v10706_v48 = vrot.slane %v8782_v54, 1  ;;  %vm10709_vm13 = vmmov %vm10695_vm15  ;;  %v6772_v30 = vld [vmem:[#allocation8 + $0x1b0] sm:$0xff]   ;;  %v8978_v6 = vmax.f32 %v2772_v17, 0.0  ;;  %v2669_v41 = vpop.f32.mrb[149].mxu0  ;;  %6342 = vmatprep.subr.bf16.mxu0 %v6771_v24  ;;  %v6773_v54 = vld [vmem:[#allocation8 + $0x1f8] sm:$0xff]  }
 0x28c   : > { %v8956_v3 = vpack.c.bf16 %v2949_v20, %v2950_v31  ;;  %10704 = vst [vmem:[#allocation29_spill] sm:$0xff] %v8960_v62  ;;  %v10708_v31 = vrot.slane %v8749_v23, 1  ;;  %v2678_v50 = vadd.f32 %v6504_v16, %v8656_v28  ;;  %5241 = vmatmul.mubr.msk.bf16.gmra.mrb[144].mxu1 %vm10697_vm8, %v8897_v27  ;;  %v8984_v23 = vmax.f32 %v2775_v53, 0.0 }
 0x28d   : > { %v3058_v46 = vsel %vm10695_vm15, %v10706_v48, %v10705_v63  ;;  %v10707_v9 = vmov %v10706_v48  ;;  %v2773_v14 = vadd.f32 %v8694_v19, %v2737_v7  ;;  %v2670_v63 = vadd.f32 %v2669_v41, %v8650_v39  ;;  %v6505_v48 = vpop.f32.mrb[150].mxu0  ;;  %3807 = vmatprep.mubr.bf16.mxu1 %v8892_v47  ;;  %5298 = vmatmul.mubr.msk.bf16.gmra.mrb[172].mxu0 %vm7392_vm12, %v8945_v29  ;;  %v10710_v41 = vld [vmem:[#allocation24_spill] sm:$0xff] }
 0x28e   : > { %10703 = vst [vmem:[#allocation35_spill] sm:$0xff] %v8956_v3  ;;  %v3059_v20 = vsel %vm10709_vm13, %v10708_v31, %v10707_v9  ;;  %v2742_v53 = vmul.f32 %v8687_v42, %v2678_v50  ;;  %v2681_v16 = vadd.f32 %v6505_v48, %v8658_v26  ;;  %v2672_v7 = vpop.f32.mrb[151].mxu0  ;;  %vm10711_vm15 = vnez %v10710_v41 }
 0x28f   : > { %v8992_v28 = vpack.c.bf16 %v3058_v46, %v3059_v20  ;;  %5301 = vmatprep.mubr.msk.bf16.mxu0 %vm10711_vm15, %v8956_v3  ;;  %v9003_v31 = vmax.f32 %v2773_v14, 0.0  ;;  %v2740_v46 = vmul.f32 %v8687_v42, %v2670_v63  ;;  %6343 = vmatpush3.bf16.msra.mxu0 %v6772_v30  ;;  %v6774_v20 = vld [vmem:[#allocation8 + $0x1b8] sm:$0xff]   ;;  %v2673_v26 = vadd.f32 %v2672_v7, %v8652_v44 }
 0x290   : > { %v2778_v24 = vadd.f32 %v8694_v19, %v2742_v53  ;;  %v2743_v50 = vmul.f32 %v8687_v42, %v2681_v16  ;;  %v10712_v48 = vrot.slane %v8841_v49, 7  ;;  %v10713_v4 = vrot.slane %v8820_v8, 7  ;;  %6344 = vmatprep.subr.bf16.mxu0 %v6773_v54 }
 0x291   : > { %vm10714_vm13 = vcmp.lt.s32.totalorder %v7172_v22, 1  ;;  %v2776_v30 = vadd.f32 %v8694_v19, %v2740_v46  ;;  %v10716_v16 = vrot.slane %v8849_v11, 7  ;;  %v9034_v46 = vpack.c.bf16 %v8937_v12, %v8910_v45 }
 0x292   : > { %v2947_v39 = vsel %vm10714_vm13, %v10713_v4, %v10712_v48  ;;  %v10715_v53 = vmov %v10713_v4  ;;  %vm10717_vm8 = vmmov %vm10714_vm13  ;;  %v9024_v7 = vmax.f32 %v2778_v24, 0.0  ;;  %v2779_v9 = vadd.f32 %v8694_v19, %v2743_v50  ;;  %v6508_v63 = vpop.f32.mrb[152].mxu0 }
 0x293   : > { %v2948_v44 = vsel %vm10717_vm8, %v10716_v16, %v10715_v53  ;;  %v2741_v4 = vmul.f32 %v8687_v42, %v2673_v26  ;;  %v9030_v48 = vmax.f32 %v2776_v30, 0.0  ;;  %10719 = vst [vmem:[#allocation38_spill] sm:$0xff] %v9034_v46  ;;  %v10720_v14 = vrot.slane %v8820_v8, 1  ;;  %6345 = vmatpush3.bf16.msra.mxu0 %v6774_v20  ;;  %v2685_v57 = vpop.f32.mrb[153].mxu0 }
 0x294   : > { %v9028_v54 = vpack.c.bf16 %v2947_v39, %v2948_v44  ;;  %v10721_v17 = vrot.slane %v8849_v11, 1  ;;  %vm10722_vm8 = vcmp.lt.s32.totalorder %v7172_v22, 7  ;;  %v10724_v26 = vrot.slane %v8822_v21, 1  ;;  %5244 = vmatmul.mubr.msk.bf16.gmra.mrb[148].mxu1 %vm10711_vm15, %v8956_v3 }
 0x295   : > { %vm10725_vm13 = vmmov %vm10722_vm8  ;;  %v9050_v16 = vmax.f32 %v2779_v9, 0.0  ;;  %v2777_v44 = vadd.f32 %v8694_v19, %v2741_v4  ;;  %v2686_v20 = vadd.f32 %v2685_v57, %v8662_v37  ;;  %3815 = vmatprep.mubr.bf16.mxu1 %v8960_v62  ;;  %5304 = vmatmul.mubr.msk.bf16.gmra.mrb[176].mxu0 %vm10595_vm5, %v8992_v28  ;;  %v10783_v3 = vrot.slane %v9030_v48, 7 }
 0x296   : > { %10718 = vst [vmem:[#allocation34_spill] sm:$0xff] %v9028_v54  ;;  %v3056_v24 = vsel %vm10722_vm8, %v10721_v17, %v10720_v14  ;;  %v10723_v50 = vmov %v10721_v17  ;;  %v2694_v17 = vadd.f32 %v6508_v63, %v8668_v52  ;;  %v6509_v14 = vpop.f32.mrb[154].mxu0  ;;  %v10726_v52 = vld [vmem:[#allocation28_spill] sm:$0xff] }
 0x297   : > { %v3057_v39 = vsel %vm10725_vm13, %v10724_v26, %v10723_v50  ;;  %v2697_v26 = vadd.f32 %v6509_v14, %v8670_v2  ;;  %v2688_v21 = vpop.f32.mrb[155].mxu0  ;;  %vm10727_vm8 = vnez %v10726_v52  ;;  %v2744_v57 = vmul.f32 %v8687_v42, %v2686_v20 }
 0x298   : > { %5307 = vmatprep.mubr.msk.bf16.mxu0 %vm10727_vm8, %v9028_v54  ;;  %v2746_v37 = vmul.f32 %v8687_v42, %v2694_v17  ;;  %v2689_v63 = vadd.f32 %v2688_v21, %v8664_v0  ;;  %v9074_v30 = vpack.c.bf16 %v3056_v24, %v3057_v39  ;;  %v9077_v4 = vmax.f32 %v2777_v44, 0.0 }
 0x299   : > { %v2747_v50 = vmul.f32 %v8687_v42, %v2697_v26  ;;  %v10728_v2 = vrot.slane %v8937_v12, 7  ;;  %v10729_v14 = vrot.slane %v8910_v45, 7  ;;  %vm10730_vm13 = vcmp.lt.s32.totalorder %v7172_v22, 1 }
 0x29a   : > { %v2782_v17 = vadd.f32 %v8694_v19, %v2746_v37  ;;  %v2780_v20 = vadd.f32 %v8694_v19, %v2744_v57  ;;  %v2745_v0 = vmul.f32 %v8687_v42, %v2689_v63  ;;  %v10732_v39 = vrot.slane %v8841_v49, 7  ;;  %vm10733_vm15 = vmmov %vm10730_vm13 }
 0x29b   : > { %v2945_v11 = vsel %vm10730_vm13, %v10729_v14, %v10728_v2  ;;  %v10731_v24 = vmov %v10729_v14  ;;  %v2783_v21 = vadd.f32 %v8694_v19, %v2747_v50  ;;  %v9100_v2 = vpack.c.bf16 %v8912_v40, %v8878_v59  ;;  %v6512_v50 = vpop.f32.mrb[156].mxu0 }
 0x29c   : > { %v2946_v44 = vsel %vm10733_vm15, %v10732_v39, %v10731_v24  ;;  %v10736_v37 = vrot.slane %v8910_v45, 1  ;;  %v10737_v57 = vrot.slane %v8841_v49, 1  ;;  %vm10738_vm13 = vcmp.lt.s32.totalorder %v7172_v22, 7  ;;  %v2701_v41 = vpop.f32.mrb[157].mxu0  ;;  %5247 = vmatmul.mubr.msk.bf16.gmra.mrb[152].mxu1 %vm10727_vm8, %v9028_v54 }
 0x29d   : > { %v9096_v26 = vpack.c.bf16 %v2945_v11, %v2946_v44  ;;  %10735 = vst [vmem:[#allocation46_spill] sm:$0xff] %v9100_v2  ;;  %v9108_v14 = vmax.f32 %v2782_v17, 0.0  ;;  %v9110_v9 = vmax.f32 %v2780_v20, 0.0  ;;  %v2781_v24 = vadd.f32 %v8694_v19, %v2745_v0  ;;  %vm10741_vm15 = vmmov %vm10738_vm13  ;;  %3823 = vmatprep.mubr.bf16.mxu1 %v9034_v46  ;;  %5310 = vmatmul.mubr.msk.bf16.gmra.mrb[180].mxu0 %vm10602_vm9, %v9074_v30 }
 0x29e   : > { %v3054_v63 = vsel %vm10738_vm13, %v10737_v57, %v10736_v37  ;;  %v10739_v11 = vmov %v10737_v57  ;;  %v10740_v39 = vrot.slane %v8820_v8, 1  ;;  %v9119_v53 = vmax.f32 %v2783_v21, 0.0  ;;  %v6513_v57 = vpop.f32.mrb[158].mxu0 }
 0x29f   : > { %10734 = vst [vmem:[#allocation42_spill] sm:$0xff] %v9096_v26  ;;  %v2710_v62 = vadd.f32 %v6512_v50, %v8689_v1  ;;  %v10742_v20 = vrot.slane %v8912_v40, 7  ;;  %v10743_v49 = vrot.slane %v8878_v59, 7  ;;  %vm10744_vm13 = vcmp.lt.s32.totalorder %v7172_v22, 1 }
 0x2a0   : > { %v3055_v44 = vsel %vm10741_vm15, %v10740_v39, %v10739_v11  ;;  %v2713_v37 = vadd.f32 %v6513_v57, %v8697_v60  ;;  %v10747_v1 = vrot.slane %v8878_v59, 7  ;;  %v9158_v50 = vmax.f32 %v2781_v24, 0.0 }
 0x2a1   : > { %v9125_v17 = vpack.c.bf16 %v3054_v63, %v3055_v44  ;;  %v2943_v8 = vsel %vm10744_vm13, %v10743_v49, %v10742_v20  ;;  %v2750_v39 = vmul.f32 %v8687_v42, %v2710_v62  ;;  %v2704_v44 = vpop.f32.mrb[159].mxu0  ;;  %v10745_v20 = vld [vmem:[#allocation33_spill] sm:$0xff]  ;;  %v2702_v49 = vadd.f32 %v2701_v41, %v8674_v58 }
 0x2a2   : > { %vm10746_vm15 = vnez %v10745_v20  ;;  %v2705_v0 = vadd.f32 %v2704_v44, %v8676_v55  ;;  %v10748_v63 = vrot.slane %v8937_v12, 7  ;;  %v2751_v60 = vmul.f32 %v8687_v42, %v2713_v37 }
 0x2a3   : > { %5313 = vmatprep.mubr.msk.bf16.mxu0 %vm10746_vm15, %v9096_v26  ;;  %v2786_v21 = vadd.f32 %v8694_v19, %v2750_v39  ;;  %v2748_v58 = vmul.f32 %v8687_v42, %v2702_v49  ;;  %v9168_v41 = vpack.c.bf16 %v9003_v31, %v8978_v6  ;;  %v10752_v24 = vrot.slane %v8937_v12, 1 }
 0x2a4   : > { %v2944_v11 = vsel %vm10744_vm13, %v10748_v63, %v10747_v1  ;;  %v2749_v55 = vmul.f32 %v8687_v42, %v2705_v0  ;;  %v10751_v1 = vrot.slane %v8878_v59, 1  ;;  %vm10753_vm13 = vcmp.lt.s32.totalorder %v7172_v22, 7  ;;  %5250 = vmatmul.mubr.msk.bf16.gmra.mrb[156].mxu1 %vm10746_vm15, %v9096_v26 }
 0x2a5   : > { %v9161_v46 = vpack.c.bf16 %v2943_v8, %v2944_v11  ;;  %10750 = vst [vmem:[#allocation53_spill] sm:$0xff] %v9168_v41  ;;  %v9170_v57 = vmax.f32 %v2786_v21, 0.0  ;;  %v10754_v63 = vmov %v10752_v24  ;;  %v10755_v11 = vrot.slane %v8910_v45, 1  ;;  %vm10756_vm8 = vmmov %vm10753_vm13  ;;  %3831 = vmatprep.mubr.bf16.mxu1 %v9100_v2  ;;  %5316 = vmatmul.mubr.msk.bf16.gmra.mrb[184].mxu0 %vm10651_vm11, %v9125_v17 }
 0x2a6   : > { %v3052_v8 = vsel %vm10753_vm13, %v10752_v24, %v10751_v1  ;;  %v10757_v0 = vrot.slane %v9003_v31, 7  ;;  %v10758_v37 = vrot.slane %v8978_v6, 7  ;;  %vm10759_vm9 = vcmp.lt.s32.totalorder %v7172_v22, 1 }
 0x2a7   : > { %10749 = vst [vmem:[#allocation48_spill] sm:$0xff] %v9161_v46  ;;  %v3053_v42 = vsel %vm10756_vm8, %v10755_v11, %v10754_v63  ;;  %v2784_v39 = vadd.f32 %v8694_v19, %v2748_v58  ;;  %v2787_v44 = vadd.f32 %v8694_v19, %v2751_v60  ;;  %v2785_v49 = vadd.f32 %v8694_v19, %v2749_v55 }
 0x2a8   : > { %v2941_v21 = vsel %vm10759_vm9, %v10758_v37, %v10757_v0  ;;  %v9193_v1 = vpack.c.bf16 %v3052_v8, %v3053_v42  ;;  %v2916_v45 = vrot.slane %v9158_v50, 7  ;;  %v10761_v24 = vmov %v10758_v37  ;;  %v10764_v42 = vld [vmem:[#allocation37_spill] sm:$0xff] }
 0x2a9   : > { %v10762_v63 = vrot.slane %v8912_v40, 7  ;;  %v9208_v19 = vpack.c.bf16 %v8984_v23, %v8953_v13  ;;  %v9210_v60 = vmax.f32 %v2784_v39, 0.0  ;;  %v9212_v55 = vmax.f32 %v2787_v44, 0.0 }
 0x2aa   : > { %10760 = vst [vmem:[#allocation50_spill] sm:$0xff] %v9193_v1  ;;  %v9214_v8 = vmax.f32 %v2785_v49, 0.0  ;;  %vm10765_vm8 = vnez %v10764_v42  ;;  %v10766_v0 = vrot.slane %v8978_v6, 1  ;;  %v10767_v37 = vrot.slane %v8912_v40, 1 }
 0x2ab   : > { %v2942_v58 = vsel %vm10759_vm9, %v10762_v63, %v10761_v24  ;;  %10763 = vst [vmem:[#allocation56_spill] sm:$0xff] %v9212_v55  ;;  %5319 = vmatprep.mubr.msk.bf16.mxu0 %vm10765_vm8, %v9161_v46  ;;  %v10769_v49 = vrot.slane %v8878_v59, 1  ;;  %vm10770_vm9 = vmmov %vm10753_vm13  ;;  %v10772_v63 = vrot.slane %v8953_v13, 7  ;;  %vm10773_vm15 = vcmp.lt.s32.totalorder %v7172_v22, 1 }
 0x2ac   : > { %v9220_v11 = vpack.c.bf16 %v2941_v21, %v2942_v58  ;;  %v3050_v39 = vsel %vm10753_vm13, %v10767_v37, %v10766_v0  ;;  %v10768_v44 = vmov %v10767_v37  ;;  %v10771_v21 = vrot.slane %v8984_v23, 7  ;;  %vm10776_vm13 = vmmov %vm10773_vm15  ;;  %5253 = vmatmul.mubr.msk.bf16.gmra.mrb[160].mxu1 %vm10765_vm8, %v9161_v46 }
 0x2ad   : > { %v3051_v24 = vsel %vm10770_vm9, %v10769_v49, %v10768_v44  ;;  %v10774_v12 = vmov %v10772_v63  ;;  %v10775_v62 = vrot.slane %v9003_v31, 7  ;;  %v3024_v40 = vrot.slane %v9158_v50, 1  ;;  %3839 = vmatprep.mubr.bf16.mxu1 %v9168_v41  ;;  %5322 = vmatmul.mubr.msk.bf16.gmra.mrb[188].mxu0 %vm10652_vm0, %v9193_v1  ;;  %v10802_v41 = vld [vmem:[#allocation40_spill] sm:$0xff] }
 0x2ae   : > { %v2939_v58 = vsel %vm10773_vm15, %v10772_v63, %v10771_v21  ;;  %v2921_v59 = vrot.slane %v9170_v57, 7  ;;  %v3029_v37 = vrot.slane %v9170_v57, 1  ;;  %v2919_v44 = vrot.slane %v9210_v60, 7  ;;  %vm10779_vm15 = vmmov %vm10770_vm9 }
 0x2af   : > { %v2940_v0 = vsel %vm10776_vm13, %v10775_v62, %v10774_v12  ;;  %v3027_v49 = vrot.slane %v9210_v60, 1  ;;  %v9255_v21 = vpack.c.bf16 %v3050_v39, %v3051_v24  ;;  %v3030_v20 = vrot.slane %v9212_v55, 1 }
 0x2b0   : > { %v9257_v63 = vpack.c.bf16 %v2939_v58, %v2940_v0  ;;  %v9262_v62 = vpack.c.bf16 %v9077_v4, %v9030_v48  ;;  %v10777_v12 = vrot.slane %v8953_v13, 1  ;;  %v10778_v26 = vrot.slane %v9003_v31, 1 }
 0x2b1   : > { %v10781_v39 = vrot.slane %v8978_v6, 1  ;;  %v2920_v58 = vrot.slane %v9214_v8, 7  ;;  %v10782_v2 = vrot.slane %v9077_v4, 7  ;;  %v10785_v31 = vrot.slane %v8984_v23, 7 }
 0x2b2   : > { %v3048_v52 = vsel %vm10779_vm15, %v10778_v26, %v10777_v12  ;;  %v10780_v54 = vmov %v10778_v26  ;;  %v10784_v26 = vmov %v10783_v3  ;;  %vm10786_vm15 = vmmov %vm10776_vm13  ;;  %vm10805_vm8 = vcmp.lt.s32.totalorder %v7172_v22, 1  ;;  %v10860_v22 = vld [vmem:[#allocation31_spill] sm:$0xff] }
 0x2b3   : > { %v3049_v24 = vsel %vm10770_vm9, %v10781_v39, %v10780_v54  ;;  %v2937_v10 = vsel %vm10776_vm13, %v10783_v3, %v10782_v2  ;;  %v2938_v6 = vsel %vm10786_vm15, %v10785_v31, %v10784_v26  ;;  %v9295_v54 = vpack.c.bf16 %v9050_v16, %v9024_v7  ;;  %vm10791_vm13 = vmmov %vm10770_vm9 }
 0x2b4   : > { %v9277_v0 = vpack.c.bf16 %v3048_v52, %v3049_v24  ;;  %v9291_v12 = vpack.c.bf16 %v2937_v10, %v2938_v6  ;;  %v10787_v52 = vrot.slane %v9030_v48, 1  ;;  %v10788_v39 = vrot.slane %v8984_v23, 1 }
 0x2b5   : > { %v10790_v24 = vrot.slane %v8953_v13, 1  ;;  %v10792_v31 = vrot.slane %v9050_v16, 7  ;;  %v10793_v6 = vrot.slane %v9024_v7, 7  ;;  %v10795_v13 = vrot.slane %v9077_v4, 7 }
 0x2b6   : > { %v3046_v3 = vsel %vm10770_vm9, %v10788_v39, %v10787_v52  ;;  %v10789_v2 = vmov %v10788_v39  ;;  %vm10796_vm9 = vmmov %vm10786_vm15  ;;  %v10812_v46 = vrot.slane %v9024_v7, 1  ;;  %v10815_v56 = vrot.slane %v9108_v14, 7 }
 0x2b7   : > { %v3047_v26 = vsel %vm10791_vm13, %v10790_v24, %v10789_v2  ;;  %v2935_v52 = vsel %vm10786_vm15, %v10793_v6, %v10792_v31  ;;  %v10794_v23 = vmov %v10793_v6  ;;  %v9328_v2 = vpack.c.bf16 %v9158_v50, %v9110_v9  ;;  %vm10801_vm15 = vmmov %vm10791_vm13 }
 0x2b8   : > { %v9312_v10 = vpack.c.bf16 %v3046_v3, %v3047_v26  ;;  %v2936_v39 = vsel %vm10796_vm9, %v10795_v13, %v10794_v23  ;;  %v3028_v3 = vrot.slane %v9214_v8, 1  ;;  %v10797_v26 = vrot.slane %v9024_v7, 1 }
 0x2b9   : > { %v9335_v24 = vpack.c.bf16 %v2935_v52, %v2936_v39  ;;  %v10798_v31 = vrot.slane %v9077_v4, 1  ;;  %v10800_v23 = vrot.slane %v9030_v48, 1  ;;  %vm10803_vm9 = vnez %v10802_v41 }
 0x2ba   : > { %5325 = vmatprep.mubr.msk.bf16.mxu0 %vm10803_vm9, %v9220_v11  ;;  %v10804_v39 = vrot.slane %v9110_v9, 7  ;;  %v10807_v4 = vrot.slane %v9050_v16, 7  ;;  %v10816_v1 = vmov %v10815_v56  ;;  %v9396_v7 = vpack.c.bf16 %v9214_v8, %v9210_v60  ;;  %5256 = vmatmul.mubr.msk.bf16.gmra.mrb[164].mxu1 %vm10803_vm9, %v9220_v11 }
 0x2bb   : > { %v3044_v6 = vsel %vm10791_vm13, %v10798_v31, %v10797_v26  ;;  %v10799_v50 = vmov %v10798_v31  ;;  %vm10808_vm13 = vmmov %vm10805_vm8  ;;  %v9366_v31 = vpack.c.bf16 %v9119_v53, %v9108_v14  ;;  %3847 = vmatprep.mubr.bf16.mxu1 %v9208_v19  ;;  %5328 = vmatmul.mubr.msk.bf16.gmra.mrb[192].mxu0 %vm10617_vm3, %v9255_v21 }
 0x2bc   : > { %v3045_v13 = vsel %vm10801_vm15, %v10800_v23, %v10799_v50  ;;  %v2933_v42 = vsel %vm10805_vm8, %v10804_v39, %v2916_v45  ;;  %v10806_v26 = vmov %v10804_v39  ;;  %v10810_v23 = vrot.slane %v9050_v16, 1  ;;  %vm10813_vm8 = vmmov %vm10801_vm15 }
 0x2bd   : > { %v9352_v52 = vpack.c.bf16 %v3044_v6, %v3045_v13  ;;  %v2934_v48 = vsel %vm10808_vm13, %v10807_v4, %v10806_v26  ;;  %v10809_v6 = vrot.slane %v9110_v9, 1  ;;  %v10814_v4 = vrot.slane %v9119_v53, 7 }
 0x2be   : > { %v9368_v50 = vpack.c.bf16 %v2933_v42, %v2934_v48  ;;  %v10811_v39 = vmov %v10810_v23 }
 0x2bf   : > { %v3042_v13 = vsel %vm10801_vm15, %v10810_v23, %v10809_v6  ;;  %v3043_v26 = vsel %vm10813_vm8, %v10812_v46, %v10811_v39  ;;  %v2931_v42 = vsel %vm10808_vm13, %v10815_v56, %v10814_v4  ;;  %vm10817_vm15 = vmmov %vm10808_vm13  ;;  %v10818_v46 = vrot.slane %v9108_v14, 1 }
 0x2c0   : > { %v9388_v48 = vpack.c.bf16 %v3042_v13, %v3043_v26  ;;  %v2932_v6 = vsel %vm10817_vm15, %v2916_v45, %v10816_v1  ;;  %v10819_v56 = vrot.slane %v9110_v9, 1  ;;  %vm10820_vm13 = vmmov %vm10813_vm8  ;;  %v10822_v1 = vmov %v10814_v4 }
 0x2c1   : > { %v3040_v16 = vsel %vm10813_vm8, %v3024_v40, %v10818_v46  ;;  %v9402_v23 = vpack.c.bf16 %v2931_v42, %v2932_v6  ;;  %vm10821_vm0 = vmmov %vm10817_vm15  ;;  %v10824_v26 = vrot.slane %v9119_v53, 1 }
 0x2c2   : > { %v3041_v13 = vsel %vm10820_vm13, %v10819_v56, %v3024_v40  ;;  %v2929_v39 = vsel %vm10821_vm0, %v2919_v44, %v2920_v58  ;;  %vm10823_vm15 = vmmov %vm10821_vm0  ;;  %v10826_v40 = vmov %v10818_v46 }
 0x2c3   : > { %v2930_v45 = vsel %vm10823_vm15, %v10822_v1, %v2919_v44  ;;  %v9414_v60 = vpack.c.bf16 %v3040_v16, %v3041_v13  ;;  %v3038_v9 = vsel %vm10813_vm8, %v10824_v26, %v3027_v49  ;;  %v10825_v4 = vmov %v10824_v26  ;;  %vm10827_vm0 = vmmov %vm10813_vm8 }
 0x2c4   : > { %v9416_v8 = vpack.c.bf16 %v2929_v39, %v2930_v45  ;;  %v3039_v42 = vsel %vm10827_vm0, %v10826_v40, %v10825_v4  ;;  %v10828_v44 = vrot.slane %v9212_v55, 7  ;;  %vm10829_vm13 = vmmov %vm10823_vm15  ;;  %v3034_v13 = vsel %vm10827_vm0, %v3030_v20, %v10637_v33  ;;  %v6010_v33 = vpop.f32.mrb[128].mxu1  ;;  %v10838_v45 = vld [vmem:[#allocation45_spill] sm:$0xff] }
 0x2c5   : > { %v9428_v6 = vpack.c.bf16 %v3038_v9, %v3039_v42  ;;  %vm10830_vm15 = vmmov %vm10829_vm13  ;;  %v10841_v42 = vld [vmem:[#allocation49_spill] sm:$0xff] }
 0x2c6   : > { %v2927_v46 = vsel %vm10829_vm13, %v2921_v59, %v10828_v44  ;;  %v2928_v16 = vsel %vm10830_vm15, %v2920_v58, %v2921_v59  ;;  %vm10831_vm11 = vmmov %vm10827_vm0  ;;  %vm10839_vm15 = vnez %v10838_v45 }
 0x2c7   : > { %v3036_v56 = vsel %vm10831_vm11, %v3028_v3, %v3029_v37  ;;  %v9441_v53 = vpack.c.bf16 %v2927_v46, %v2928_v16  ;;  %vm10832_vm8 = vmmov %vm10827_vm0  ;;  %v10844_v46 = vld [vmem:[#allocation52_spill] sm:$0xff] }
 0x2c8   : > { %v3037_v14 = vsel %vm10832_vm8, %v3027_v49, %v3028_v3  ;;  %vm10833_vm13 = vmmov %vm10827_vm0  ;;  %v9460_v49 = vpack.c.bf16 %v9212_v55, %v9170_v57  ;;  %v10835_v3 = vld [vmem:[#allocation43_spill] sm:$0xff]  ;;  %vm10842_vm8 = vnez %v10841_v42  ;;  %vm10845_vm0 = vnez %v10844_v46 }
 0x2c9   : > { %v3035_v39 = vsel %vm10833_vm13, %v3029_v37, %v3030_v20  ;;  %v9454_v58 = vpack.c.bf16 %v3036_v56, %v3037_v14  ;;  %vm10836_vm11 = vnez %v10835_v3  ;;  %v6011_v37 = vpop.f32.mrb[129].mxu1  ;;  %v10847_v56 = vld [vmem:[#allocation55_spill] sm:$0xff]  ;;  %v10849_v14 = vld [vmem:[#allocation57_spill] sm:$0xff] }
 0x2ca   : > { %v9456_v1 = vpack.c.bf16 %v3034_v13, %v3035_v39  ;;  %5331 = vmatprep.mubr.msk.bf16.mxu0 %vm10836_vm11, %v9257_v63  ;;  %5259 = vmatmul.mubr.msk.bf16.gmra.mrb[168].mxu1 %vm10836_vm11, %v9257_v63  ;;  %v9475_v57 = vadd.f32 %v6011_v37, %v6010_v33  ;;  %v6013_v26 = vpop.f32.mrb[130].mxu1  ;;  %vm10848_vm13 = vnez %v10847_v56  ;;  %v10851_v13 = vld [vmem:[#allocation58_spill] sm:$0xff]  ;;  %v10853_v39 = vld [vmem:[#allocation60_spill] sm:$0xff]  ;;  %v10855_v33 = vld [vmem:[#allocation61_spill] sm:$0xff] }
 0x2cb   : > { %3855 = vmatprep.mubr.bf16.mxu1 %v9262_v62  ;;  %5334 = vmatmul.mubr.msk.bf16.gmra.mrb[196].mxu0 %vm10653_vm7, %v9277_v0  ;;  %v6014_v9 = vpop.f32.mrb[131].mxu1  ;;  %v6775_v37 = vld [vmem:[#allocation8 + $0x208] sm:$0xff]   ;;  %v10861_v55 = vld [vmem:[#allocation23_spill] sm:$0xff] }
 0x2cc   : > { %5337 = vmatprep.mubr.msk.bf16.mxu0 %vm10839_vm15, %v9291_v12  ;;  %v9477_v4 = vadd.f32 %v6014_v9, %v6013_v26  ;;  %v10857_v26 = vld [vmem:[#allocation32_spill] sm:$0xff]  ;;  %v10858_v9 = vld [vmem:[#allocation62_spill] sm:$0xff] }
 0x2d2   : > { %5262 = vmatmul.mubr.msk.bf16.gmra.mrb[172].mxu1 %vm10839_vm15, %v9291_v12  ;;  %vm10854_vm15 = vnez %v10853_v39 }
 0x2d3   : > { %3863 = vmatprep.mubr.bf16.mxu1 %v9295_v54  ;;  %5340 = vmatmul.mubr.msk.bf16.gmra.mrb[200].mxu0 %vm7966_vm6, %v9312_v10 }
 0x2d4   : > { %5343 = vmatprep.mubr.msk.bf16.mxu0 %vm10842_vm8, %v9335_v24 }
 0x2da   : > { %5265 = vmatmul.mubr.msk.bf16.gmra.mrb[176].mxu1 %vm10842_vm8, %v9335_v24  ;;  %vm10850_vm8 = vnez %v10849_v14 }
 0x2db   : > { %3871 = vmatprep.mubr.bf16.mxu1 %v9328_v2  ;;  %5346 = vmatmul.mubr.msk.bf16.gmra.mrb[204].mxu0 %vm10627_vm14, %v9352_v52 }
 0x2dc   : > { %5349 = vmatprep.mubr.msk.bf16.mxu0 %vm10845_vm0, %v9368_v50 }
 0x2e2   : > { %5268 = vmatmul.mubr.msk.bf16.gmra.mrb[180].mxu1 %vm10845_vm0, %v9368_v50  ;;  %vm10852_vm0 = vnez %v10851_v13  ;;  %v10895_v13 = vmov 0.0|0.0  }
 0x2e3   : > { %3879 = vmatprep.mubr.bf16.mxu1 %v9366_v31  ;;  %5352 = vmatmul.mubr.msk.bf16.gmra.mrb[208].mxu0 %vm8107_vm4, %v9388_v48 }
 0x2e4   : > { %5355 = vmatprep.mubr.msk.bf16.mxu0 %vm10848_vm13, %v9402_v23 }
 0x2ea   : > { %5271 = vmatmul.mubr.msk.bf16.gmra.mrb[184].mxu1 %vm10848_vm13, %v9402_v23  ;;  %vm10856_vm13 = vnez %v10855_v33 }
 0x2eb   : > { %3887 = vmatprep.mubr.bf16.mxu1 %v9396_v7  ;;  %5358 = vmatmul.mubr.msk.bf16.gmra.mrb[212].mxu0 %vm10850_vm8, %v9414_v60  ;;  %vm10859_vm8 = vnez %v10858_v9  ;;  %v10906_v9 = vld [vmem:[#allocation22_spill] sm:$0xff] }
 0x2ec   : > { %5361 = vmatprep.mubr.msk.bf16.mxu0 %vm10852_vm0, %v9416_v8 }
 0x2f2   : > { %5274 = vmatmul.mubr.msk.bf16.gmra.mrb[188].mxu1 %vm10852_vm0, %v9416_v8 }
 0x2f3   : > { %5364 = vmatmul.mubr.msk.bf16.gmra.mrb[216].mxu0 %vm10854_vm15, %v9428_v6  ;;  %5373 = vmatprep.mubr.msk.bf16.mxu1 %vm10682_vm10, %v8825_v34  ;;  %v6777_v34 = vld [vmem:[#allocation8 + $0x218] sm:$0xff]  }
 0x2f4   : > { %5367 = vmatprep.mubr.msk.bf16.mxu0 %vm10856_vm13, %v9441_v53 }
 0x2fa   : > { %4090 = vmatmul.mubr.bf16.vlgmr.msra.gmra.mrb[192].mxu1 %v10857_v26  ;;  %v6781_v26 = vld [vmem:[#allocation8 + $0x238] sm:$0xff]  }
 0x2fb   : > { %5370 = vmatmul.mubr.msk.bf16.gmra.mrb[220].mxu0 %vm10859_vm8, %v9454_v58  ;;  %5376 = vmatprep.mubr.msk.bf16.mxu1 %vm7336_vm1, %v8876_v5 }
 0x2fc   : > { %6515 = vmatpush3.bf16.msra.mxu1 %v10860_v22  ;;  %4250 = vmatprep.mubr.bf16.mxu0 %v10861_v55  ;;  %v6778_v22 = vld [vmem:[#allocation8 + $0x220] sm:$0xff]  }
 0x2fd   : > { %6516 = vmatprep.subr.bf16.mxu1 %v6775_v37 }
 0x300   : > { %6517 = vmatpush3.bf16.msra.mxu1 %v6775_v37  ;;  %v6779_v37 = vld [vmem:[#allocation8 + $0x228] sm:$0xff]  }
 0x301   : > { %6518 = vmatprep.subr.bf16.mxu1 %v6776_v35 }
 0x302   : > { %4098 = vmatmul.mubr.bf16.gmra.mrb[196].mxu1 %v10861_v55  ;;  %v10862_v55 = vld [vmem:[#allocation20_spill] sm:$0xff] }
 0x303   : > { %5379 = vmatprep.mubr.msk.bf16.mxu1 %vm7392_vm12, %v8945_v29  ;;  %5421 = vmatmul.mubr.msk.bf16.vlgmr.msra.gmra.mrb[224].mxu0 %vm10673_vm2, %v8790_v32  ;;  %vm10863_vm10 = vnez %v10862_v55  ;;  %v6780_v32 = vld [vmem:[#allocation8 + $0x230] sm:$0xff]   ;;  %vm10865_vm2 = vnez %v10601_v51  ;;  %v10880_v55 = vld [vmem:[#allocation42_spill] sm:$0xff] }
 0x304   : > { %4258 = vmatprep.mubr.bf16.mxu0 %v8797_v36  ;;  %6519 = vmatpush3.bf16.msra.mxu1 %v6776_v35  ;;  %v10870_v35 = vld [vmem:[#allocation24_spill] sm:$0xff] }
 0x305   : > { %6520 = vmatprep.subr.bf16.mxu1 %v6777_v34  ;;  %vm10871_vm12 = vnez %v10870_v35  ;;  %v10887_v35 = vld [vmem:[#allocation53_spill] sm:$0xff] }
 0x308   : > { %6521 = vmatpush3.bf16.msra.mxu1 %v6777_v34  ;;  %v10872_v34 = vld [vmem:[#allocation29_spill] sm:$0xff] }
 0x309   : > { %6522 = vmatprep.subr.bf16.mxu1 %v6778_v22 }
 0x30a   : > { %4106 = vmatmul.mubr.bf16.gmra.mrb[200].mxu1 %v8797_v36  ;;  %v10867_v36 = vld [vmem:[#allocation36_spill] sm:$0xff] }
 0x30b   : > { %5382 = vmatprep.mubr.msk.bf16.mxu1 %vm10595_vm5, %v8992_v28  ;;  %5424 = vmatmul.mubr.msk.bf16.gmra.mrb[228].mxu0 %vm10863_vm10, %v8832_v43  ;;  %vm10866_vm5 = vnez %v10696_v15  ;;  %vm10868_vm10 = vnez %v10867_v36  ;;  %v10869_v43 = vld [vmem:[#allocation35_spill] sm:$0xff] }
 0x30c   : > { %4266 = vmatprep.mubr.bf16.mxu0 %v10864_v18  ;;  %6523 = vmatpush3.bf16.msra.mxu1 %v6778_v22  ;;  %v10874_v15 = vld [vmem:[#allocation39_spill] sm:$0xff]  ;;  %v10876_v22 = vld [vmem:[#allocation34_spill] sm:$0xff] }
 0x30d   : > { %6524 = vmatprep.subr.bf16.mxu1 %v6779_v37 }
 0x310   : > { %6525 = vmatpush3.bf16.msra.mxu1 %v6779_v37  ;;  %v10877_v37 = vld [vmem:[#allocation28_spill] sm:$0xff] }
 0x311   : > { %6526 = vmatprep.subr.bf16.mxu1 %v6780_v32 }
 0x312   : > { %4114 = vmatmul.mubr.bf16.gmra.mrb[204].mxu1 %v10864_v18  ;;  %v10881_v18 = vld [vmem:[#allocation33_spill] sm:$0xff] }
 0x313   : > { %5385 = vmatprep.mubr.msk.bf16.mxu1 %vm10865_vm2, %v9074_v30  ;;  %5427 = vmatmul.mubr.msk.bf16.gmra.mrb[232].mxu0 %vm10866_vm5, %v8897_v27  ;;  %v10873_v27 = vld [vmem:[#allocation50_spill] sm:$0xff]  ;;  %vm10875_vm5 = vnez %v10874_v15  ;;  %vm10878_vm2 = vnez %v10877_v37 }
 0x314   : > { %4274 = vmatprep.mubr.bf16.mxu0 %v8892_v47  ;;  %6527 = vmatpush3.bf16.msra.mxu1 %v6780_v32  ;;  %v10883_v32 = vld [vmem:[#allocation46_spill] sm:$0xff] }
 0x315   : > { %6528 = vmatprep.subr.bf16.mxu1 %v6781_v26 }
 0x318   : > { %6529 = vmatpush3.bf16.msra.mxu1 %v6781_v26  ;;  %v10884_v26 = vld [vmem:[#allocation48_spill] sm:$0xff] }
 0x31a   : > { %4122 = vmatmul.mubr.bf16.gmra.mrb[208].mxu1 %v8892_v47  ;;  %v10879_v47 = vld [vmem:[#allocation38_spill] sm:$0xff] }
 0x31b   : > { %5388 = vmatprep.mubr.msk.bf16.mxu1 %vm10868_vm10, %v9125_v17  ;;  %5430 = vmatmul.mubr.msk.bf16.gmra.mrb[236].mxu0 %vm10871_vm12, %v10869_v43  ;;  %vm10882_vm12 = vnez %v10881_v18  ;;  %v10885_v43 = vld [vmem:[#allocation37_spill] sm:$0xff] }
 0x31c   : > { %4282 = vmatprep.mubr.bf16.mxu0 %v10872_v34 }
 0x322   : > { %4130 = vmatmul.mubr.bf16.gmra.mrb[212].mxu1 %v10872_v34 }
 0x323   : > { %5391 = vmatprep.mubr.msk.bf16.mxu1 %vm10875_vm5, %v10873_v27  ;;  %5433 = vmatmul.mubr.msk.bf16.gmra.mrb[240].mxu0 %vm10878_vm2, %v10876_v22  ;;  %vm10886_vm2 = vnez %v10885_v43 }
 0x324   : > { %4290 = vmatprep.mubr.bf16.mxu0 %v10879_v47 }
 0x32a   : > { %4138 = vmatmul.mubr.bf16.gmra.mrb[216].mxu1 %v10879_v47 }
 0x32b   : > { %5394 = vmatprep.mubr.msk.bf16.mxu1 %vm10617_vm3, %v9255_v21  ;;  %5436 = vmatmul.mubr.msk.bf16.gmra.mrb[244].mxu0 %vm10882_vm12, %v10880_v55  ;;  %vm10889_vm12 = vnez %v10849_v14 }
 0x32c   : > { %4298 = vmatprep.mubr.bf16.mxu0 %v10883_v32 }
 0x332   : > { %4146 = vmatmul.mubr.bf16.gmra.mrb[220].mxu1 %v10883_v32 }
 0x333   : > { %5397 = vmatprep.mubr.msk.bf16.mxu1 %vm10653_vm7, %v9277_v0  ;;  %5439 = vmatmul.mubr.msk.bf16.gmra.mrb[248].mxu0 %vm10886_vm2, %v10884_v26  ;;  %vm10891_vm2 = vnez %v10844_v46 }
 0x334   : > { %4306 = vmatprep.mubr.bf16.mxu0 %v10887_v35 }
 0x33a   : > { %4154 = vmatmul.mubr.bf16.gmra.mrb[224].mxu1 %v10887_v35 }
 0x33b   : > { %5400 = vmatprep.mubr.msk.bf16.mxu1 %vm7966_vm6, %v9312_v10  ;;  %5442 = vmatmul.mubr.msk.bf16.gmra.mrb[252].mxu0 %vm10803_vm9, %v9220_v11  ;;  %vm10888_vm9 = vnez %v10838_v45 }
 0x33c   : > { %4314 = vmatprep.mubr.bf16.mxu0 %v9208_v19 }
 0x342   : > { %4162 = vmatmul.mubr.bf16.gmra.mrb[228].mxu1 %v9208_v19 }
 0x343   : > { %5403 = vmatprep.mubr.msk.bf16.mxu1 %vm10627_vm14, %v9352_v52  ;;  %5445 = vmatmul.mubr.msk.bf16.gmra.mrb[0].mxu0 %vm10836_vm11, %v9257_v63  ;;  %vm10890_vm11 = vnez %v10841_v42 }
 0x344   : > { %4322 = vmatprep.mubr.bf16.mxu0 %v9262_v62 }
 0x347   : > { %v6016_v41 = vpop.f32.mrb[132].mxu1 }
 0x348   : > { %v6017_v19 = vpop.f32.mrb[133].mxu1  ;;  %v6122_v11 = vpop.f32.mrb[160].mxu0 }
 0x349   : > { %v6018_v63 = vadd.f32 %v6017_v19, %v6016_v41 }
 0x34a   : > { %4170 = vmatmul.mubr.bf16.gmra.mrb[232].mxu1 %v9262_v62  ;;  %v6019_v62 = vpop.f32.mrb[134].mxu1 }
 0x34b   : > { %5406 = vmatprep.mubr.msk.bf16.mxu1 %vm8107_vm4, %v9388_v48  ;;  %5448 = vmatmul.mubr.msk.bf16.gmra.mrb[4].mxu0 %vm10888_vm9, %v9291_v12  ;;  %v6123_v12 = vpop.f32.mrb[161].mxu0  ;;  %v6020_v45 = vpop.f32.mrb[135].mxu1  ;;  %vm10892_vm9 = vnez %v10847_v56 }
 0x34c   : > { %4330 = vmatprep.mubr.bf16.mxu0 %v9295_v54  ;;  %v6124_v3 = vadd.f32 %v6123_v12, %v6122_v11  ;;  %v6125_v34 = vpop.f32.mrb[162].mxu0 }
 0x34d   : > { %v6126_v22 = vpop.f32.mrb[163].mxu0 }
 0x34e   : > { %v9629_v37 = vadd.f32 %v6124_v3, %v9475_v57  ;;  %v6127_v47 = vadd.f32 %v6126_v22, %v6125_v34 }
 0x34f   : > { %v6022_v42 = vpop.f32.mrb[136].mxu1 }
 0x350   : > { %v6023_v55 = vpop.f32.mrb[137].mxu1  ;;  %v6128_v57 = vpop.f32.mrb[164].mxu0 }
 0x351   : > { %v6024_v18 = vadd.f32 %v6023_v55, %v6022_v42  ;;  %v6025_v32 = vpop.f32.mrb[138].mxu1  ;;  %v6129_v26 = vpop.f32.mrb[165].mxu0 }
 0x352   : > { %4178 = vmatmul.mubr.bf16.gmra.mrb[236].mxu1 %v9295_v54  ;;  %v6021_v54 = vadd.f32 %v6020_v45, %v6019_v62  ;;  %v6026_v43 = vpop.f32.mrb[139].mxu1  ;;  %v6131_v35 = vpop.f32.mrb[166].mxu0 }
 0x353   : > { %5409 = vmatprep.mubr.msk.bf16.mxu1 %vm10889_vm12, %v9414_v60  ;;  %5451 = vmatmul.mubr.msk.bf16.gmra.mrb[8].mxu0 %vm10890_vm11, %v9335_v24  ;;  %v9639_v24 = vadd.f32 %v6127_v47, %v9477_v4  ;;  %v6027_v41 = vadd.f32 %v6026_v43, %v6025_v32  ;;  %v6132_v19 = vpop.f32.mrb[167].mxu0 }
 0x354   : > { %4338 = vmatprep.mubr.bf16.mxu0 %v9328_v2  ;;  %v6133_v46 = vadd.f32 %v6132_v19, %v6131_v35 }
 0x357   : > { %v6028_v4 = vpop.f32.mrb[140].mxu1 }
 0x358   : > { %v6029_v62 = vpop.f32.mrb[141].mxu1  ;;  %v6134_v12 = vpop.f32.mrb[168].mxu0 }
 0x359   : > { %v6031_v3 = vpop.f32.mrb[142].mxu1  ;;  %v6135_v45 = vpop.f32.mrb[169].mxu0 }
 0x35a   : > { %4186 = vmatmul.mubr.bf16.gmra.mrb[240].mxu1 %v9328_v2  ;;  %v6130_v2 = vadd.f32 %v6129_v26, %v6128_v57  ;;  %v6136_v34 = vadd.f32 %v6135_v45, %v6134_v12  ;;  %v6137_v22 = vpop.f32.mrb[170].mxu0  ;;  %v10897_v45 = vld [vmem:[#allocation56_spill] sm:$0xff] }
 0x35b   : > { %5412 = vmatprep.mubr.msk.bf16.mxu1 %vm10854_vm15, %v9428_v6  ;;  %5454 = vmatmul.mubr.msk.bf16.gmra.mrb[12].mxu0 %vm10891_vm2, %v9368_v50  ;;  %v9651_v50 = vadd.f32 %v6133_v46, %v6021_v54  ;;  %v6138_v42 = vpop.f32.mrb[171].mxu0  ;;  %vm10904_vm2 = vnez %v10594_v25 }
 0x35c   : > { %4346 = vmatprep.mubr.bf16.mxu0 %v9366_v31  ;;  %v9642_v11 = vadd.f32 %v6130_v2, %v6018_v63  ;;  %v6030_v63 = vadd.f32 %v6029_v62, %v6028_v4  ;;  %v9654_v55 = vadd.f32 %v6136_v34, %v6024_v18  ;;  %v6139_v57 = vadd.f32 %v6138_v42, %v6137_v22  ;;  %v10899_v34 = vld [vmem:[#allocation13_spill] sm:$0xff] }
 0x35e   : > { %v9663_v56 = vadd.f32 %v6139_v57, %v6027_v41 }
 0x360   : > { %v6140_v26 = vpop.f32.mrb[172].mxu0 }
 0x361   : > { %v6141_v43 = vpop.f32.mrb[173].mxu0 }
 0x362   : > { %4194 = vmatmul.mubr.bf16.gmra.mrb[244].mxu1 %v9366_v31  ;;  %v6032_v31 = vpop.f32.mrb[143].mxu1  ;;  %v6142_v35 = vadd.f32 %v6141_v43, %v6140_v26  ;;  %v6143_v19 = vpop.f32.mrb[174].mxu0  ;;  %v10902_v43 = vld [vmem:[#allocation26_spill] sm:$0xff] }
 0x363   : > { %5415 = vmatprep.mubr.msk.bf16.mxu1 %vm10859_vm8, %v9454_v58  ;;  %5457 = vmatmul.mubr.msk.bf16.gmra.mrb[16].mxu0 %vm10892_vm9, %v9402_v23  ;;  %v6033_v47 = vadd.f32 %v6032_v31, %v6031_v3  ;;  %v10893_v23 = vld [vmem:[#allocation27_spill] sm:$0xff]  ;;  %v6034_v54 = vpop.f32.mrb[144].mxu1  ;;  %v6144_v4 = vpop.f32.mrb[175].mxu0  ;;  %v10896_v3 = vld [vmem:[#allocation14_spill] sm:$0xff]  ;;  %vm10905_vm9 = vnez %v10601_v51 }
 0x364   : > { %4354 = vmatprep.mubr.bf16.mxu0 %v9396_v7  ;;  %vm10894_vm11 = vnez %v10893_v23  ;;  %v6035_v32 = vpop.f32.mrb[145].mxu1  ;;  %v9666_v62 = vadd.f32 %v6142_v35, %v6030_v63  ;;  %v6145_v12 = vadd.f32 %v6144_v4, %v6143_v19  ;;  %v10898_v63 = vrot.slane %v10897_v45, 7 }
 0x365   : > { %v6036_v18 = vadd.f32 %v6035_v32, %v6034_v54  ;;  %v6037_v2 = vpop.f32.mrb[146].mxu1 }
 0x368   : > { %v6146_v22 = vpop.f32.mrb[176].mxu0 }
 0x36a   : > { %4202 = vmatmul.mubr.bf16.gmra.mrb[248].mxu1 %v9396_v7  ;;  %v6038_v7 = vpop.f32.mrb[147].mxu1 }
 0x36b   : > { %5418 = vmatprep.mubr.msk.bf16.mxu1 %vm10894_vm11, %v9456_v1  ;;  %5460 = vmatmul.mubr.msk.bf16.gmra.mrb[20].mxu0 %vm10852_vm0, %v9416_v8  ;;  %v6039_v46 = vadd.f32 %v6038_v7, %v6037_v2  ;;  %v9675_v8 = vadd.f32 %v6145_v12, %v6033_v47  ;;  %v6040_v41 = vpop.f32.mrb[148].mxu1  ;;  %vm10900_vm0 = vcmp.lt.s32.totalorder %v10899_v34, 1 }
 0x36c   : > { %4362 = vmatprep.mubr.bf16.mxu0 %v9460_v49  ;;  %v2926_v31 = vsel %vm10900_vm0, %v10898_v63, %v10896_v3 }
 0x372   : > { %4210 = vmatmul.mubr.bf16.gmra.mrb[252].mxu1 %v9460_v49  ;;  %v6041_v49 = vpop.f32.mrb[149].mxu1 }
 0x373   : > { %5463 = vmatmul.mubr.msk.bf16.gmra.mrb[24].mxu0 %vm10856_vm13, %v9441_v53  ;;  %6530 = vmatprep.mubr.msk.bf16.mxu1 %vm7336_vm1, %v8876_v5  ;;  %v6042_v42 = vadd.f32 %v6041_v49, %v6040_v41  ;;  %v6043_v33 = vpop.f32.mrb[150].mxu1  ;;  %v6147_v53 = vpop.f32.mrb[177].mxu0  ;;  %v5465_v5 = vpack.c.bf16 %v10896_v3, %v2926_v31  ;;  %vm10901_vm1 = vnez %v10338_v38  ;;  %vm10903_vm13 = vnez %v10902_v43 }
 0x374   : > { %4370 = vmatprep.mubr.bf16.mxu0 %v10895_v13  ;;  %v6148_v57 = vadd.f32 %v6147_v53, %v6146_v22  ;;  %v6044_v54 = vpop.f32.mrb[151].mxu1  ;;  %v6149_v61 = vpop.f32.mrb[178].mxu0 }
 0x375   : > { %v6045_v47 = vadd.f32 %v6044_v54, %v6043_v33  ;;  %v6150_v32 = vpop.f32.mrb[179].mxu0  ;;  %v6046_v7 = vpop.f32.mrb[152].mxu1 }
 0x376   : > { %v9684_v26 = vadd.f32 %v6148_v57, %v6036_v18  ;;  %v6151_v2 = vadd.f32 %v6150_v32, %v6149_v61  ;;  %v6047_v19 = vpop.f32.mrb[153].mxu1  ;;  %v6152_v4 = vpop.f32.mrb[180].mxu0 }
 0x377   : > { %v6048_v12 = vadd.f32 %v6047_v19, %v6046_v7  ;;  %v6049_v18 = vpop.f32.mrb[154].mxu1  ;;  %v6153_v13 = vpop.f32.mrb[181].mxu0 }
 0x378   : > { %v9694_v35 = vadd.f32 %v6151_v2, %v6039_v46  ;;  %v6154_v41 = vadd.f32 %v6153_v13, %v6152_v4  ;;  %v6050_v3 = vpop.f32.mrb[155].mxu1  ;;  %v6155_v45 = vpop.f32.mrb[182].mxu0 }
 0x379   : > { %v6051_v38 = vadd.f32 %v6050_v3, %v6049_v18 }
 0x37a   : > { %6531 = vmatmul.mubr.msk.bf16.vlgmr.msra.gmra.mrb[0].mxu1 %vm10901_vm1, %v8945_v29  ;;  %v6156_v29 = vpop.f32.mrb[183].mxu0  ;;  %v9696_v63 = vadd.f32 %v6154_v41, %v6042_v42 }
 0x37b   : > { %5466 = vmatmul.mubr.msk.bf16.gmra.mrb[28].mxu0 %vm10903_vm13, %v5465_v5  ;;  %6534 = vmatprep.mubr.msk.bf16.mxu1 %vm10904_vm2, %v8992_v28  ;;  %v6157_v31 = vadd.f32 %v6156_v29, %v6155_v45  ;;  %v6052_v28 = vpop.f32.mrb[156].mxu1  ;;  %v6158_v49 = vpop.f32.mrb[184].mxu0 }
 0x37c   : > { %v6053_v46 = vpop.f32.mrb[157].mxu1  ;;  %v6159_v53 = vpop.f32.mrb[185].mxu0 }
 0x37d   : > { %v9704_v25 = vadd.f32 %v6157_v31, %v6045_v47  ;;  %v6054_v22 = vadd.f32 %v6053_v46, %v6052_v28  ;;  %v6055_v33 = vpop.f32.mrb[158].mxu1  ;;  %v6160_v57 = vadd.f32 %v6159_v53, %v6158_v49  ;;  %v6161_v54 = vpop.f32.mrb[186].mxu0 }
 0x37e   : > { %v6056_v42 = vpop.f32.mrb[159].mxu1  ;;  %v6162_v5 = vpop.f32.mrb[187].mxu0 }
 0x37f   : > { %v6057_v61 = vadd.f32 %v6056_v42, %v6055_v33  ;;  %v9706_v32 = vadd.f32 %v6160_v57, %v6048_v12  ;;  %v6163_v51 = vadd.f32 %v6162_v5, %v6161_v54 }
 0x380   : > { %v6164_v47 = vpop.f32.mrb[188].mxu0 }
 0x381   : > { %v6165_v7 = vpop.f32.mrb[189].mxu0 }
 0x382   : > { %6535 = vmatmul.mubr.msk.bf16.gmra.mrb[4].mxu1 %vm10905_vm9, %v9074_v30  ;;  %v9714_v30 = vadd.f32 %v6163_v51, %v6051_v38  ;;  %v6166_v19 = vadd.f32 %v6165_v7, %v6164_v47  ;;  %v6167_v12 = vpop.f32.mrb[190].mxu0 }
 0x383   : > { %6538 = vmatprep.mubr.msk.bf16.mxu1 %vm10868_vm10, %v9125_v17  ;;  %v6058_v17 = vpop.f32.mrb[160].mxu1  ;;  %v6168_v13 = vpop.f32.mrb[191].mxu0 }
 0x384   : > { %v6059_v36 = vpop.f32.mrb[161].mxu1  ;;  %v9716_v41 = vadd.f32 %v6166_v19, %v6054_v22 }
 0x385   : > { %v6060_v2 = vadd.f32 %v6059_v36, %v6058_v17  ;;  %v6061_v43 = vpop.f32.mrb[162].mxu1 }
 0x386   : > { %v6062_v4 = vpop.f32.mrb[163].mxu1 }
 0x387   : > { %v6063_v18 = vadd.f32 %v6062_v4, %v6061_v43 }
 0x38a   : > { %6539 = vmatmul.mubr.msk.bf16.gmra.mrb[8].mxu1 %vm10875_vm5, %v10873_v27  ;;  %v6169_v27 = vadd.f32 %v6168_v13, %v6167_v12 }
 0x38b   : > { %6542 = vmatprep.mubr.msk.bf16.mxu1 %vm10617_vm3, %v9255_v21 }
 0x38c   : > { %v9724_v21 = vadd.f32 %v6169_v27, %v6057_v61 }
 0x38d   : > { %v6064_v59 = vpop.f32.mrb[164].mxu1 }
 0x38e   : > { %v6065_v15 = vpop.f32.mrb[165].mxu1  ;;  %v6170_v3 = vpop.f32.mrb[192].mxu0 }
 0x38f   : > { %v6066_v45 = vadd.f32 %v6065_v15, %v6064_v59  ;;  %v6067_v38 = vpop.f32.mrb[166].mxu1  ;;  %v6171_v29 = vpop.f32.mrb[193].mxu0 }
 0x390   : > { %v6172_v31 = vadd.f32 %v6171_v29, %v6170_v3  ;;  %v6068_v28 = vpop.f32.mrb[167].mxu1  ;;  %v6173_v46 = vpop.f32.mrb[194].mxu0 }
 0x391   : > { %v6069_v49 = vadd.f32 %v6068_v28, %v6067_v38  ;;  %v6174_v22 = vpop.f32.mrb[195].mxu0 }
 0x392   : > { %6543 = vmatmul.mubr.msk.bf16.gmra.mrb[12].mxu1 %vm10653_vm7, %v9277_v0  ;;  %v9726_v33 = vadd.f32 %v6172_v31, %v6060_v2  ;;  %v6175_v0 = vadd.f32 %v6174_v22, %v6173_v46 }
 0x393   : > { %6546 = vmatprep.mubr.msk.bf16.mxu1 %vm7966_vm6, %v9312_v10 }
 0x394   : > { %v9734_v10 = vadd.f32 %v6175_v0, %v6063_v18  ;;  %v10907_v0 = vld [vmem:[#allocation25_spill] sm:$0xff] }
 0x39a   : > { %6547 = vmatmul.mubr.msk.bf16.gmra.mrb[16].mxu1 %vm10627_vm14, %v9352_v52  ;;  %vm10908_vm14 = vnez %v10907_v0 }
 0x39b   : > { %6550 = vmatprep.mubr.msk.bf16.mxu1 %vm8107_vm4, %v9388_v48 }
 0x39d   : > { %v6070_v20 = vpop.f32.mrb[168].mxu1 }
 0x39e   : > { %v6071_v40 = vpop.f32.mrb[169].mxu1  ;;  %v6176_v53 = vpop.f32.mrb[196].mxu0 }
 0x39f   : > { %v6072_v57 = vadd.f32 %v6071_v40, %v6070_v20  ;;  %v6073_v42 = vpop.f32.mrb[170].mxu1  ;;  %v6177_v54 = vpop.f32.mrb[197].mxu0 }
 0x3a0   : > { %v6178_v61 = vadd.f32 %v6177_v54, %v6176_v53  ;;  %v6074_v5 = vpop.f32.mrb[171].mxu1  ;;  %v6179_v51 = vpop.f32.mrb[198].mxu0 }
 0x3a1   : > { %v6075_v17 = vadd.f32 %v6074_v5, %v6073_v42  ;;  %v6180_v36 = vpop.f32.mrb[199].mxu0 }
 0x3a2   : > { %v9736_v47 = vadd.f32 %v6178_v61, %v6066_v45  ;;  %v6181_v52 = vadd.f32 %v6180_v36, %v6179_v51  ;;  %6551 = vmatmul.mubr.msk.bf16.gmra.mrb[20].mxu1 %vm10889_vm12, %v9414_v60 }
 0x3a3   : > { %6554 = vmatprep.mubr.msk.bf16.mxu1 %vm10854_vm15, %v9428_v6 }
 0x3a4   : > { %v9744_v48 = vadd.f32 %v6181_v52, %v6069_v49 }
 0x3a5   : > { %v6076_v44 = vpop.f32.mrb[172].mxu1 }
 0x3a6   : > { %v6077_v16 = vpop.f32.mrb[173].mxu1  ;;  %v6182_v2 = vpop.f32.mrb[200].mxu0 }
 0x3a7   : > { %v6078_v43 = vadd.f32 %v6077_v16, %v6076_v44  ;;  %v6079_v7 = vpop.f32.mrb[174].mxu1  ;;  %v6183_v19 = vpop.f32.mrb[201].mxu0 }
 0x3a8   : > { %v6184_v4 = vadd.f32 %v6183_v19, %v6182_v2  ;;  %v6080_v12 = vpop.f32.mrb[175].mxu1  ;;  %v6185_v18 = vpop.f32.mrb[202].mxu0 }
 0x3a9   : > { %v6081_v13 = vadd.f32 %v6080_v12, %v6079_v7  ;;  %v6186_v27 = vpop.f32.mrb[203].mxu0 }
 0x3aa   : > { %v9746_v59 = vadd.f32 %v6184_v4, %v6072_v57  ;;  %v6187_v60 = vadd.f32 %v6186_v27, %v6185_v18  ;;  %6555 = vmatmul.mubr.msk.bf16.gmra.mrb[24].mxu1 %vm10859_vm8, %v9454_v58 }
 0x3ab   : > { %6558 = vmatprep.mubr.msk.bf16.mxu1 %vm10894_vm11, %v9456_v1 }
 0x3ac   : > { %v9754_v6 = vadd.f32 %v6187_v60, %v6075_v17 }
 0x3ad   : > { %v6082_v14 = vpop.f32.mrb[176].mxu1 }
 0x3ae   : > { %v6083_v39 = vpop.f32.mrb[177].mxu1  ;;  %v6188_v15 = vpop.f32.mrb[204].mxu0 }
 0x3af   : > { %v6084_v3 = vadd.f32 %v6083_v39, %v6082_v14  ;;  %v6085_v45 = vpop.f32.mrb[178].mxu1  ;;  %v6189_v38 = vpop.f32.mrb[205].mxu0 }
 0x3b0   : > { %v6190_v29 = vadd.f32 %v6189_v38, %v6188_v15  ;;  %v6086_v31 = vpop.f32.mrb[179].mxu1  ;;  %v6191_v28 = vpop.f32.mrb[206].mxu0 }
 0x3b1   : > { %v6087_v46 = vadd.f32 %v6086_v31, %v6085_v45  ;;  %v6192_v49 = vpop.f32.mrb[207].mxu0 }
 0x3b2   : > { %v9756_v22 = vadd.f32 %v6190_v29, %v6078_v43  ;;  %v6193_v58 = vadd.f32 %v6192_v49, %v6191_v28  ;;  %6559 = vmatmul.mubr.msk.bf16.gmra.mrb[28].mxu1 %vm10908_vm14, %v10906_v9 }
 0x3b4   : > { %v9761_v1 = vadd.f32 %v6193_v58, %v6081_v13 }
 0x3b5   : > { %v6088_v23 = vpop.f32.mrb[180].mxu1 }
 0x3b6   : > { %v6089_v20 = vpop.f32.mrb[181].mxu1  ;;  %v6194_v40 = vpop.f32.mrb[208].mxu0 }
 0x3b7   : > { %v6090_v53 = vadd.f32 %v6089_v20, %v6088_v23  ;;  %v6091_v57 = vpop.f32.mrb[182].mxu1  ;;  %v6195_v42 = vpop.f32.mrb[209].mxu0 }
 0x3b8   : > { %v6196_v54 = vadd.f32 %v6195_v42, %v6194_v40  ;;  %v6092_v61 = vpop.f32.mrb[183].mxu1  ;;  %v6197_v5 = vpop.f32.mrb[210].mxu0 }
 0x3b9   : > { %v6093_v51 = vadd.f32 %v6092_v61, %v6091_v57  ;;  %v6198_v17 = vpop.f32.mrb[211].mxu0 }
 0x3ba   : > { %v9763_v36 = vadd.f32 %v6196_v54, %v6084_v3  ;;  %v6199_v52 = vadd.f32 %v6198_v17, %v6197_v5 }
 0x3bc   : > { %v9765_v44 = vadd.f32 %v6199_v52, %v6087_v46 }
 0x3bd   : > { %v6094_v16 = vpop.f32.mrb[184].mxu1 }
 0x3be   : > { %v6095_v2 = vpop.f32.mrb[185].mxu1  ;;  %v6200_v43 = vpop.f32.mrb[212].mxu0 }
 0x3bf   : > { %v6096_v7 = vadd.f32 %v6095_v2, %v6094_v16  ;;  %v6097_v19 = vpop.f32.mrb[186].mxu1  ;;  %v6201_v4 = vpop.f32.mrb[213].mxu0 }
 0x3c0   : > { %v6202_v12 = vadd.f32 %v6201_v4, %v6200_v43  ;;  %v6098_v18 = vpop.f32.mrb[187].mxu1  ;;  %v6203_v13 = vpop.f32.mrb[214].mxu0 }
 0x3c1   : > { %v6099_v27 = vadd.f32 %v6098_v18, %v6097_v19  ;;  %v6204_v60 = vpop.f32.mrb[215].mxu0 }
 0x3c2   : > { %v9767_v14 = vadd.f32 %v6202_v12, %v6090_v53  ;;  %v6205_v39 = vadd.f32 %v6204_v60, %v6203_v13 }
 0x3c4   : > { %v9769_v15 = vadd.f32 %v6205_v39, %v6093_v51 }
 0x3c5   : > { %v6100_v3 = vpop.f32.mrb[188].mxu1 }
 0x3c6   : > { %v6101_v45 = vpop.f32.mrb[189].mxu1  ;;  %v6206_v38 = vpop.f32.mrb[216].mxu0 }
 0x3c7   : > { %v6102_v29 = vadd.f32 %v6101_v45, %v6100_v3  ;;  %v6103_v31 = vpop.f32.mrb[190].mxu1  ;;  %v6207_v28 = vpop.f32.mrb[217].mxu0 }
 0x3c8   : > { %v6208_v46 = vadd.f32 %v6207_v28, %v6206_v38  ;;  %v6104_v49 = vpop.f32.mrb[191].mxu1  ;;  %v6209_v58 = vpop.f32.mrb[218].mxu0 }
 0x3c9   : > { %v6105_v9 = vadd.f32 %v6104_v49, %v6103_v31  ;;  %v6210_v0 = vpop.f32.mrb[219].mxu0 }
 0x3ca   : > { %v9771_v23 = vadd.f32 %v6208_v46, %v6096_v7  ;;  %v6211_v20 = vadd.f32 %v6210_v0, %v6209_v58 }
 0x3cc   : > { %v9773_v40 = vadd.f32 %v6211_v20, %v6099_v27 }
 0x3cd   : > { %v6234_v53 = vpop.f32.mrb[192].mxu1 }
 0x3ce   : > { %v6212_v57 = vpop.f32.mrb[220].mxu0  ;;  %v6235_v42 = vpop.f32.mrb[193].mxu1 }
 0x3cf   : > { %v6236_v54 = vadd.f32 %v6235_v42, %v6234_v53  ;;  %v6213_v61 = vpop.f32.mrb[221].mxu0  ;;  %v6237_v5 = vpop.f32.mrb[194].mxu1 }
 0x3d0   : > { %v6214_v51 = vadd.f32 %v6213_v61, %v6212_v57  ;;  %v6215_v17 = vpop.f32.mrb[222].mxu0  ;;  %v6238_v52 = vpop.f32.mrb[195].mxu1 }
 0x3d1   : > { %v4092_v16 = vadd.f32 %v6236_v54, %v9629_v37  ;;  %v6239_v2 = vadd.f32 %v6238_v52, %v6237_v5  ;;  %v6216_v43 = vpop.f32.mrb[223].mxu0 }
 0x3d2   : > { %v9776_v19 = vadd.f32 %v6214_v51, %v6102_v29  ;;  %v6217_v7 = vadd.f32 %v6216_v43, %v6215_v17 }
 0x3d3   : > { %v4095_v4 = vadd.f32 %v6239_v2, %v9639_v24 }
 0x3d4   : > { %v9779_v12 = vadd.f32 %v6217_v7, %v6105_v9 }
 0x3d5   : > { %v6240_v18 = vpop.f32.mrb[196].mxu1 }
 0x3d6   : > { %v6241_v13 = vpop.f32.mrb[197].mxu1  ;;  %v6346_v27 = vpop.f32.mrb[224].mxu0 }
 0x3d7   : > { %v6242_v60 = vadd.f32 %v6241_v13, %v6240_v18  ;;  %v6243_v39 = vpop.f32.mrb[198].mxu1  ;;  %v6347_v3 = vpop.f32.mrb[225].mxu0 }
 0x3d8   : > { %v6348_v45 = vadd.f32 %v6347_v3, %v6346_v27  ;;  %v6244_v38 = vpop.f32.mrb[199].mxu1  ;;  %v6349_v31 = vpop.f32.mrb[226].mxu0 }
 0x3d9   : > { %v4100_v37 = vadd.f32 %v6242_v60, %v9642_v11  ;;  %v6245_v28 = vadd.f32 %v6244_v38, %v6243_v39  ;;  %v6350_v46 = vpop.f32.mrb[227].mxu0 }
 0x3da   : > { %v6351_v29 = vadd.f32 %v6350_v46, %v6349_v31  ;;  %v9782_v49 = vadd.f32 %v6348_v45, %v4092_v16 }
 0x3db   : > { %v4103_v24 = vadd.f32 %v6245_v28, %v9651_v50 }
 0x3dc   : > { %v9785_v58 = vadd.f32 %v6351_v29, %v4095_v4 }
 0x3dd   : > { %v6246_v9 = vpop.f32.mrb[200].mxu1 }
 0x3de   : > { %v6247_v0 = vpop.f32.mrb[201].mxu1  ;;  %v6352_v20 = vpop.f32.mrb[228].mxu0 }
 0x3df   : > { %v6248_v53 = vadd.f32 %v6247_v0, %v6246_v9  ;;  %v6249_v57 = vpop.f32.mrb[202].mxu1  ;;  %v6353_v42 = vpop.f32.mrb[229].mxu0 }
 0x3e0   : > { %v6354_v54 = vadd.f32 %v6353_v42, %v6352_v20  ;;  %v6250_v61 = vpop.f32.mrb[203].mxu1  ;;  %v6355_v5 = vpop.f32.mrb[230].mxu0 }
 0x3e1   : > { %v4108_v11 = vadd.f32 %v6248_v53, %v9654_v55  ;;  %v6251_v51 = vadd.f32 %v6250_v61, %v6249_v57  ;;  %v6356_v17 = vpop.f32.mrb[231].mxu0 }
 0x3e2   : > { %v6357_v52 = vadd.f32 %v6356_v17, %v6355_v5  ;;  %v9788_v16 = vadd.f32 %v6354_v54, %v4100_v37 }
 0x3e3   : > { %v4111_v50 = vadd.f32 %v6251_v51, %v9663_v56 }
 0x3e4   : > { %v9791_v2 = vadd.f32 %v6357_v52, %v4103_v24 }
 0x3e5   : > { %v6252_v43 = vpop.f32.mrb[204].mxu1 }
 0x3e6   : > { %v6253_v7 = vpop.f32.mrb[205].mxu1  ;;  %v6358_v4 = vpop.f32.mrb[232].mxu0 }
 0x3e7   : > { %v6254_v18 = vadd.f32 %v6253_v7, %v6252_v43  ;;  %v6255_v13 = vpop.f32.mrb[206].mxu1  ;;  %v6359_v27 = vpop.f32.mrb[233].mxu0 }
 0x3e8   : > { %v6360_v60 = vadd.f32 %v6359_v27, %v6358_v4  ;;  %v6256_v39 = vpop.f32.mrb[207].mxu1  ;;  %v6361_v3 = vpop.f32.mrb[234].mxu0 }
 0x3e9   : > { %v4116_v55 = vadd.f32 %v6254_v18, %v9666_v62  ;;  %v6257_v45 = vadd.f32 %v6256_v39, %v6255_v13  ;;  %v6362_v38 = vpop.f32.mrb[235].mxu0 }
 0x3ea   : > { %v6363_v31 = vadd.f32 %v6362_v38, %v6361_v3  ;;  %v9794_v37 = vadd.f32 %v6360_v60, %v4108_v11 }
 0x3eb   : > { %v4119_v56 = vadd.f32 %v6257_v45, %v9675_v8 }
 0x3ec   : > { %v9797_v28 = vadd.f32 %v6363_v31, %v4111_v50 }
 0x3ed   : > { %v6258_v46 = vpop.f32.mrb[208].mxu1 }
 0x3ee   : > { %v6259_v29 = vpop.f32.mrb[209].mxu1  ;;  %v6364_v24 = vpop.f32.mrb[236].mxu0 }
 0x3ef   : > { %v6260_v9 = vadd.f32 %v6259_v29, %v6258_v46  ;;  %v6261_v0 = vpop.f32.mrb[210].mxu1  ;;  %v6365_v20 = vpop.f32.mrb[237].mxu0 }
 0x3f0   : > { %v6366_v53 = vadd.f32 %v6365_v20, %v6364_v24  ;;  %v6262_v57 = vpop.f32.mrb[211].mxu1  ;;  %v6367_v42 = vpop.f32.mrb[238].mxu0 }
 0x3f1   : > { %v4124_v62 = vadd.f32 %v6260_v9, %v9684_v26  ;;  %v6263_v54 = vadd.f32 %v6262_v57, %v6261_v0  ;;  %v6368_v61 = vpop.f32.mrb[239].mxu0 }
 0x3f2   : > { %v6369_v5 = vadd.f32 %v6368_v61, %v6367_v42  ;;  %v9800_v11 = vadd.f32 %v6366_v53, %v4116_v55 }
 0x3f3   : > { %v4127_v8 = vadd.f32 %v6263_v54, %v9694_v35 }
 0x3f4   : > { %v9803_v51 = vadd.f32 %v6369_v5, %v4119_v56 }
 0x3f5   : > { %v6264_v17 = vpop.f32.mrb[212].mxu1 }
 0x3f6   : > { %v6265_v52 = vpop.f32.mrb[213].mxu1  ;;  %v6370_v50 = vpop.f32.mrb[240].mxu0 }
 0x3f7   : > { %v6266_v43 = vadd.f32 %v6265_v52, %v6264_v17  ;;  %v6267_v7 = vpop.f32.mrb[214].mxu1  ;;  %v6371_v4 = vpop.f32.mrb[241].mxu0 }
 0x3f8   : > { %v6372_v18 = vadd.f32 %v6371_v4, %v6370_v50  ;;  %v6268_v13 = vpop.f32.mrb[215].mxu1  ;;  %v6373_v27 = vpop.f32.mrb[242].mxu0 }
 0x3f9   : > { %v4132_v26 = vadd.f32 %v6266_v43, %v9696_v63  ;;  %v6269_v60 = vadd.f32 %v6268_v13, %v6267_v7  ;;  %v6374_v39 = vpop.f32.mrb[243].mxu0 }
 0x3fa   : > { %v6375_v3 = vadd.f32 %v6374_v39, %v6373_v27  ;;  %v9806_v55 = vadd.f32 %v6372_v18, %v4124_v62 }
 0x3fb   : > { %v4135_v35 = vadd.f32 %v6269_v60, %v9704_v25 }
 0x3fc   : > { %v9809_v45 = vadd.f32 %v6375_v3, %v4127_v8 }
 0x3fd   : > { %v6270_v38 = vpop.f32.mrb[216].mxu1 }
 0x3fe   : > { %v6271_v31 = vpop.f32.mrb[217].mxu1  ;;  %v6376_v56 = vpop.f32.mrb[244].mxu0 }
 0x3ff   : > { %v6272_v46 = vadd.f32 %v6271_v31, %v6270_v38  ;;  %v6273_v29 = vpop.f32.mrb[218].mxu1  ;;  %v6377_v24 = vpop.f32.mrb[245].mxu0 }
 0x400   : > { %v6378_v9 = vadd.f32 %v6377_v24, %v6376_v56  ;;  %v6274_v0 = vpop.f32.mrb[219].mxu1  ;;  %v6379_v20 = vpop.f32.mrb[246].mxu0 }
 0x401   : > { %v4140_v63 = vadd.f32 %v6272_v46, %v9706_v32  ;;  %v6275_v53 = vadd.f32 %v6274_v0, %v6273_v29  ;;  %v6380_v57 = vpop.f32.mrb[247].mxu0 }
 0x402   : > { %v6381_v42 = vadd.f32 %v6380_v57, %v6379_v20  ;;  %v9812_v62 = vadd.f32 %v6378_v9, %v4132_v26 }
 0x403   : > { %v4143_v25 = vadd.f32 %v6275_v53, %v9714_v30 }
 0x404   : > { %v9815_v54 = vadd.f32 %v6381_v42, %v4135_v35 }
 0x405   : > { %v6276_v61 = vpop.f32.mrb[220].mxu1 }
 0x406   : > { %v6277_v5 = vpop.f32.mrb[221].mxu1  ;;  %v6382_v8 = vpop.f32.mrb[248].mxu0 }
 0x407   : > { %v6278_v17 = vadd.f32 %v6277_v5, %v6276_v61  ;;  %v6279_v52 = vpop.f32.mrb[222].mxu1  ;;  %v6383_v50 = vpop.f32.mrb[249].mxu0 }
 0x408   : > { %v6384_v43 = vadd.f32 %v6383_v50, %v6382_v8  ;;  %v6280_v7 = vpop.f32.mrb[223].mxu1  ;;  %v6385_v4 = vpop.f32.mrb[250].mxu0 }
 0x409   : > { %v4148_v32 = vadd.f32 %v6278_v17, %v9716_v41  ;;  %v6281_v18 = vadd.f32 %v6280_v7, %v6279_v52  ;;  %v6386_v13 = vpop.f32.mrb[251].mxu0 }
 0x40a   : > { %v6387_v27 = vadd.f32 %v6386_v13, %v6385_v4  ;;  %v9818_v26 = vadd.f32 %v6384_v43, %v4140_v63 }
 0x40b   : > { %v4151_v30 = vadd.f32 %v6281_v18, %v9724_v21 }
 0x40c   : > { %v9821_v60 = vadd.f32 %v6387_v27, %v4143_v25 }
 0x40d   : > { %v6282_v39 = vpop.f32.mrb[224].mxu1 }
 0x40e   : > { %v6283_v3 = vpop.f32.mrb[225].mxu1  ;;  %v6388_v35 = vpop.f32.mrb[252].mxu0 }
 0x40f   : > { %v6284_v38 = vadd.f32 %v6283_v3, %v6282_v39  ;;  %v6285_v31 = vpop.f32.mrb[226].mxu1  ;;  %v6389_v56 = vpop.f32.mrb[253].mxu0 }
 0x410   : > { %v6390_v46 = vadd.f32 %v6389_v56, %v6388_v35  ;;  %v6286_v29 = vpop.f32.mrb[227].mxu1  ;;  %v6391_v24 = vpop.f32.mrb[254].mxu0 }
 0x411   : > { %v4156_v41 = vadd.f32 %v6284_v38, %v9726_v33  ;;  %v6287_v9 = vadd.f32 %v6286_v29, %v6285_v31  ;;  %v6392_v0 = vpop.f32.mrb[255].mxu0 }
 0x412   : > { %v6393_v20 = vadd.f32 %v6392_v0, %v6391_v24  ;;  %v9824_v63 = vadd.f32 %v6390_v46, %v4148_v32 }
 0x413   : > { %v4159_v21 = vadd.f32 %v6287_v9, %v9734_v10 }
 0x414   : > { %v9827_v53 = vadd.f32 %v6393_v20, %v4151_v30 }
 0x415   : > { %v6288_v57 = vpop.f32.mrb[228].mxu1 }
 0x416   : > { %v6289_v42 = vpop.f32.mrb[229].mxu1  ;;  %v6394_v25 = vpop.f32.mrb[0].mxu0 }
 0x417   : > { %v6290_v61 = vadd.f32 %v6289_v42, %v6288_v57  ;;  %v6291_v5 = vpop.f32.mrb[230].mxu1  ;;  %v6395_v8 = vpop.f32.mrb[1].mxu0 }
 0x418   : > { %v6396_v17 = vadd.f32 %v6395_v8, %v6394_v25  ;;  %v6292_v52 = vpop.f32.mrb[231].mxu1  ;;  %v6397_v50 = vpop.f32.mrb[2].mxu0 }
 0x419   : > { %v4164_v33 = vadd.f32 %v6290_v61, %v9736_v47  ;;  %v6293_v43 = vadd.f32 %v6292_v52, %v6291_v5  ;;  %v6398_v7 = vpop.f32.mrb[3].mxu0 }
 0x41a   : > { %v6399_v4 = vadd.f32 %v6398_v7, %v6397_v50  ;;  %v9830_v32 = vadd.f32 %v6396_v17, %v4156_v41 }
 0x41b   : > { %v4167_v10 = vadd.f32 %v6293_v43, %v9744_v48 }
 0x41c   : > { %v9833_v18 = vadd.f32 %v6399_v4, %v4159_v21 }
 0x41d   : > { %v6294_v13 = vpop.f32.mrb[232].mxu1 }
 0x41e   : > { %v6295_v27 = vpop.f32.mrb[233].mxu1  ;;  %v6400_v30 = vpop.f32.mrb[4].mxu0 }
 0x41f   : > { %v6296_v39 = vadd.f32 %v6295_v27, %v6294_v13  ;;  %v6297_v3 = vpop.f32.mrb[234].mxu1  ;;  %v6401_v35 = vpop.f32.mrb[5].mxu0 }
 0x420   : > { %v6402_v38 = vadd.f32 %v6401_v35, %v6400_v30  ;;  %v6298_v31 = vpop.f32.mrb[235].mxu1  ;;  %v6403_v56 = vpop.f32.mrb[6].mxu0 }
 0x421   : > { %v4172_v47 = vadd.f32 %v6296_v39, %v9746_v59  ;;  %v6299_v46 = vadd.f32 %v6298_v31, %v6297_v3  ;;  %v6404_v29 = vpop.f32.mrb[7].mxu0 }
 0x422   : > { %v6405_v24 = vadd.f32 %v6404_v29, %v6403_v56  ;;  %v9836_v41 = vadd.f32 %v6402_v38, %v4164_v33 }
 0x423   : > { %v4175_v48 = vadd.f32 %v6299_v46, %v9754_v6 }
 0x424   : > { %v9839_v9 = vadd.f32 %v6405_v24, %v4167_v10 }
 0x425   : > { %v6300_v0 = vpop.f32.mrb[236].mxu1 }
 0x426   : > { %v6301_v20 = vpop.f32.mrb[237].mxu1  ;;  %v6406_v21 = vpop.f32.mrb[8].mxu0 }
 0x427   : > { %v6302_v57 = vadd.f32 %v6301_v20, %v6300_v0  ;;  %v6303_v42 = vpop.f32.mrb[238].mxu1  ;;  %v6407_v25 = vpop.f32.mrb[9].mxu0 }
 0x428   : > { %v6408_v61 = vadd.f32 %v6407_v25, %v6406_v21  ;;  %v6304_v5 = vpop.f32.mrb[239].mxu1  ;;  %v6409_v8 = vpop.f32.mrb[10].mxu0 }
 0x429   : > { %v4180_v59 = vadd.f32 %v6302_v57, %v9756_v22  ;;  %v6305_v17 = vadd.f32 %v6304_v5, %v6303_v42  ;;  %v6410_v52 = vpop.f32.mrb[11].mxu0 }
 0x42a   : > { %v6411_v50 = vadd.f32 %v6410_v52, %v6409_v8  ;;  %v9842_v33 = vadd.f32 %v6408_v61, %v4172_v47 }
 0x42b   : > { %v4183_v6 = vadd.f32 %v6305_v17, %v9761_v1 }
 0x42c   : > { %v9845_v43 = vadd.f32 %v6411_v50, %v4175_v48 }
 0x42d   : > { %v6306_v7 = vpop.f32.mrb[240].mxu1 }
 0x42e   : > { %v6307_v4 = vpop.f32.mrb[241].mxu1  ;;  %v6412_v10 = vpop.f32.mrb[12].mxu0 }
 0x42f   : > { %v6308_v13 = vadd.f32 %v6307_v4, %v6306_v7  ;;  %v6309_v27 = vpop.f32.mrb[242].mxu1  ;;  %v6413_v30 = vpop.f32.mrb[13].mxu0 }
 0x430   : > { %v6414_v39 = vadd.f32 %v6413_v30, %v6412_v10  ;;  %v6310_v3 = vpop.f32.mrb[243].mxu1  ;;  %v6415_v35 = vpop.f32.mrb[14].mxu0 }
 0x431   : > { %v4188_v22 = vadd.f32 %v6308_v13, %v9763_v36  ;;  %v6311_v38 = vadd.f32 %v6310_v3, %v6309_v27  ;;  %v6416_v31 = vpop.f32.mrb[15].mxu0 }
 0x432   : > { %v6417_v56 = vadd.f32 %v6416_v31, %v6415_v35  ;;  %v9848_v47 = vadd.f32 %v6414_v39, %v4180_v59 }
 0x433   : > { %v4191_v1 = vadd.f32 %v6311_v38, %v9765_v44 }
 0x434   : > { %v9851_v46 = vadd.f32 %v6417_v56, %v4183_v6 }
 0x435   : > { %v6312_v29 = vpop.f32.mrb[244].mxu1 }
 0x436   : > { %v6313_v24 = vpop.f32.mrb[245].mxu1  ;;  %v6418_v48 = vpop.f32.mrb[16].mxu0 }
 0x437   : > { %v6314_v0 = vadd.f32 %v6313_v24, %v6312_v29  ;;  %v6315_v20 = vpop.f32.mrb[246].mxu1  ;;  %v6419_v21 = vpop.f32.mrb[17].mxu0 }
 0x438   : > { %v6420_v57 = vadd.f32 %v6419_v21, %v6418_v48  ;;  %v6316_v42 = vpop.f32.mrb[247].mxu1  ;;  %v6421_v25 = vpop.f32.mrb[18].mxu0 }
 0x439   : > { %v4196_v36 = vadd.f32 %v6314_v0, %v9767_v14  ;;  %v6317_v61 = vadd.f32 %v6316_v42, %v6315_v20  ;;  %v6422_v5 = vpop.f32.mrb[19].mxu0 }
 0x43a   : > { %v6423_v8 = vadd.f32 %v6422_v5, %v6421_v25  ;;  %v9854_v59 = vadd.f32 %v6420_v57, %v4188_v22  ;;  %v2852_v25 = vld [vmem:[%s10073_s4] sm:$0x3]  ;;  %v10909_v5 = vsub.s32 0, %v10899_v34 }
 0x43b   : > { %v4199_v44 = vadd.f32 %v6317_v61, %v9769_v15 }
 0x43c   : > { %v9857_v17 = vadd.f32 %v6423_v8, %v4191_v1  ;;  %v9874_v8 = vrot.slane %v2852_v25, %v10909_v5 }
 0x43d   : > { %v6318_v52 = vpop.f32.mrb[248].mxu1 }
 0x43e   : > { %v6319_v50 = vpop.f32.mrb[249].mxu1  ;;  %v6424_v6 = vpop.f32.mrb[20].mxu0 }
 0x43f   : > { %v6320_v7 = vadd.f32 %v6319_v50, %v6318_v52  ;;  %v6321_v4 = vpop.f32.mrb[250].mxu1  ;;  %v6425_v10 = vpop.f32.mrb[21].mxu0  ;;  %v10910_v50 = vsub.s32 1, %v10899_v34 }
 0x440   : > { %v6426_v13 = vadd.f32 %v6425_v10, %v6424_v6  ;;  %v6322_v27 = vpop.f32.mrb[251].mxu1  ;;  %v6427_v30 = vpop.f32.mrb[22].mxu0 }
 0x441   : > { %v4204_v14 = vadd.f32 %v6320_v7, %v9771_v23  ;;  %v6323_v39 = vadd.f32 %v6322_v27, %v6321_v4  ;;  %v6428_v3 = vpop.f32.mrb[23].mxu0  ;;  %v9881_v6 = vrot.slane %v2852_v25, %v10910_v50 }
 0x442   : > { %v6429_v35 = vadd.f32 %v6428_v3, %v6427_v30  ;;  %v9860_v22 = vadd.f32 %v6426_v13, %v4196_v36 }
 0x443   : > { %v4207_v15 = vadd.f32 %v6323_v39, %v9773_v40 }
 0x444   : > { %v9863_v38 = vadd.f32 %v6429_v35, %v4199_v44 }
 0x445   : > { %v6324_v31 = vpop.f32.mrb[252].mxu1 }
 0x446   : > { %v6325_v56 = vpop.f32.mrb[253].mxu1  ;;  %v6430_v1 = vpop.f32.mrb[24].mxu0 }
 0x447   : > { %v6326_v29 = vadd.f32 %v6325_v56, %v6324_v31  ;;  %v6327_v24 = vpop.f32.mrb[254].mxu1  ;;  %v6431_v48 = vpop.f32.mrb[25].mxu0 }
 0x448   : > { %v6432_v0 = vadd.f32 %v6431_v48, %v6430_v1  ;;  %v6328_v20 = vpop.f32.mrb[255].mxu1  ;;  %v6433_v21 = vpop.f32.mrb[26].mxu0 }
 0x449   : > { %v4212_v23 = vadd.f32 %v6326_v29, %v9776_v19  ;;  %v6329_v57 = vadd.f32 %v6328_v20, %v6327_v24  ;;  %v6434_v42 = vpop.f32.mrb[27].mxu0 }
 0x44a   : > { %v6435_v40 = vadd.f32 %v6434_v42, %v6433_v21  ;;  %v9869_v36 = vadd.f32 %v6432_v0, %v4204_v14 }
 0x44b   : > { %v4215_v61 = vadd.f32 %v6329_v57, %v9779_v12 }
 0x44c   : > { %v9876_v44 = vadd.f32 %v6435_v40, %v4207_v15 }
 0x44d   : > { %v6532_v52 = vpop.f32.mrb[0].mxu1 }
 0x44e   : > { %v4422_v19 = vadd.f32 %v6532_v52, %v9788_v16  ;;  %v6436_v7 = vpop.f32.mrb[28].mxu0  ;;  %v4413_v4 = vpop.f32.mrb[1].mxu1 }
 0x44f   : > { %v4414_v10 = vadd.f32 %v4413_v4, %v9782_v49  ;;  %v6437_v13 = vpop.f32.mrb[29].mxu0  ;;  %v6533_v27 = vpop.f32.mrb[2].mxu1 }
 0x450   : > { %v4546_v12 = vmul.f32 %v9874_v8, %v4422_v19  ;;  %v6438_v30 = vadd.f32 %v6437_v13, %v6436_v7  ;;  %v4425_v14 = vadd.f32 %v6533_v27, %v9791_v2  ;;  %v6439_v39 = vpop.f32.mrb[30].mxu0  ;;  %v4416_v3 = vpop.f32.mrb[3].mxu1 }
 0x451   : > { %v4544_v16 = vmul.f32 %v9874_v8, %v4414_v10  ;;  %v4417_v34 = vadd.f32 %v4416_v3, %v9785_v58  ;;  %v6440_v35 = vpop.f32.mrb[31].mxu0 }
 0x452   : > { %v4582_v15 = vadd.f32 %v9881_v6, %v4546_v12  ;;  %v4547_v31 = vmul.f32 %v9874_v8, %v4425_v14  ;;  %v6441_v49 = vadd.f32 %v6440_v35, %v6439_v39  ;;  %v9890_v56 = vadd.f32 %v6438_v30, %v4212_v23 }
 0x453   : > { %v4580_v1 = vadd.f32 %v9881_v6, %v4544_v16  ;;  %v4545_v29 = vmul.f32 %v9874_v8, %v4417_v34 }
 0x454   : > { %v4614_v2 = vmax.f32 %v4582_v15, 0.0  ;;  %v4583_v24 = vadd.f32 %v9881_v6, %v4547_v31  ;;  %v9895_v48 = vadd.f32 %v6441_v49, %v4215_v61 }
 0x455   : > { %v4612_v0 = vmax.f32 %v4580_v1, 0.0  ;;  %v4581_v58 = vadd.f32 %v9881_v6, %v4545_v29  ;;  %v6536_v20 = vpop.f32.mrb[4].mxu1 }
 0x456   : > { %4646 = vst [vmem:[%s9900_s11 + $0x10] sm:$0xff] %v4614_v2  ;;  %v4615_v21 = vmax.f32 %v4583_v24, 0.0  ;;  %v4438_v23 = vadd.f32 %v6536_v20, %v9800_v11  ;;  %v4429_v57 = vpop.f32.mrb[5].mxu1 }
 0x457   : > { %4644 = vst [vmem:[%s9900_s11] sm:$0xff] %v4612_v0  ;;  %v4613_v42 = vmax.f32 %v4581_v58, 0.0  ;;  %v4430_v25 = vadd.f32 %v4429_v57, %v9794_v37  ;;  %v6537_v40 = vpop.f32.mrb[6].mxu1 }
 0x458   : > { %4647 = vst [vmem:[%s9900_s11 + $0x18] sm:$0xff] %v4615_v21  ;;  %v4550_v61 = vmul.f32 %v9874_v8, %v4438_v23  ;;  %v4441_v5 = vadd.f32 %v6537_v40, %v9803_v51  ;;  %v4432_v52 = vpop.f32.mrb[7].mxu1 }
 0x459   : > { %4645 = vst [vmem:[%s9900_s11 + $0x8] sm:$0xff] %v4613_v42  ;;  %v4548_v19 = vmul.f32 %v9874_v8, %v4430_v25  ;;  %v4433_v50 = vadd.f32 %v4432_v52, %v9797_v28 }
 0x45a   : > { %v4586_v11 = vadd.f32 %v9881_v6, %v4550_v61  ;;  %v4551_v7 = vmul.f32 %v9874_v8, %v4441_v5 }
 0x45b   : > { %v4584_v37 = vadd.f32 %v9881_v6, %v4548_v19  ;;  %v4549_v4 = vmul.f32 %v9874_v8, %v4433_v50 }
 0x45c   : > { %v4618_v10 = vmax.f32 %v4586_v11, 0.0  ;;  %v4587_v13 = vadd.f32 %v9881_v6, %v4551_v7 }
 0x45d   : > { %v4616_v51 = vmax.f32 %v4584_v37, 0.0  ;;  %v4585_v27 = vadd.f32 %v9881_v6, %v4549_v4  ;;  %v6540_v12 = vpop.f32.mrb[8].mxu1 }
 0x45e   : > { %4650 = vst [vmem:[%s9900_s11 + $0x30] sm:$0xff] %v4618_v10  ;;  %v4619_v30 = vmax.f32 %v4587_v13, 0.0  ;;  %v4454_v28 = vadd.f32 %v6540_v12, %v9812_v62  ;;  %v4445_v14 = vpop.f32.mrb[9].mxu1 }
 0x45f   : > { %4648 = vst [vmem:[%s9900_s11 + $0x20] sm:$0xff] %v4616_v51  ;;  %v4617_v39 = vmax.f32 %v4585_v27, 0.0  ;;  %v4446_v3 = vadd.f32 %v4445_v14, %v9806_v55  ;;  %v6541_v16 = vpop.f32.mrb[10].mxu1 }
 0x460   : > { %4651 = vst [vmem:[%s9900_s11 + $0x38] sm:$0xff] %v4619_v30  ;;  %v4554_v34 = vmul.f32 %v9874_v8, %v4454_v28  ;;  %v4457_v35 = vadd.f32 %v6541_v16, %v9815_v54  ;;  %v4448_v15 = vpop.f32.mrb[11].mxu1 }
 0x461   : > { %4649 = vst [vmem:[%s9900_s11 + $0x28] sm:$0xff] %v4617_v39  ;;  %v4552_v31 = vmul.f32 %v9874_v8, %v4446_v3  ;;  %v4449_v49 = vadd.f32 %v4448_v15, %v9809_v45 }
 0x462   : > { %v4590_v62 = vadd.f32 %v9881_v6, %v4554_v34  ;;  %v4555_v1 = vmul.f32 %v9874_v8, %v4457_v35 }
 0x463   : > { %v4588_v55 = vadd.f32 %v9881_v6, %v4552_v31  ;;  %v4553_v29 = vmul.f32 %v9874_v8, %v4449_v49 }
 0x464   : > { %v4622_v2 = vmax.f32 %v4590_v62, 0.0  ;;  %v4591_v24 = vadd.f32 %v9881_v6, %v4555_v1 }
 0x465   : > { %v4620_v54 = vmax.f32 %v4588_v55, 0.0  ;;  %v4589_v0 = vadd.f32 %v9881_v6, %v4553_v29  ;;  %v6544_v58 = vpop.f32.mrb[12].mxu1 }
 0x466   : > { %4654 = vst [vmem:[%s9900_s11 + $0x50] sm:$0xff] %v4622_v2  ;;  %v4623_v20 = vmax.f32 %v4591_v24, 0.0  ;;  %v4470_v45 = vadd.f32 %v6544_v58, %v9824_v63  ;;  %v4461_v21 = vpop.f32.mrb[13].mxu1 }
 0x467   : > { %4652 = vst [vmem:[%s9900_s11 + $0x40] sm:$0xff] %v4620_v54  ;;  %v4621_v23 = vmax.f32 %v4589_v0, 0.0  ;;  %v4462_v57 = vadd.f32 %v4461_v21, %v9818_v26  ;;  %v6545_v42 = vpop.f32.mrb[14].mxu1 }
 0x468   : > { %4655 = vst [vmem:[%s9900_s11 + $0x58] sm:$0xff] %v4623_v20  ;;  %v4558_v25 = vmul.f32 %v9874_v8, %v4470_v45  ;;  %v4473_v40 = vadd.f32 %v6545_v42, %v9827_v53  ;;  %v4464_v61 = vpop.f32.mrb[15].mxu1 }
 0x469   : > { %4653 = vst [vmem:[%s9900_s11 + $0x48] sm:$0xff] %v4621_v23  ;;  %v4556_v5 = vmul.f32 %v9874_v8, %v4462_v57  ;;  %v4465_v52 = vadd.f32 %v4464_v61, %v9821_v60 }
 0x46a   : > { %v4594_v63 = vadd.f32 %v9881_v6, %v4558_v25  ;;  %v4559_v19 = vmul.f32 %v9874_v8, %v4473_v40 }
 0x46b   : > { %v4592_v26 = vadd.f32 %v9881_v6, %v4556_v5  ;;  %v4557_v50 = vmul.f32 %v9874_v8, %v4465_v52 }
 0x46c   : > { %v4626_v11 = vmax.f32 %v4594_v63, 0.0  ;;  %v4595_v7 = vadd.f32 %v9881_v6, %v4559_v19 }
 0x46d   : > { %v4624_v53 = vmax.f32 %v4592_v26, 0.0  ;;  %v4593_v37 = vadd.f32 %v9881_v6, %v4557_v50  ;;  %v6548_v4 = vpop.f32.mrb[16].mxu1 }
 0x46e   : > { %4658 = vst [vmem:[%s9900_s11 + $0x70] sm:$0xff] %v4626_v11  ;;  %v4627_v10 = vmax.f32 %v4595_v7, 0.0  ;;  %v4486_v60 = vadd.f32 %v6548_v4, %v9836_v41  ;;  %v4477_v13 = vpop.f32.mrb[17].mxu1 }
 0x46f   : > { %4656 = vst [vmem:[%s9900_s11 + $0x60] sm:$0xff] %v4624_v53  ;;  %v4625_v51 = vmax.f32 %v4593_v37, 0.0  ;;  %v4478_v27 = vadd.f32 %v4477_v13, %v9830_v32  ;;  %v6549_v12 = vpop.f32.mrb[18].mxu1 }
 0x470   : > { %4659 = vst [vmem:[%s9900_s11 + $0x78] sm:$0xff] %v4627_v10  ;;  %v4562_v30 = vmul.f32 %v9874_v8, %v4486_v60  ;;  %v4489_v28 = vadd.f32 %v6549_v12, %v9839_v9  ;;  %v4480_v14 = vpop.f32.mrb[19].mxu1 }
 0x471   : > { %4657 = vst [vmem:[%s9900_s11 + $0x68] sm:$0xff] %v4625_v51  ;;  %v4560_v39 = vmul.f32 %v9874_v8, %v4478_v27  ;;  %v4481_v3 = vadd.f32 %v4480_v14, %v9833_v18 }
 0x472   : > { %v4598_v41 = vadd.f32 %v9881_v6, %v4562_v30  ;;  %v4563_v16 = vmul.f32 %v9874_v8, %v4489_v28 }
 0x473   : > { %v4596_v32 = vadd.f32 %v9881_v6, %v4560_v39  ;;  %v4561_v34 = vmul.f32 %v9874_v8, %v4481_v3 }
 0x474   : > { %v4630_v35 = vmax.f32 %v4598_v41, 0.0  ;;  %v4599_v15 = vadd.f32 %v9881_v6, %v4563_v16 }
 0x475   : > { %v4628_v9 = vmax.f32 %v4596_v32, 0.0  ;;  %v4597_v31 = vadd.f32 %v9881_v6, %v4561_v34  ;;  %v6552_v49 = vpop.f32.mrb[20].mxu1 }
 0x476   : > { %4662 = vst [vmem:[%s9900_s11 + $0x90] sm:$0xff] %v4630_v35  ;;  %v4631_v62 = vmax.f32 %v4599_v15, 0.0  ;;  %v4502_v18 = vadd.f32 %v6552_v49, %v9848_v47  ;;  %v4493_v1 = vpop.f32.mrb[21].mxu1 }
 0x477   : > { %4660 = vst [vmem:[%s9900_s11 + $0x80] sm:$0xff] %v4628_v9  ;;  %v4629_v55 = vmax.f32 %v4597_v31, 0.0  ;;  %v4494_v29 = vadd.f32 %v4493_v1, %v9842_v33  ;;  %v6553_v2 = vpop.f32.mrb[22].mxu1 }
 0x478   : > { %4663 = vst [vmem:[%s9900_s11 + $0x98] sm:$0xff] %v4631_v62  ;;  %v4566_v24 = vmul.f32 %v9874_v8, %v4502_v18  ;;  %v4505_v54 = vadd.f32 %v6553_v2, %v9851_v46  ;;  %v4496_v0 = vpop.f32.mrb[23].mxu1 }
 0x479   : > { %4661 = vst [vmem:[%s9900_s11 + $0x88] sm:$0xff] %v4629_v55  ;;  %v4564_v58 = vmul.f32 %v9874_v8, %v4494_v29  ;;  %v4497_v20 = vadd.f32 %v4496_v0, %v9845_v43 }
 0x47a   : > { %v4602_v47 = vadd.f32 %v9881_v6, %v4566_v24  ;;  %v4567_v45 = vmul.f32 %v9874_v8, %v4505_v54 }
 0x47b   : > { %v4600_v33 = vadd.f32 %v9881_v6, %v4564_v58  ;;  %v4565_v21 = vmul.f32 %v9874_v8, %v4497_v20 }
 0x47c   : > { %v4634_v23 = vmax.f32 %v4602_v47, 0.0  ;;  %v4603_v57 = vadd.f32 %v9881_v6, %v4567_v45 }
 0x47d   : > { %v4632_v46 = vmax.f32 %v4600_v33, 0.0  ;;  %v4601_v42 = vadd.f32 %v9881_v6, %v4565_v21  ;;  %v6556_v25 = vpop.f32.mrb[24].mxu1 }
 0x47e   : > { %4666 = vst [vmem:[%s9900_s11 + $0xb0] sm:$0xff] %v4634_v23  ;;  %v4635_v40 = vmax.f32 %v4603_v57, 0.0  ;;  %v4518_v43 = vadd.f32 %v6556_v25, %v9860_v22  ;;  %v4509_v61 = vpop.f32.mrb[25].mxu1 }
 0x47f   : > { %4664 = vst [vmem:[%s9900_s11 + $0xa0] sm:$0xff] %v4632_v46  ;;  %v4633_v5 = vmax.f32 %v4601_v42, 0.0  ;;  %v4510_v52 = vadd.f32 %v4509_v61, %v9854_v59  ;;  %v6557_v63 = vpop.f32.mrb[26].mxu1 }
 0x480   : > { %4667 = vst [vmem:[%s9900_s11 + $0xb8] sm:$0xff] %v4635_v40  ;;  %v4570_v19 = vmul.f32 %v9874_v8, %v4518_v43  ;;  %v4521_v26 = vadd.f32 %v6557_v63, %v9863_v38  ;;  %v4512_v50 = vpop.f32.mrb[27].mxu1 }
 0x481   : > { %4665 = vst [vmem:[%s9900_s11 + $0xa8] sm:$0xff] %v4633_v5  ;;  %v4568_v11 = vmul.f32 %v9874_v8, %v4510_v52  ;;  %v4513_v7 = vadd.f32 %v4512_v50, %v9857_v17 }
 0x482   : > { %v4606_v22 = vadd.f32 %v9881_v6, %v4570_v19  ;;  %v4571_v53 = vmul.f32 %v9874_v8, %v4521_v26 }
 0x483   : > { %v4604_v59 = vadd.f32 %v9881_v6, %v4568_v11  ;;  %v4569_v37 = vmul.f32 %v9874_v8, %v4513_v7 }
 0x484   : > { %v4638_v4 = vmax.f32 %v4606_v22, 0.0  ;;  %v4607_v10 = vadd.f32 %v9881_v6, %v4571_v53 }
 0x485   : > { %v4636_v38 = vmax.f32 %v4604_v59, 0.0  ;;  %v4605_v60 = vadd.f32 %v9881_v6, %v4569_v37  ;;  %v6560_v13 = vpop.f32.mrb[28].mxu1 }
 0x486   : > { %4670 = vst [vmem:[%s9900_s11 + $0xd0] sm:$0xff] %v4638_v4  ;;  %v4639_v51 = vmax.f32 %v4607_v10, 0.0  ;;  %v4534_v17 = vadd.f32 %v6560_v13, %v9890_v56  ;;  %v4525_v27 = vpop.f32.mrb[29].mxu1 }
 0x487   : > { %4668 = vst [vmem:[%s9900_s11 + $0xc0] sm:$0xff] %v4636_v38  ;;  %v4637_v12 = vmax.f32 %v4605_v60, 0.0  ;;  %v4526_v30 = vadd.f32 %v4525_v27, %v9869_v36  ;;  %v6561_v28 = vpop.f32.mrb[30].mxu1 }
 0x488   : > { %4671 = vst [vmem:[%s9900_s11 + $0xd8] sm:$0xff] %v4639_v51  ;;  %v4574_v14 = vmul.f32 %v9874_v8, %v4534_v17  ;;  %v4537_v39 = vadd.f32 %v6561_v28, %v9895_v48  ;;  %v4528_v3 = vpop.f32.mrb[31].mxu1 }
 0x489   : > { %4669 = vst [vmem:[%s9900_s11 + $0xc8] sm:$0xff] %v4637_v12  ;;  %v4572_v41 = vmul.f32 %v9874_v8, %v4526_v30  ;;  %v4529_v56 = vadd.f32 %v4528_v3, %v9876_v44 }
 0x48a   : > { %v4610_v16 = vadd.f32 %v9881_v6, %v4574_v14  ;;  %v4575_v32 = vmul.f32 %v9874_v8, %v4537_v39 }
 0x48b   : > { %v4608_v36 = vadd.f32 %v9881_v6, %v4572_v41  ;;  %v4573_v34 = vmul.f32 %v9874_v8, %v4529_v56 }
 0x48c   : > { %v4642_v48 = vmax.f32 %v4610_v16, 0.0  ;;  %v4611_v35 = vadd.f32 %v9881_v6, %v4575_v32 }
 0x48d   : > { %v4640_v15 = vmax.f32 %v4608_v36, 0.0  ;;  %v4609_v44 = vadd.f32 %v9881_v6, %v4573_v34 }
 0x48e   : > { %4674 = vst [vmem:[%s9900_s11 + $0xf0] sm:$0xff] %v4642_v48  ;;  %v4643_v9 = vmax.f32 %v4611_v35, 0.0 }
 0x48f   : > { %4672 = vst [vmem:[%s9900_s11 + $0xe0] sm:$0xff] %v4640_v15  ;;  %v4641_v8 = vmax.f32 %v4609_v44, 0.0 }
 0x490   : > { %4675 = vst [vmem:[%s9900_s11 + $0xf8] sm:$0xff] %v4643_v9 }
 0x491   : > { %4673 = vst [vmem:[%s9900_s11 + $0xe8] sm:$0xff] %v4641_v8 }
 0x492   : > { %6881 = shalt.err (!%p6878_p2)
}
 0x493   : > { %s6882_s6 = scalar_lea.hbm %s10020_s9, 4096  ;;  %s6886_s8 = scalar_lea.hbm %s10074_s5, 8192 }
 0x494   : > { %p6883_p13 = scmp.ne.s32.totalorder %s10020_s9, %s6882_s6  ;;  %p6887_p4 = scmp.lt.u32.totalorder %s10020_s9, %s10074_s5 }
 0x495   : > { %p6888_p5 = scmp.lt.u32.totalorder %s6886_s8, %s6882_s6  ;;  %p6890_p11 = scmp.lt.u32.totalorder %s6882_s6, %s10020_s9 }
 0x496   : > { %p6884_p6 = pnand %p6883_p13, %p10911_p0 }
 0x497   : > { %p6889_p8 = por %p6888_p5, %p6887_p4 }
 0x498   : > { %p6885_p10 = pneg %p6884_p6 }
 0x499   : > { %p6891_p1 = por %p6890_p11, %p6889_p8 }
 0x49b   : > { %p6892_p3 = pnand %p6891_p1, %p6885_p10 }
 0x49d   : > { %6895 = shalt.err (!%p6892_p3)
}
 0x49e   : > { %s6951_s28 = smov 128   ;;  %s6952_s15 = smov 8  }
 0x49f   : > { %6572 = dma.vmem_to_hbm [thread:$0]  (%p10911_p0), %s10022_s30, 4096, %s10020_s9, %s4677_s22, %s6951_s28, %s6951_s28, %s6952_s15  }
 0x4a0 PF: > { %s4705_s16 = sand.u32 1, %s6926_s18   ;;  %p10912_p7 = scmp.ne.s32.totalorder %s10294_s25, 0 }
 0x4a1   : > { %p10913_p9 = scmp.ge.s32.totalorder %s6938_s21, 2  ;;  %s4706_s12 = scalar_lea.sflag [#allocation5], %s4705_s16 }
 0x4a3   : > { %p6586_p12 = pnand %p10913_p9, %p10912_p7 }
 0x4a5   : > { %6921 = dma.done.wait (!%p6586_p12), %s4706_s12, 4096  }
 0x4a6   : > { %6923 = vsyncadd (!%p6586_p12), %s4706_s12, 4294963200  ;;  %p19_p2 = scmp.ge.s32.totalorder %s7093_s14, 4   ;;  %s10914_s18 = smov %s6930_s19 }
 0x4a7   : > { %s10915_s19 = smov %s6934_s20  ;;  %s10916_s20 = smov %s7109_s27 }
 0x4a8   : > { %s10917_s21 = smov %s7093_s14  ;;  %21 = sbr.rel (!%p19_p2) target bundleno = 6 (0x6), region = 93 }
 0x4af   :  { %4711 = vsyncpa [#allocation4], 1 }
 0x4b0   :  { %4713 = vsyncpa [#allocation4 + $0x1], 1 }
 0x4b1   :  { %4714 = vsyncpa [#allocation7], 1 }
 0x4b2   :  { %4715 = vsyncpa [#allocation5], 1 }
 0x4b3   :  { %4717 = vsyncpa [#allocation5 + $0x1], 1 }

</bundles_post_ra>
